<compile_context>
chip_gen: v5e
topology: v5e:2x2
jax: 0.10.0
libtpu: 0.0.40
codegen_flags: <defaults>
</compile_context>

<pallas_src>
import functools

import jax
import jax.numpy as jnp
from jax.experimental import pallas as pl
from jax.experimental.pallas import tpu as pltpu


# ----------------------------- configuration -------------------------------

COOR_SIZE = 3
FEAT_SIZE = 4
OUT_SIZE = 4
N_PROBE = 2
N_ENC_LAYERS = 1
N_DEC_LAYERS = 1
D_MODEL = 128
D_INNER = 64
N_HEAD = 8
D_HEAD = 16
LN_EPS = 1e-5

_ATTN_SCALE = 1.0 / (D_HEAD ** 0.5)

# dot_general dimension numbers, batch dim 0 = head (both patterns were proven
# to lower in the previous working kernel):
#   'hqd,hdk->hqk'
_DN_PROJ = (((2,), (1,)), ((0,), (0,)))
#   'hdk,hqk->hdq'
_DN_QK = (((2,), (2,)), ((0,), (0,)))


# ------------------------------ fused kernel --------------------------------


def _state_dae_kernel(cfg, idx, vcoor_ref, vfeat_ref, coor_ref,
                      vec128_ref, vec64_ref, w_in_ref, w_mid_ref, w_up_ref,
                      wqo_ref, wkv_ref, out_ref):
    """BB batch elements per grid step; everything stays resident in VMEM."""
    BB, Nv, Nd = cfg["BB"], cfg["Nv"], cfg["Nd"]
    n_layers = N_ENC_LAYERS + N_DEC_LAYERS

    def v128(i, n=1):
        return vec128_ref[i:i + n, :]            # (n, 128)

    def v64(i):
        return vec64_ref[i:i + 1, :]             # (1, 64)

    def layer_norm(x, g, b):
        mu = jnp.mean(x, axis=-1, keepdims=True)
        var = jnp.mean((x - mu) ** 2, axis=-1, keepdims=True)
        return (x - mu) * jax.lax.rsqrt(var + LN_EPS) * g + b

    def attn_core(q2, k2, v2, lq, lk):
        """Per-element multi-head attention core on already-projected q/k/v.

        q2: (lq, 128), k2/v2: (lk, 128).  Head split uses only cheap
        relayouts; scores / AV use head-batched dot_generals.
        """
        # (lq, 128) -> (H, lq, dh): static 16-lane slices + major-dim stack.
        qh = jnp.stack(
            [q2[:, h * D_HEAD:(h + 1) * D_HEAD] for h in range(N_HEAD)], axis=0)
        # (lk, 128) -> (H, dh, lk): one 2-D transpose + tile-aligned reshape
        # (dh = 16 is a multiple of the 8-row sublane tile, so the reshape is
        # a pure regrouping of tiles).
        kh = k2.T.reshape(N_HEAD, D_HEAD, lk)
        vh = v2.T.reshape(N_HEAD, D_HEAD, lk)

        s = jax.lax.dot_general(qh, kh, _DN_PROJ,
                                preferred_element_type=jnp.float32) * _ATTN_SCALE
        m = jnp.max(s, axis=-1, keepdims=True)
        e = jnp.exp(s - m)
        p = e / jnp.sum(e, axis=-1, keepdims=True)      # exact softmax
        # oT[h, d, q] = sum_k vh[h, d, k] * p[h, q, k]
        oT = jax.lax.dot_general(vh, p, _DN_QK,
                                 preferred_element_type=jnp.float32)  # (H,dh,lq)
        return oT.reshape(D_MODEL, lq).T                # (lq, 128)

    def mha_block(xq, lq, xkv, lk, li):
        """Full-width projections for all BB elements at once + per-element
        attention core + full-width output projection + residual + LN."""
        a = idx["attn"][li]
        wq = wqo_ref[2 * li]                            # (128, 128)
        wo = wqo_ref[2 * li + 1]                        # (128, 128)
        wkv_l = wkv_ref[li]                             # (128, 256) packed K|V

        q = jnp.dot(xq, wq, preferred_element_type=jnp.float32) + v128(a["bq"])
        kv = jnp.dot(xkv, wkv_l, preferred_element_type=jnp.float32)
        k = kv[:, :D_MODEL] + v128(a["bk"])
        v = kv[:, D_MODEL:] + v128(a["bv"])

        if BB == 1:
            ctx = attn_core(q, k, v, lq, lk)
        else:
            ctx = jnp.concatenate(
                [attn_core(q[b * lq:(b + 1) * lq],
                           k[b * lk:(b + 1) * lk],
                           v[b * lk:(b + 1) * lk], lq, lk)
                 for b in range(BB)], axis=0)

        out = jnp.dot(ctx, wo, preferred_element_type=jnp.float32) + v128(a["bo"])
        return layer_norm(xq + out, v128(a["g"]), v128(a["b"]))

    def ff_block(x, li):
        f = idx["ff"][li]
        w1 = w_mid_ref[1 + li]                          # (128, 64)
        w2 = w_up_ref[2 + li]                           # (64, 128)
        h = jnp.maximum(
            jnp.dot(x, w1, preferred_element_type=jnp.float32) + v64(f["b1"]), 0.0)
        y = jnp.dot(h, w2, preferred_element_type=jnp.float32) + v128(f["b2"])
        return layer_norm(x + y, v128(f["g"]), v128(f["b"]))

    # ----- load inputs, flatten batch into the matmul M dimension ------------
    vc = vcoor_ref[...].reshape(BB * Nv, COOR_SIZE)
    vf = vfeat_ref[...].reshape(BB * Nv, FEAT_SIZE)
    c = coor_ref[...].reshape(BB * Nd, COOR_SIZE)

    # ----- embedding MLPs (full-width, all BB elements at once) --------------
    w_c1 = w_in_ref[0:COOR_SIZE, :]
    w_f1 = w_in_ref[COOR_SIZE:COOR_SIZE + FEAT_SIZE, :]
    b_c1, b_f1 = v64(idx["coor_b1"]), v64(idx["feat_b1"])
    w_c2, w_f2 = w_up_ref[0], w_up_ref[1]
    b_c2, b_f2 = v128(idx["coor_b2"]), v128(idx["feat_b2"])

    def emb_coor(x):
        h = jnp.tanh(jnp.dot(x, w_c1, preferred_element_type=jnp.float32) + b_c1)
        return jnp.dot(h, w_c2, preferred_element_type=jnp.float32) + b_c2

    def emb_feat(x):
        h = jnp.tanh(jnp.dot(x, w_f1, preferred_element_type=jnp.float32) + b_f1)
        return jnp.dot(h, w_f2, preferred_element_type=jnp.float32) + b_f2

    coor_emb = emb_coor(c)                              # (BB*Nd, 128)
    encode_feat = emb_coor(vc) + emb_feat(vf)           # (BB*Nv, 128)

    # ----- StateEncoder: probe tokens attend to visible features -------------
    probe = v128(idx["probe"], N_PROBE)                 # (N_PROBE, 128)
    if BB == 1:
        enc_state = probe
    else:
        enc_state = jnp.concatenate([probe] * BB, axis=0)
    for l in range(N_ENC_LAYERS):
        enc_state = mha_block(enc_state, N_PROBE, encode_feat, Nv, l)
        enc_state = ff_block(enc_state, l)
    probe_emb = enc_state                               # (BB*N_PROBE, 128)

    # ----- StateDecoder: queries attend to merged [encode_feat ; probe_emb] --
    # (order swapped vs. the reference concat so the 8-row, tile-aligned
    #  operand comes first; attention is permutation-invariant over KV rows.)
    lm = Nv + N_PROBE
    if BB == 1:
        memory = jnp.concatenate([encode_feat, probe_emb], axis=0)
    else:
        memory = jnp.concatenate(
            [part for b in range(BB)
             for part in (encode_feat[b * Nv:(b + 1) * Nv],
                          probe_emb[b * N_PROBE:(b + 1) * N_PROBE])], axis=0)

    dec_state = coor_emb
    for l in range(N_DEC_LAYERS):
        li = N_ENC_LAYERS + l
        dec_state = mha_block(dec_state, Nd, memory, lm, li)
        dec_state = ff_block(dec_state, li)

    # ----- o_net (second layer runs lane-padded to 128, then sliced) ---------
    w_o1, b_o1 = w_mid_ref[0], v64(idx["o_b1"])
    w_o2, b_o2 = w_up_ref[2 + n_layers], v128(idx["o_b2"])
    h = jnp.tanh(jnp.dot(dec_state, w_o1, preferred_element_type=jnp.float32) + b_o1)
    out_full = jnp.dot(h, w_o2, preferred_element_type=jnp.float32) + b_o2
    out_ref[...] = out_full[:, :OUT_SIZE].reshape(BB, Nd, OUT_SIZE)


# ------------------------- parameter packing (host) --------------------------


def _pack_params(params):
    """Coalesce the ~34 leaves into 7 packed arrays + a static row index map."""
    f32 = jnp.float32
    layers = list(params["enc_layers"]) + list(params["dec_layers"])

    rows128, rows64 = [], []
    n128 = 0
    n64 = 0

    def add128(arr):
        nonlocal n128
        a = jnp.asarray(arr, f32).reshape(-1, D_MODEL)
        start = n128
        rows128.append(a)
        n128 += a.shape[0]
        return start

    def add64(arr):
        nonlocal n64
        a = jnp.asarray(arr, f32).reshape(-1, D_INNER)
        start = n64
        rows64.append(a)
        n64 += a.shape[0]
        return start

    idx = {}
    idx["coor_b2"] = add128(params["coor_mapping"]["b2"])
    idx["feat_b2"] = add128(params["feat_mapping"]["b2"])
    o_b2 = jnp.zeros((1, D_MODEL), f32)
    o_b2 = o_b2.at[:, :OUT_SIZE].set(
        jnp.asarray(params["o_net"]["b2"], f32).reshape(1, OUT_SIZE))
    idx["o_b2"] = add128(o_b2)
    idx["probe"] = add128(params["probe"])

    idx["coor_b1"] = add64(params["coor_mapping"]["b1"])
    idx["feat_b1"] = add64(params["feat_mapping"]["b1"])
    idx["o_b1"] = add64(params["o_net"]["b1"])

    attn_rows, ff_rows = [], []
    wq_wo, wkv_list, ff_w1, ff_w2 = [], [], [], []
    for lyr in layers:
        a, f = lyr["attn"], lyr["ff"]
        attn_rows.append(dict(
            bq=add128(a["bq"]), bk=add128(a["bk"]), bv=add128(a["bv"]),
            bo=add128(a["bo"]), g=add128(a["gamma"]), b=add128(a["beta"])))
        ff_rows.append(dict(
            b1=add64(f["b1"]), b2=add128(f["b2"]),
            g=add128(f["gamma"]), b=add128(f["beta"])))
        wq_wo += [jnp.asarray(a["wq"], f32), jnp.asarray(a["wo"], f32)]
        wkv_list.append(jnp.concatenate(
            [jnp.asarray(a["wk"], f32), jnp.asarray(a["wv"], f32)], axis=1))
        ff_w1.append(jnp.asarray(f["w1"], f32))
        ff_w2.append(jnp.asarray(f["w2"], f32))
    idx["attn"] = attn_rows
    idx["ff"] = ff_rows

    o_w2 = jnp.zeros((D_INNER, D_MODEL), f32)
    o_w2 = o_w2.at[:, :OUT_SIZE].set(jnp.asarray(params["o_net"]["w2"], f32))

    packed = dict(
        vec128=jnp.concatenate(rows128, axis=0),          # (23, 128)
        vec64=jnp.concatenate(rows64, axis=0),             # (5, 64)
        w_in=jnp.concatenate(
            [jnp.asarray(params["coor_mapping"]["w1"], f32),
             jnp.asarray(params["feat_mapping"]["w1"], f32)], axis=0),  # (7, 64)
        w_mid=jnp.stack([jnp.asarray(params["o_net"]["w1"], f32)] + ff_w1,
                        axis=0),                            # (3, 128, 64)
        w_up=jnp.stack(
            [jnp.asarray(params["coor_mapping"]["w2"], f32),
             jnp.asarray(params["feat_mapping"]["w2"], f32)] + ff_w2 + [o_w2],
            axis=0),                                        # (5, 64, 128)
        attn_wqo=jnp.stack(wq_wo, axis=0),                  # (4, 128, 128)
        attn_wkv=jnp.stack(wkv_list, axis=0),               # (2, 128, 256)
    )
    return packed, idx


def _choose_batching(batch, max_tokens):
    """Pick BB (elements per grid step): grow matmul M toward 128 but keep
    >= 2 grid steps when possible so v7x's two TensorCores both get work."""
    target = max(1, min(16, 128 // max(max_tokens, 1)))
    divisors = [d for d in range(1, batch + 1) if batch % d == 0 and d <= target]
    pref = [d for d in divisors if batch // d >= 2]
    pool = pref if pref else divisors
    bb = max(pool)
    return bb, batch // bb


# ------------------------------ forward wrapper ------------------------------


@jax.jit
def state_dae_forward(params, visible_coor, visible_feat, coor):
    B, Nv, _ = visible_coor.shape
    _, Nd, _ = coor.shape

    packed, idx = _pack_params(params)
    BB, n_steps = _choose_batching(B, max(Nv, Nd))

    cfg = dict(BB=BB, Nv=Nv, Nd=Nd)
    kernel = functools.partial(_state_dae_kernel, cfg, idx)

    def batched(shape):
        nd = len(shape)
        return pl.BlockSpec((BB,) + tuple(shape[1:]),
                            lambda i, _n=nd: (i,) + (0,) * (_n - 1))

    def replicated(arr):
        nd = arr.ndim
        return pl.BlockSpec(tuple(arr.shape), lambda i, _n=nd: (0,) * _n)

    param_order = ["vec128", "vec64", "w_in", "w_mid", "w_up",
                   "attn_wqo", "attn_wkv"]
    param_arrays = [packed[k] for k in param_order]

    in_specs = ([batched(visible_coor.shape),
                 batched(visible_feat.shape),
                 batched(coor.shape)]
                + [replicated(a) for a in param_arrays])

    return pl.pallas_call(
        kernel,
        out_shape=jax.ShapeDtypeStruct((B, Nd, OUT_SIZE), jnp.float32),
        grid=(n_steps,),
        in_specs=in_specs,
        out_specs=pl.BlockSpec((BB, Nd, OUT_SIZE), lambda i: (i, 0, 0)),
        compiler_params=pltpu.CompilerParams(dimension_semantics=("parallel",)),
    )(visible_coor, visible_feat, coor, *param_arrays)


# ------------------------------ parameters ----------------------------------


def _normal(key, shape, scale=0.02):
    return scale * jax.random.normal(key, shape, dtype=jnp.float32)


def init_params(key):
    keys = iter(jax.random.split(key, 64))

    def mlp_params(din, dh, dout):
        return dict(
            w1=_normal(next(keys), (din, dh)),
            b1=jnp.zeros((1, dh), jnp.float32),
            w2=_normal(next(keys), (dh, dout)),
            b2=jnp.zeros((1, dout), jnp.float32),
        )

    def attn_params():
        dqk = N_HEAD * D_HEAD
        return dict(
            wq=_normal(next(keys), (D_MODEL, dqk)),
            bq=jnp.zeros((1, dqk), jnp.float32),
            wk=_normal(next(keys), (D_MODEL, dqk)),
            bk=jnp.zeros((1, dqk), jnp.float32),
            wv=_normal(next(keys), (D_MODEL, dqk)),
            bv=jnp.zeros((1, dqk), jnp.float32),
            wo=_normal(next(keys), (dqk, D_MODEL)),
            bo=jnp.zeros((1, D_MODEL), jnp.float32),
            gamma=jnp.ones((1, D_MODEL), jnp.float32),
            beta=jnp.zeros((1, D_MODEL), jnp.float32),
        )

    def ff_params():
        return dict(
            w1=_normal(next(keys), (D_MODEL, D_INNER)),
            b1=jnp.zeros((1, D_INNER), jnp.float32),
            w2=_normal(next(keys), (D_INNER, D_MODEL)),
            b2=jnp.zeros((1, D_MODEL), jnp.float32),
            gamma=jnp.ones((1, D_MODEL), jnp.float32),
            beta=jnp.zeros((1, D_MODEL), jnp.float32),
        )

    return dict(
        coor_mapping=mlp_params(COOR_SIZE, D_INNER, D_MODEL),
        feat_mapping=mlp_params(FEAT_SIZE, D_INNER, D_MODEL),
        o_net=mlp_params(D_MODEL, D_INNER, OUT_SIZE),
        probe=_normal(next(keys), (N_PROBE, D_MODEL)),
        enc_layers=[dict(attn=attn_params(), ff=ff_params())
                    for _ in range(N_ENC_LAYERS)],
        dec_layers=[dict(attn=attn_params(), ff=ff_params())
                    for _ in range(N_DEC_LAYERS)],
    )


# ------------------------- pure-JAX reference (check) ------------------------


def _reference_forward(params, visible_coor, visible_feat, coor):
    hi = jax.lax.Precision.HIGHEST

    def mm(a, b):
        return jnp.matmul(a, b, precision=hi)

    def mlp(x, m):
        return mm(jnp.tanh(mm(x, m["w1"]) + m["b1"]), m["w2"]) + m["b2"]

    def ln(z, g, b):
        mu = jnp.mean(z, axis=-1, keepdims=True)
        var = jnp.mean((z - mu) ** 2, axis=-1, keepdims=True)
        return (z - mu) / jnp.sqrt(var + LN_EPS) * g + b

    def mha(xq, xkv, a):
        bsz, lq, _ = xq.shape
        lk = xkv.shape[1]
        q = (mm(xq, a["wq"]) + a["bq"]).reshape(bsz, lq, N_HEAD, D_HEAD)
        k = (mm(xkv, a["wk"]) + a["bk"]).reshape(bsz, lk, N_HEAD, D_HEAD)
        v = (mm(xkv, a["wv"]) + a["bv"]).reshape(bsz, lk, N_HEAD, D_HEAD)
        s = jnp.einsum("bqhd,bkhd->bhqk", q, k, precision=hi) * _ATTN_SCALE
        pr = jax.nn.softmax(s, axis=-1)
        o = jnp.einsum("bhqk,bkhd->bqhd", pr, v,
                       precision=hi).reshape(bsz, lq, N_HEAD * D_HEAD)
        return ln(xq + mm(o, a["wo"]) + a["bo"], a["gamma"], a["beta"])

    def ffn(x, f):
        h = jax.nn.relu(mm(x, f["w1"]) + f["b1"])
        return ln(x + mm(h, f["w2"]) + f["b2"], f["gamma"], f["beta"])

    coor_emb = mlp(coor, params["coor_mapping"])
    vcoor_emb = mlp(visible_coor, params["coor_mapping"])
    vfeat_emb = mlp(visible_feat, params["feat_mapping"])
    encode_feat = vcoor_emb + vfeat_emb

    bsz = coor.shape[0]
    probe = jnp.broadcast_to(params["probe"][None], (bsz, N_PROBE, D_MODEL))
    for layer in params["enc_layers"]:
        probe = mha(probe, encode_feat, layer["attn"])
        probe = ffn(probe, layer["ff"])

    memory = jnp.concatenate([probe, encode_feat], axis=1)
    dec = coor_emb
    for layer in params["dec_layers"]:
        dec = mha(dec, memory, layer["attn"])
        dec = ffn(dec, layer["ff"])

    return mlp(dec, params["o_net"])


# ------------------------------ main -----------------------------------------


if __name__ == "__main__":
    key = jax.random.PRNGKey(0)
    k_params, k_vc, k_vf, k_c = jax.random.split(key, 4)

    params = init_params(k_params)

    bsz, n_points, d_n_points = 2, 8, 8
    visible_coor = jax.random.normal(k_vc, (bsz, n_points, COOR_SIZE), jnp.float32)
    visible_feat = jax.random.normal(k_vf, (bsz, n_points, FEAT_SIZE), jnp.float32)
    coor = jax.random.normal(k_c, (bsz, d_n_points, COOR_SIZE), jnp.float32)

    out = state_dae_forward(params, visible_coor, visible_feat, coor)
    out = jax.block_until_ready(out)

    assert out.shape == (bsz, d_n_points, OUT_SIZE)
    assert bool(jnp.all(jnp.isfinite(out)))

    ref = _reference_forward(params, visible_coor, visible_feat, coor)
    max_err = float(jnp.max(jnp.abs(out - ref)))
    assert jnp.allclose(out, ref, atol=5e-3, rtol=5e-2), f"max abs err = {max_err}"

    print("KERNEL_OK")
</pallas_src>

<mosaic_0001>
module attributes {stable_mosaic.version = 11 : i64} {
  func.func @_state_dae_kernel(%arg0: i32, %arg1: memref<1x8x3xf32, #tpu.memory_space<vmem>>, %arg2: memref<1x8x4xf32, #tpu.memory_space<vmem>>, %arg3: memref<1x8x3xf32, #tpu.memory_space<vmem>>, %arg4: memref<23x128xf32, #tpu.memory_space<vmem>>, %arg5: memref<5x64xf32, #tpu.memory_space<vmem>>, %arg6: memref<7x64xf32, #tpu.memory_space<vmem>>, %arg7: memref<3x128x64xf32, #tpu.memory_space<vmem>>, %arg8: memref<5x64x128xf32, #tpu.memory_space<vmem>>, %arg9: memref<4x128x128xf32, #tpu.memory_space<vmem>>, %arg10: memref<2x128x256xf32, #tpu.memory_space<vmem>>, %arg11: memref<1x8x4xf32, #tpu.memory_space<vmem>>) attributes {dimension_semantics = [#tpu.dimension_semantics<parallel>], iteration_bounds = array<i64: 2>, scalar_prefetch = 0 : i64, scratch_operands = 0 : i64, tpu.core_type = #tpu.core_type<tc>, window_params = [{transform_indices = @transform_0, window_bounds = array<i64: 1, 8, 3>}, {transform_indices = @transform_1, window_bounds = array<i64: 1, 8, 4>}, {transform_indices = @transform_2, window_bounds = array<i64: 1, 8, 3>}, {pipeline_mode = #tpu.pipeline_mode<synchronous>, transform_indices = @transform_3, window_bounds = array<i64: 23, 128>}, {pipeline_mode = #tpu.pipeline_mode<synchronous>, transform_indices = @transform_4, window_bounds = array<i64: 5, 64>}, {pipeline_mode = #tpu.pipeline_mode<synchronous>, transform_indices = @transform_5, window_bounds = array<i64: 7, 64>}, {pipeline_mode = #tpu.pipeline_mode<synchronous>, transform_indices = @transform_6, window_bounds = array<i64: 3, 128, 64>}, {pipeline_mode = #tpu.pipeline_mode<synchronous>, transform_indices = @transform_7, window_bounds = array<i64: 5, 64, 128>}, {pipeline_mode = #tpu.pipeline_mode<synchronous>, transform_indices = @transform_8, window_bounds = array<i64: 4, 128, 128>}, {pipeline_mode = #tpu.pipeline_mode<synchronous>, transform_indices = @transform_9, window_bounds = array<i64: 2, 128, 256>}, {transform_indices = @transform_10, window_bounds = array<i64: 1, 8, 4>}]} {
    %c0 = arith.constant 0 : index
    %c0_0 = arith.constant 0 : index
    %c0_1 = arith.constant 0 : index
    %0 = vector.load %arg1[%c0, %c0_0, %c0_1] : memref<1x8x3xf32, #tpu.memory_space<vmem>>, vector<1x8x3xf32>
    %1 = vector.shape_cast %0 : vector<1x8x3xf32> to vector<8x3xf32>
    %c0_2 = arith.constant 0 : index
    %c0_3 = arith.constant 0 : index
    %c0_4 = arith.constant 0 : index
    %2 = vector.load %arg2[%c0_2, %c0_3, %c0_4] : memref<1x8x4xf32, #tpu.memory_space<vmem>>, vector<1x8x4xf32>
    %3 = vector.shape_cast %2 : vector<1x8x4xf32> to vector<8x4xf32>
    %c0_5 = arith.constant 0 : index
    %c0_6 = arith.constant 0 : index
    %c0_7 = arith.constant 0 : index
    %4 = vector.load %arg3[%c0_5, %c0_6, %c0_7] : memref<1x8x3xf32, #tpu.memory_space<vmem>>, vector<1x8x3xf32>
    %5 = vector.shape_cast %4 : vector<1x8x3xf32> to vector<8x3xf32>
    %c0_8 = arith.constant 0 : index
    %c0_9 = arith.constant 0 : index
    %6 = vector.load %arg6[%c0_8, %c0_9] : memref<7x64xf32, #tpu.memory_space<vmem>>, vector<3x64xf32>
    %c3 = arith.constant 3 : index
    %c0_10 = arith.constant 0 : index
    %7 = vector.load %arg6[%c3, %c0_10] : memref<7x64xf32, #tpu.memory_space<vmem>>, vector<4x64xf32>
    %c0_11 = arith.constant 0 : index
    %c0_12 = arith.constant 0 : index
    %8 = vector.load %arg5[%c0_11, %c0_12] : memref<5x64xf32, #tpu.memory_space<vmem>>, vector<1x64xf32>
    %c1 = arith.constant 1 : index
    %c0_13 = arith.constant 0 : index
    %9 = vector.load %arg5[%c1, %c0_13] : memref<5x64xf32, #tpu.memory_space<vmem>>, vector<1x64xf32>
    %c0_14 = arith.constant 0 : index
    %c0_15 = arith.constant 0 : index
    %c0_16 = arith.constant 0 : index
    %10 = vector.load %arg8[%c0_14, %c0_15, %c0_16] : memref<5x64x128xf32, #tpu.memory_space<vmem>>, vector<1x64x128xf32>
    %11 = vector.shape_cast %10 : vector<1x64x128xf32> to vector<64x128xf32>
    %c1_17 = arith.constant 1 : index
    %c0_18 = arith.constant 0 : index
    %c0_19 = arith.constant 0 : index
    %12 = vector.load %arg8[%c1_17, %c0_18, %c0_19] : memref<5x64x128xf32, #tpu.memory_space<vmem>>, vector<1x64x128xf32>
    %13 = vector.shape_cast %12 : vector<1x64x128xf32> to vector<64x128xf32>
    %c0_20 = arith.constant 0 : index
    %c0_21 = arith.constant 0 : index
    %14 = vector.load %arg4[%c0_20, %c0_21] : memref<23x128xf32, #tpu.memory_space<vmem>>, vector<1x128xf32>
    %c1_22 = arith.constant 1 : index
    %c0_23 = arith.constant 0 : index
    %15 = vector.load %arg4[%c1_22, %c0_23] : memref<23x128xf32, #tpu.memory_space<vmem>>, vector<1x128xf32>
    %cst = arith.constant dense<0.000000e+00> : vector<8x64xf32>
    %16 = tpu.matmul %5, %6, %cst {dimension_numbers = #tpu.dot_dimension_numbers<[1], [0], [0], [1], [0, 0, 1, 1], [], []>} : vector<8x3xf32>, vector<3x64xf32>, vector<8x64xf32> -> vector<8x64xf32>
    %17 = vector.broadcast %8 : vector<1x64xf32> to vector<8x64xf32>
    %18 = arith.addf %16, %17 : vector<8x64xf32>
    %19 = math.tanh %18 : vector<8x64xf32>
    %cst_24 = arith.constant dense<0.000000e+00> : vector<8x128xf32>
    %20 = tpu.matmul %19, %11, %cst_24 {dimension_numbers = #tpu.dot_dimension_numbers<[1], [0], [0], [1], [0, 0, 1, 1], [], []>} : vector<8x64xf32>, vector<64x128xf32>, vector<8x128xf32> -> vector<8x128xf32>
    %21 = vector.broadcast %14 : vector<1x128xf32> to vector<8x128xf32>
    %22 = arith.addf %20, %21 : vector<8x128xf32>
    %cst_25 = arith.constant dense<0.000000e+00> : vector<8x64xf32>
    %23 = tpu.matmul %1, %6, %cst_25 {dimension_numbers = #tpu.dot_dimension_numbers<[1], [0], [0], [1], [0, 0, 1, 1], [], []>} : vector<8x3xf32>, vector<3x64xf32>, vector<8x64xf32> -> vector<8x64xf32>
    %24 = vector.broadcast %8 : vector<1x64xf32> to vector<8x64xf32>
    %25 = arith.addf %23, %24 : vector<8x64xf32>
    %26 = math.tanh %25 : vector<8x64xf32>
    %cst_26 = arith.constant dense<0.000000e+00> : vector<8x128xf32>
    %27 = tpu.matmul %26, %11, %cst_26 {dimension_numbers = #tpu.dot_dimension_numbers<[1], [0], [0], [1], [0, 0, 1, 1], [], []>} : vector<8x64xf32>, vector<64x128xf32>, vector<8x128xf32> -> vector<8x128xf32>
    %28 = vector.broadcast %14 : vector<1x128xf32> to vector<8x128xf32>
    %29 = arith.addf %27, %28 : vector<8x128xf32>
    %cst_27 = arith.constant dense<0.000000e+00> : vector<8x64xf32>
    %30 = tpu.matmul %3, %7, %cst_27 {dimension_numbers = #tpu.dot_dimension_numbers<[1], [0], [0], [1], [0, 0, 1, 1], [], []>} : vector<8x4xf32>, vector<4x64xf32>, vector<8x64xf32> -> vector<8x64xf32>
    %31 = vector.broadcast %9 : vector<1x64xf32> to vector<8x64xf32>
    %32 = arith.addf %30, %31 : vector<8x64xf32>
    %33 = math.tanh %32 : vector<8x64xf32>
    %cst_28 = arith.constant dense<0.000000e+00> : vector<8x128xf32>
    %34 = tpu.matmul %33, %13, %cst_28 {dimension_numbers = #tpu.dot_dimension_numbers<[1], [0], [0], [1], [0, 0, 1, 1], [], []>} : vector<8x64xf32>, vector<64x128xf32>, vector<8x128xf32> -> vector<8x128xf32>
    %35 = vector.broadcast %15 : vector<1x128xf32> to vector<8x128xf32>
    %36 = arith.addf %34, %35 : vector<8x128xf32>
    %37 = arith.addf %29, %36 : vector<8x128xf32>
    %c3_29 = arith.constant 3 : index
    %c0_30 = arith.constant 0 : index
    %38 = vector.load %arg4[%c3_29, %c0_30] : memref<23x128xf32, #tpu.memory_space<vmem>>, vector<2x128xf32>
    %c0_31 = arith.constant 0 : index
    %c0_32 = arith.constant 0 : index
    %c0_33 = arith.constant 0 : index
    %39 = vector.load %arg9[%c0_31, %c0_32, %c0_33] : memref<4x128x128xf32, #tpu.memory_space<vmem>>, vector<1x128x128xf32>
    %40 = vector.shape_cast %39 : vector<1x128x128xf32> to vector<128x128xf32>
    %c1_34 = arith.constant 1 : index
    %c0_35 = arith.constant 0 : index
    %c0_36 = arith.constant 0 : index
    %41 = vector.load %arg9[%c1_34, %c0_35, %c0_36] : memref<4x128x128xf32, #tpu.memory_space<vmem>>, vector<1x128x128xf32>
    %42 = vector.shape_cast %41 : vector<1x128x128xf32> to vector<128x128xf32>
    %c0_37 = arith.constant 0 : index
    %c0_38 = arith.constant 0 : index
    %c0_39 = arith.constant 0 : index
    %43 = vector.load %arg10[%c0_37, %c0_38, %c0_39] : memref<2x128x256xf32, #tpu.memory_space<vmem>>, vector<1x128x256xf32>
    %44 = vector.shape_cast %43 : vector<1x128x256xf32> to vector<128x256xf32>
    %cst_40 = arith.constant dense<0.000000e+00> : vector<2x128xf32>
    %45 = tpu.matmul %38, %40, %cst_40 {dimension_numbers = #tpu.dot_dimension_numbers<[1], [0], [0], [1], [0, 0, 1, 1], [], []>} : vector<2x128xf32>, vector<128x128xf32>, vector<2x128xf32> -> vector<2x128xf32>
    %c5 = arith.constant 5 : index
    %c0_41 = arith.constant 0 : index
    %46 = vector.load %arg4[%c5, %c0_41] : memref<23x128xf32, #tpu.memory_space<vmem>>, vector<1x128xf32>
    %47 = vector.broadcast %46 : vector<1x128xf32> to vector<2x128xf32>
    %48 = arith.addf %45, %47 : vector<2x128xf32>
    %cst_42 = arith.constant dense<0.000000e+00> : vector<8x256xf32>
    %49 = tpu.matmul %37, %44, %cst_42 {dimension_numbers = #tpu.dot_dimension_numbers<[1], [0], [0], [1], [0, 0, 1, 1], [], []>} : vector<8x128xf32>, vector<128x256xf32>, vector<8x256xf32> -> vector<8x256xf32>
    %50 = vector.extract_strided_slice %49 {offsets = [0, 0], sizes = [8, 128], strides = [1, 1]} : vector<8x256xf32> to vector<8x128xf32>
    %c6 = arith.constant 6 : index
    %c0_43 = arith.constant 0 : index
    %51 = vector.load %arg4[%c6, %c0_43] : memref<23x128xf32, #tpu.memory_space<vmem>>, vector<1x128xf32>
    %52 = vector.broadcast %51 : vector<1x128xf32> to vector<8x128xf32>
    %53 = arith.addf %50, %52 : vector<8x128xf32>
    %54 = vector.extract_strided_slice %49 {offsets = [0, 128], sizes = [8, 128], strides = [1, 1]} : vector<8x256xf32> to vector<8x128xf32>
    %c7 = arith.constant 7 : index
    %c0_44 = arith.constant 0 : index
    %55 = vector.load %arg4[%c7, %c0_44] : memref<23x128xf32, #tpu.memory_space<vmem>>, vector<1x128xf32>
    %56 = vector.broadcast %55 : vector<1x128xf32> to vector<8x128xf32>
    %57 = arith.addf %54, %56 : vector<8x128xf32>
    %58 = vector.extract_strided_slice %48 {offsets = [0, 0], sizes = [2, 16], strides = [1, 1]} : vector<2x128xf32> to vector<2x16xf32>
    %59 = vector.extract_strided_slice %48 {offsets = [0, 16], sizes = [2, 16], strides = [1, 1]} : vector<2x128xf32> to vector<2x16xf32>
    %60 = vector.extract_strided_slice %48 {offsets = [0, 32], sizes = [2, 16], strides = [1, 1]} : vector<2x128xf32> to vector<2x16xf32>
    %61 = vector.extract_strided_slice %48 {offsets = [0, 48], sizes = [2, 16], strides = [1, 1]} : vector<2x128xf32> to vector<2x16xf32>
    %62 = vector.extract_strided_slice %48 {offsets = [0, 64], sizes = [2, 16], strides = [1, 1]} : vector<2x128xf32> to vector<2x16xf32>
    %63 = vector.extract_strided_slice %48 {offsets = [0, 80], sizes = [2, 16], strides = [1, 1]} : vector<2x128xf32> to vector<2x16xf32>
    %64 = vector.extract_strided_slice %48 {offsets = [0, 96], sizes = [2, 16], strides = [1, 1]} : vector<2x128xf32> to vector<2x16xf32>
    %65 = vector.extract_strided_slice %48 {offsets = [0, 112], sizes = [2, 16], strides = [1, 1]} : vector<2x128xf32> to vector<2x16xf32>
    %66 = vector.shape_cast %58 : vector<2x16xf32> to vector<1x2x16xf32>
    %67 = vector.shape_cast %59 : vector<2x16xf32> to vector<1x2x16xf32>
    %68 = vector.shape_cast %60 : vector<2x16xf32> to vector<1x2x16xf32>
    %69 = vector.shape_cast %61 : vector<2x16xf32> to vector<1x2x16xf32>
    %70 = vector.shape_cast %62 : vector<2x16xf32> to vector<1x2x16xf32>
    %71 = vector.shape_cast %63 : vector<2x16xf32> to vector<1x2x16xf32>
    %72 = vector.shape_cast %64 : vector<2x16xf32> to vector<1x2x16xf32>
    %73 = vector.shape_cast %65 : vector<2x16xf32> to vector<1x2x16xf32>
    %74 = tpu.concatenate %66, %67, %68, %69, %70, %71, %72, %73 in 0 : vector<1x2x16xf32>, vector<1x2x16xf32>, vector<1x2x16xf32>, vector<1x2x16xf32>, vector<1x2x16xf32>, vector<1x2x16xf32>, vector<1x2x16xf32>, vector<1x2x16xf32> -> vector<8x2x16xf32>
    %75 = tpu.transpose %53, [1, 0] : vector<8x128xf32> -> vector<128x8xf32>
    %76 = vector.shape_cast %75 : vector<128x8xf32> to vector<8x16x8xf32>
    %77 = tpu.transpose %57, [1, 0] : vector<8x128xf32> -> vector<128x8xf32>
    %78 = vector.shape_cast %77 : vector<128x8xf32> to vector<8x16x8xf32>
    %cst_45 = arith.constant dense<0.000000e+00> : vector<8x2x8xf32>
    %79 = tpu.matmul %74, %76, %cst_45 {dimension_numbers = #tpu.dot_dimension_numbers<[2], [1], [1], [2], [0, 0, 0, 1, 1, 2], [0], [0]>} : vector<8x2x16xf32>, vector<8x16x8xf32>, vector<8x2x8xf32> -> vector<8x2x8xf32>
    %cst_46 = arith.constant 2.500000e-01 : f32
    %80 = vector.broadcast %cst_46 : f32 to vector<8x2x8xf32>
    %81 = arith.mulf %79, %80 : vector<8x2x8xf32>
    %cst_47 = arith.constant dense<0xFF800000> : vector<8x2xf32>
    %82 = vector.multi_reduction <maximumf>, %81, %cst_47 [2] : vector<8x2x8xf32> to vector<8x2xf32>
    %83 = vector.shape_cast %82 : vector<8x2xf32> to vector<8x2x1xf32>
    %84 = vector.broadcast %83 : vector<8x2x1xf32> to vector<8x2x8xf32>
    %85 = arith.subf %81, %84 : vector<8x2x8xf32>
    %86 = math.exp %85 : vector<8x2x8xf32>
    %cst_48 = arith.constant dense<0.000000e+00> : vector<8x2xf32>
    %87 = vector.multi_reduction <add>, %86, %cst_48 [2] : vector<8x2x8xf32> to vector<8x2xf32>
    %88 = vector.shape_cast %87 : vector<8x2xf32> to vector<8x2x1xf32>
    %89 = vector.broadcast %88 : vector<8x2x1xf32> to vector<8x2x8xf32>
    %90 = arith.divf %86, %89 : vector<8x2x8xf32>
    %cst_49 = arith.constant dense<0.000000e+00> : vector<8x16x2xf32>
    %91 = tpu.matmul %78, %90, %cst_49 {dimension_numbers = #tpu.dot_dimension_numbers<[2], [2], [1], [1], [0, 0, 0, 1, 1, 1], [0], [0]>} : vector<8x16x8xf32>, vector<8x2x8xf32>, vector<8x16x2xf32> -> vector<8x16x2xf32>
    %92 = vector.shape_cast %91 : vector<8x16x2xf32> to vector<128x2xf32>
    %93 = tpu.transpose %92, [1, 0] : vector<128x2xf32> -> vector<2x128xf32>
    %cst_50 = arith.constant dense<0.000000e+00> : vector<2x128xf32>
    %94 = tpu.matmul %93, %42, %cst_50 {dimension_numbers = #tpu.dot_dimension_numbers<[1], [0], [0], [1], [0, 0, 1, 1], [], []>} : vector<2x128xf32>, vector<128x128xf32>, vector<2x128xf32> -> vector<2x128xf32>
    %c8 = arith.constant 8 : index
    %c0_51 = arith.constant 0 : index
    %95 = vector.load %arg4[%c8, %c0_51] : memref<23x128xf32, #tpu.memory_space<vmem>>, vector<1x128xf32>
    %96 = vector.broadcast %95 : vector<1x128xf32> to vector<2x128xf32>
    %97 = arith.addf %94, %96 : vector<2x128xf32>
    %98 = arith.addf %38, %97 : vector<2x128xf32>
    %c9 = arith.constant 9 : index
    %c0_52 = arith.constant 0 : index
    %99 = vector.load %arg4[%c9, %c0_52] : memref<23x128xf32, #tpu.memory_space<vmem>>, vector<1x128xf32>
    %c10 = arith.constant 10 : index
    %c0_53 = arith.constant 0 : index
    %100 = vector.load %arg4[%c10, %c0_53] : memref<23x128xf32, #tpu.memory_space<vmem>>, vector<1x128xf32>
    %cst_54 = arith.constant dense<0.000000e+00> : vector<2xf32>
    %101 = vector.multi_reduction <add>, %98, %cst_54 [1] : vector<2x128xf32> to vector<2xf32>
    %102 = vector.shape_cast %101 : vector<2xf32> to vector<2x1xf32>
    %cst_55 = arith.constant 1.280000e+02 : f32
    %103 = vector.broadcast %cst_55 : f32 to vector<2x1xf32>
    %104 = arith.divf %102, %103 : vector<2x1xf32>
    %105 = vector.broadcast %104 : vector<2x1xf32> to vector<2x128xf32>
    %106 = arith.subf %98, %105 : vector<2x128xf32>
    %107 = arith.mulf %106, %106 : vector<2x128xf32>
    %cst_56 = arith.constant dense<0.000000e+00> : vector<2xf32>
    %108 = vector.multi_reduction <add>, %107, %cst_56 [1] : vector<2x128xf32> to vector<2xf32>
    %109 = vector.shape_cast %108 : vector<2xf32> to vector<2x1xf32>
    %cst_57 = arith.constant 1.280000e+02 : f32
    %110 = vector.broadcast %cst_57 : f32 to vector<2x1xf32>
    %111 = arith.divf %109, %110 : vector<2x1xf32>
    %112 = vector.broadcast %104 : vector<2x1xf32> to vector<2x128xf32>
    %113 = arith.subf %98, %112 : vector<2x128xf32>
    %cst_58 = arith.constant 9.99999974E-6 : f32
    %114 = vector.broadcast %cst_58 : f32 to vector<2x1xf32>
    %115 = arith.addf %111, %114 : vector<2x1xf32>
    %116 = math.rsqrt %115 : vector<2x1xf32>
    %117 = vector.broadcast %116 : vector<2x1xf32> to vector<2x128xf32>
    %118 = arith.mulf %113, %117 : vector<2x128xf32>
    %119 = vector.broadcast %99 : vector<1x128xf32> to vector<2x128xf32>
    %120 = arith.mulf %118, %119 : vector<2x128xf32>
    %121 = vector.broadcast %100 : vector<1x128xf32> to vector<2x128xf32>
    %122 = arith.addf %120, %121 : vector<2x128xf32>
    %c1_59 = arith.constant 1 : index
    %c0_60 = arith.constant 0 : index
    %c0_61 = arith.constant 0 : index
    %123 = vector.load %arg7[%c1_59, %c0_60, %c0_61] : memref<3x128x64xf32, #tpu.memory_space<vmem>>, vector<1x128x64xf32>
    %124 = vector.shape_cast %123 : vector<1x128x64xf32> to vector<128x64xf32>
    %c2 = arith.constant 2 : index
    %c0_62 = arith.constant 0 : index
    %c0_63 = arith.constant 0 : index
    %125 = vector.load %arg8[%c2, %c0_62, %c0_63] : memref<5x64x128xf32, #tpu.memory_space<vmem>>, vector<1x64x128xf32>
    %126 = vector.shape_cast %125 : vector<1x64x128xf32> to vector<64x128xf32>
    %cst_64 = arith.constant dense<0.000000e+00> : vector<2x64xf32>
    %127 = tpu.matmul %122, %124, %cst_64 {dimension_numbers = #tpu.dot_dimension_numbers<[1], [0], [0], [1], [0, 0, 1, 1], [], []>} : vector<2x128xf32>, vector<128x64xf32>, vector<2x64xf32> -> vector<2x64xf32>
    %c3_65 = arith.constant 3 : index
    %c0_66 = arith.constant 0 : index
    %128 = vector.load %arg5[%c3_65, %c0_66] : memref<5x64xf32, #tpu.memory_space<vmem>>, vector<1x64xf32>
    %129 = vector.broadcast %128 : vector<1x64xf32> to vector<2x64xf32>
    %130 = arith.addf %127, %129 : vector<2x64xf32>
    %cst_67 = arith.constant 0.000000e+00 : f32
    %131 = vector.broadcast %cst_67 : f32 to vector<2x64xf32>
    %132 = arith.maximumf %130, %131 : vector<2x64xf32>
    %cst_68 = arith.constant dense<0.000000e+00> : vector<2x128xf32>
    %133 = tpu.matmul %132, %126, %cst_68 {dimension_numbers = #tpu.dot_dimension_numbers<[1], [0], [0], [1], [0, 0, 1, 1], [], []>} : vector<2x64xf32>, vector<64x128xf32>, vector<2x128xf32> -> vector<2x128xf32>
    %c11 = arith.constant 11 : index
    %c0_69 = arith.constant 0 : index
    %134 = vector.load %arg4[%c11, %c0_69] : memref<23x128xf32, #tpu.memory_space<vmem>>, vector<1x128xf32>
    %135 = vector.broadcast %134 : vector<1x128xf32> to vector<2x128xf32>
    %136 = arith.addf %133, %135 : vector<2x128xf32>
    %137 = arith.addf %122, %136 : vector<2x128xf32>
    %c12 = arith.constant 12 : index
    %c0_70 = arith.constant 0 : index
    %138 = vector.load %arg4[%c12, %c0_70] : memref<23x128xf32, #tpu.memory_space<vmem>>, vector<1x128xf32>
    %c13 = arith.constant 13 : index
    %c0_71 = arith.constant 0 : index
    %139 = vector.load %arg4[%c13, %c0_71] : memref<23x128xf32, #tpu.memory_space<vmem>>, vector<1x128xf32>
    %cst_72 = arith.constant dense<0.000000e+00> : vector<2xf32>
    %140 = vector.multi_reduction <add>, %137, %cst_72 [1] : vector<2x128xf32> to vector<2xf32>
    %141 = vector.shape_cast %140 : vector<2xf32> to vector<2x1xf32>
    %cst_73 = arith.constant 1.280000e+02 : f32
    %142 = vector.broadcast %cst_73 : f32 to vector<2x1xf32>
    %143 = arith.divf %141, %142 : vector<2x1xf32>
    %144 = vector.broadcast %143 : vector<2x1xf32> to vector<2x128xf32>
    %145 = arith.subf %137, %144 : vector<2x128xf32>
    %146 = arith.mulf %145, %145 : vector<2x128xf32>
    %cst_74 = arith.constant dense<0.000000e+00> : vector<2xf32>
    %147 = vector.multi_reduction <add>, %146, %cst_74 [1] : vector<2x128xf32> to vector<2xf32>
    %148 = vector.shape_cast %147 : vector<2xf32> to vector<2x1xf32>
    %cst_75 = arith.constant 1.280000e+02 : f32
    %149 = vector.broadcast %cst_75 : f32 to vector<2x1xf32>
    %150 = arith.divf %148, %149 : vector<2x1xf32>
    %151 = vector.broadcast %143 : vector<2x1xf32> to vector<2x128xf32>
    %152 = arith.subf %137, %151 : vector<2x128xf32>
    %cst_76 = arith.constant 9.99999974E-6 : f32
    %153 = vector.broadcast %cst_76 : f32 to vector<2x1xf32>
    %154 = arith.addf %150, %153 : vector<2x1xf32>
    %155 = math.rsqrt %154 : vector<2x1xf32>
    %156 = vector.broadcast %155 : vector<2x1xf32> to vector<2x128xf32>
    %157 = arith.mulf %152, %156 : vector<2x128xf32>
    %158 = vector.broadcast %138 : vector<1x128xf32> to vector<2x128xf32>
    %159 = arith.mulf %157, %158 : vector<2x128xf32>
    %160 = vector.broadcast %139 : vector<1x128xf32> to vector<2x128xf32>
    %161 = arith.addf %159, %160 : vector<2x128xf32>
    %162 = tpu.concatenate %37, %161 in 0 : vector<8x128xf32>, vector<2x128xf32> -> vector<10x128xf32>
    %c2_77 = arith.constant 2 : index
    %c0_78 = arith.constant 0 : index
    %c0_79 = arith.constant 0 : index
    %163 = vector.load %arg9[%c2_77, %c0_78, %c0_79] : memref<4x128x128xf32, #tpu.memory_space<vmem>>, vector<1x128x128xf32>
    %164 = vector.shape_cast %163 : vector<1x128x128xf32> to vector<128x128xf32>
    %c3_80 = arith.constant 3 : index
    %c0_81 = arith.constant 0 : index
    %c0_82 = arith.constant 0 : index
    %165 = vector.load %arg9[%c3_80, %c0_81, %c0_82] : memref<4x128x128xf32, #tpu.memory_space<vmem>>, vector<1x128x128xf32>
    %166 = vector.shape_cast %165 : vector<1x128x128xf32> to vector<128x128xf32>
    %c1_83 = arith.constant 1 : index
    %c0_84 = arith.constant 0 : index
    %c0_85 = arith.constant 0 : index
    %167 = vector.load %arg10[%c1_83, %c0_84, %c0_85] : memref<2x128x256xf32, #tpu.memory_space<vmem>>, vector<1x128x256xf32>
    %168 = vector.shape_cast %167 : vector<1x128x256xf32> to vector<128x256xf32>
    %cst_86 = arith.constant dense<0.000000e+00> : vector<8x128xf32>
    %169 = tpu.matmul %22, %164, %cst_86 {dimension_numbers = #tpu.dot_dimension_numbers<[1], [0], [0], [1], [0, 0, 1, 1], [], []>} : vector<8x128xf32>, vector<128x128xf32>, vector<8x128xf32> -> vector<8x128xf32>
    %c14 = arith.constant 14 : index
    %c0_87 = arith.constant 0 : index
    %170 = vector.load %arg4[%c14, %c0_87] : memref<23x128xf32, #tpu.memory_space<vmem>>, vector<1x128xf32>
    %171 = vector.broadcast %170 : vector<1x128xf32> to vector<8x128xf32>
    %172 = arith.addf %169, %171 : vector<8x128xf32>
    %cst_88 = arith.constant dense<0.000000e+00> : vector<10x256xf32>
    %173 = tpu.matmul %162, %168, %cst_88 {dimension_numbers = #tpu.dot_dimension_numbers<[1], [0], [0], [1], [0, 0, 1, 1], [], []>} : vector<10x128xf32>, vector<128x256xf32>, vector<10x256xf32> -> vector<10x256xf32>
    %174 = vector.extract_strided_slice %173 {offsets = [0, 0], sizes = [10, 128], strides = [1, 1]} : vector<10x256xf32> to vector<10x128xf32>
    %c15 = arith.constant 15 : index
    %c0_89 = arith.constant 0 : index
    %175 = vector.load %arg4[%c15, %c0_89] : memref<23x128xf32, #tpu.memory_space<vmem>>, vector<1x128xf32>
    %176 = vector.broadcast %175 : vector<1x128xf32> to vector<10x128xf32>
    %177 = arith.addf %174, %176 : vector<10x128xf32>
    %178 = vector.extract_strided_slice %173 {offsets = [0, 128], sizes = [10, 128], strides = [1, 1]} : vector<10x256xf32> to vector<10x128xf32>
    %c16 = arith.constant 16 : index
    %c0_90 = arith.constant 0 : index
    %179 = vector.load %arg4[%c16, %c0_90] : memref<23x128xf32, #tpu.memory_space<vmem>>, vector<1x128xf32>
    %180 = vector.broadcast %179 : vector<1x128xf32> to vector<10x128xf32>
    %181 = arith.addf %178, %180 : vector<10x128xf32>
    %182 = vector.extract_strided_slice %172 {offsets = [0, 0], sizes = [8, 16], strides = [1, 1]} : vector<8x128xf32> to vector<8x16xf32>
    %183 = vector.extract_strided_slice %172 {offsets = [0, 16], sizes = [8, 16], strides = [1, 1]} : vector<8x128xf32> to vector<8x16xf32>
    %184 = vector.extract_strided_slice %172 {offsets = [0, 32], sizes = [8, 16], strides = [1, 1]} : vector<8x128xf32> to vector<8x16xf32>
    %185 = vector.extract_strided_slice %172 {offsets = [0, 48], sizes = [8, 16], strides = [1, 1]} : vector<8x128xf32> to vector<8x16xf32>
    %186 = vector.extract_strided_slice %172 {offsets = [0, 64], sizes = [8, 16], strides = [1, 1]} : vector<8x128xf32> to vector<8x16xf32>
    %187 = vector.extract_strided_slice %172 {offsets = [0, 80], sizes = [8, 16], strides = [1, 1]} : vector<8x128xf32> to vector<8x16xf32>
    %188 = vector.extract_strided_slice %172 {offsets = [0, 96], sizes = [8, 16], strides = [1, 1]} : vector<8x128xf32> to vector<8x16xf32>
    %189 = vector.extract_strided_slice %172 {offsets = [0, 112], sizes = [8, 16], strides = [1, 1]} : vector<8x128xf32> to vector<8x16xf32>
    %190 = vector.shape_cast %182 : vector<8x16xf32> to vector<1x8x16xf32>
    %191 = vector.shape_cast %183 : vector<8x16xf32> to vector<1x8x16xf32>
    %192 = vector.shape_cast %184 : vector<8x16xf32> to vector<1x8x16xf32>
    %193 = vector.shape_cast %185 : vector<8x16xf32> to vector<1x8x16xf32>
    %194 = vector.shape_cast %186 : vector<8x16xf32> to vector<1x8x16xf32>
    %195 = vector.shape_cast %187 : vector<8x16xf32> to vector<1x8x16xf32>
    %196 = vector.shape_cast %188 : vector<8x16xf32> to vector<1x8x16xf32>
    %197 = vector.shape_cast %189 : vector<8x16xf32> to vector<1x8x16xf32>
    %198 = tpu.concatenate %190, %191, %192, %193, %194, %195, %196, %197 in 0 : vector<1x8x16xf32>, vector<1x8x16xf32>, vector<1x8x16xf32>, vector<1x8x16xf32>, vector<1x8x16xf32>, vector<1x8x16xf32>, vector<1x8x16xf32>, vector<1x8x16xf32> -> vector<8x8x16xf32>
    %199 = tpu.transpose %177, [1, 0] : vector<10x128xf32> -> vector<128x10xf32>
    %200 = vector.shape_cast %199 : vector<128x10xf32> to vector<8x16x10xf32>
    %201 = tpu.transpose %181, [1, 0] : vector<10x128xf32> -> vector<128x10xf32>
    %202 = vector.shape_cast %201 : vector<128x10xf32> to vector<8x16x10xf32>
    %cst_91 = arith.constant dense<0.000000e+00> : vector<8x8x10xf32>
    %203 = tpu.matmul %198, %200, %cst_91 {dimension_numbers = #tpu.dot_dimension_numbers<[2], [1], [1], [2], [0, 0, 0, 1, 1, 2], [0], [0]>} : vector<8x8x16xf32>, vector<8x16x10xf32>, vector<8x8x10xf32> -> vector<8x8x10xf32>
    %cst_92 = arith.constant 2.500000e-01 : f32
    %204 = vector.broadcast %cst_92 : f32 to vector<8x8x10xf32>
    %205 = arith.mulf %203, %204 : vector<8x8x10xf32>
    %cst_93 = arith.constant dense<0xFF800000> : vector<8x8xf32>
    %206 = vector.multi_reduction <maximumf>, %205, %cst_93 [2] : vector<8x8x10xf32> to vector<8x8xf32>
    %207 = vector.shape_cast %206 : vector<8x8xf32> to vector<8x8x1xf32>
    %208 = vector.broadcast %207 : vector<8x8x1xf32> to vector<8x8x10xf32>
    %209 = arith.subf %205, %208 : vector<8x8x10xf32>
    %210 = math.exp %209 : vector<8x8x10xf32>
    %cst_94 = arith.constant dense<0.000000e+00> : vector<8x8xf32>
    %211 = vector.multi_reduction <add>, %210, %cst_94 [2] : vector<8x8x10xf32> to vector<8x8xf32>
    %212 = vector.shape_cast %211 : vector<8x8xf32> to vector<8x8x1xf32>
    %213 = vector.broadcast %212 : vector<8x8x1xf32> to vector<8x8x10xf32>
    %214 = arith.divf %210, %213 : vector<8x8x10xf32>
    %cst_95 = arith.constant dense<0.000000e+00> : vector<8x16x8xf32>
    %215 = tpu.matmul %202, %214, %cst_95 {dimension_numbers = #tpu.dot_dimension_numbers<[2], [2], [1], [1], [0, 0, 0, 1, 1, 1], [0], [0]>} : vector<8x16x10xf32>, vector<8x8x10xf32>, vector<8x16x8xf32> -> vector<8x16x8xf32>
    %216 = vector.shape_cast %215 : vector<8x16x8xf32> to vector<128x8xf32>
    %217 = tpu.transpose %216, [1, 0] : vector<128x8xf32> -> vector<8x128xf32>
    %cst_96 = arith.constant dense<0.000000e+00> : vector<8x128xf32>
    %218 = tpu.matmul %217, %166, %cst_96 {dimension_numbers = #tpu.dot_dimension_numbers<[1], [0], [0], [1], [0, 0, 1, 1], [], []>} : vector<8x128xf32>, vector<128x128xf32>, vector<8x128xf32> -> vector<8x128xf32>
    %c17 = arith.constant 17 : index
    %c0_97 = arith.constant 0 : index
    %219 = vector.load %arg4[%c17, %c0_97] : memref<23x128xf32, #tpu.memory_space<vmem>>, vector<1x128xf32>
    %220 = vector.broadcast %219 : vector<1x128xf32> to vector<8x128xf32>
    %221 = arith.addf %218, %220 : vector<8x128xf32>
    %222 = arith.addf %22, %221 : vector<8x128xf32>
    %c18 = arith.constant 18 : index
    %c0_98 = arith.constant 0 : index
    %223 = vector.load %arg4[%c18, %c0_98] : memref<23x128xf32, #tpu.memory_space<vmem>>, vector<1x128xf32>
    %c19 = arith.constant 19 : index
    %c0_99 = arith.constant 0 : index
    %224 = vector.load %arg4[%c19, %c0_99] : memref<23x128xf32, #tpu.memory_space<vmem>>, vector<1x128xf32>
    %cst_100 = arith.constant dense<0.000000e+00> : vector<8xf32>
    %225 = vector.multi_reduction <add>, %222, %cst_100 [1] : vector<8x128xf32> to vector<8xf32>
    %226 = vector.shape_cast %225 : vector<8xf32> to vector<8x1xf32>
    %cst_101 = arith.constant 1.280000e+02 : f32
    %227 = vector.broadcast %cst_101 : f32 to vector<8x1xf32>
    %228 = arith.divf %226, %227 : vector<8x1xf32>
    %229 = vector.broadcast %228 : vector<8x1xf32> to vector<8x128xf32>
    %230 = arith.subf %222, %229 : vector<8x128xf32>
    %231 = arith.mulf %230, %230 : vector<8x128xf32>
    %cst_102 = arith.constant dense<0.000000e+00> : vector<8xf32>
    %232 = vector.multi_reduction <add>, %231, %cst_102 [1] : vector<8x128xf32> to vector<8xf32>
    %233 = vector.shape_cast %232 : vector<8xf32> to vector<8x1xf32>
    %cst_103 = arith.constant 1.280000e+02 : f32
    %234 = vector.broadcast %cst_103 : f32 to vector<8x1xf32>
    %235 = arith.divf %233, %234 : vector<8x1xf32>
    %236 = vector.broadcast %228 : vector<8x1xf32> to vector<8x128xf32>
    %237 = arith.subf %222, %236 : vector<8x128xf32>
    %cst_104 = arith.constant 9.99999974E-6 : f32
    %238 = vector.broadcast %cst_104 : f32 to vector<8x1xf32>
    %239 = arith.addf %235, %238 : vector<8x1xf32>
    %240 = math.rsqrt %239 : vector<8x1xf32>
    %241 = vector.broadcast %240 : vector<8x1xf32> to vector<8x128xf32>
    %242 = arith.mulf %237, %241 : vector<8x128xf32>
    %243 = vector.broadcast %223 : vector<1x128xf32> to vector<8x128xf32>
    %244 = arith.mulf %242, %243 : vector<8x128xf32>
    %245 = vector.broadcast %224 : vector<1x128xf32> to vector<8x128xf32>
    %246 = arith.addf %244, %245 : vector<8x128xf32>
    %c2_105 = arith.constant 2 : index
    %c0_106 = arith.constant 0 : index
    %c0_107 = arith.constant 0 : index
    %247 = vector.load %arg7[%c2_105, %c0_106, %c0_107] : memref<3x128x64xf32, #tpu.memory_space<vmem>>, vector<1x128x64xf32>
    %248 = vector.shape_cast %247 : vector<1x128x64xf32> to vector<128x64xf32>
    %c3_108 = arith.constant 3 : index
    %c0_109 = arith.constant 0 : index
    %c0_110 = arith.constant 0 : index
    %249 = vector.load %arg8[%c3_108, %c0_109, %c0_110] : memref<5x64x128xf32, #tpu.memory_space<vmem>>, vector<1x64x128xf32>
    %250 = vector.shape_cast %249 : vector<1x64x128xf32> to vector<64x128xf32>
    %cst_111 = arith.constant dense<0.000000e+00> : vector<8x64xf32>
    %251 = tpu.matmul %246, %248, %cst_111 {dimension_numbers = #tpu.dot_dimension_numbers<[1], [0], [0], [1], [0, 0, 1, 1], [], []>} : vector<8x128xf32>, vector<128x64xf32>, vector<8x64xf32> -> vector<8x64xf32>
    %c4 = arith.constant 4 : index
    %c0_112 = arith.constant 0 : index
    %252 = vector.load %arg5[%c4, %c0_112] : memref<5x64xf32, #tpu.memory_space<vmem>>, vector<1x64xf32>
    %253 = vector.broadcast %252 : vector<1x64xf32> to vector<8x64xf32>
    %254 = arith.addf %251, %253 : vector<8x64xf32>
    %cst_113 = arith.constant 0.000000e+00 : f32
    %255 = vector.broadcast %cst_113 : f32 to vector<8x64xf32>
    %256 = arith.maximumf %254, %255 : vector<8x64xf32>
    %cst_114 = arith.constant dense<0.000000e+00> : vector<8x128xf32>
    %257 = tpu.matmul %256, %250, %cst_114 {dimension_numbers = #tpu.dot_dimension_numbers<[1], [0], [0], [1], [0, 0, 1, 1], [], []>} : vector<8x64xf32>, vector<64x128xf32>, vector<8x128xf32> -> vector<8x128xf32>
    %c20 = arith.constant 20 : index
    %c0_115 = arith.constant 0 : index
    %258 = vector.load %arg4[%c20, %c0_115] : memref<23x128xf32, #tpu.memory_space<vmem>>, vector<1x128xf32>
    %259 = vector.broadcast %258 : vector<1x128xf32> to vector<8x128xf32>
    %260 = arith.addf %257, %259 : vector<8x128xf32>
    %261 = arith.addf %246, %260 : vector<8x128xf32>
    %c21 = arith.constant 21 : index
    %c0_116 = arith.constant 0 : index
    %262 = vector.load %arg4[%c21, %c0_116] : memref<23x128xf32, #tpu.memory_space<vmem>>, vector<1x128xf32>
    %c22 = arith.constant 22 : index
    %c0_117 = arith.constant 0 : index
    %263 = vector.load %arg4[%c22, %c0_117] : memref<23x128xf32, #tpu.memory_space<vmem>>, vector<1x128xf32>
    %cst_118 = arith.constant dense<0.000000e+00> : vector<8xf32>
    %264 = vector.multi_reduction <add>, %261, %cst_118 [1] : vector<8x128xf32> to vector<8xf32>
    %265 = vector.shape_cast %264 : vector<8xf32> to vector<8x1xf32>
    %cst_119 = arith.constant 1.280000e+02 : f32
    %266 = vector.broadcast %cst_119 : f32 to vector<8x1xf32>
    %267 = arith.divf %265, %266 : vector<8x1xf32>
    %268 = vector.broadcast %267 : vector<8x1xf32> to vector<8x128xf32>
    %269 = arith.subf %261, %268 : vector<8x128xf32>
    %270 = arith.mulf %269, %269 : vector<8x128xf32>
    %cst_120 = arith.constant dense<0.000000e+00> : vector<8xf32>
    %271 = vector.multi_reduction <add>, %270, %cst_120 [1] : vector<8x128xf32> to vector<8xf32>
    %272 = vector.shape_cast %271 : vector<8xf32> to vector<8x1xf32>
    %cst_121 = arith.constant 1.280000e+02 : f32
    %273 = vector.broadcast %cst_121 : f32 to vector<8x1xf32>
    %274 = arith.divf %272, %273 : vector<8x1xf32>
    %275 = vector.broadcast %267 : vector<8x1xf32> to vector<8x128xf32>
    %276 = arith.subf %261, %275 : vector<8x128xf32>
    %cst_122 = arith.constant 9.99999974E-6 : f32
    %277 = vector.broadcast %cst_122 : f32 to vector<8x1xf32>
    %278 = arith.addf %274, %277 : vector<8x1xf32>
    %279 = math.rsqrt %278 : vector<8x1xf32>
    %280 = vector.broadcast %279 : vector<8x1xf32> to vector<8x128xf32>
    %281 = arith.mulf %276, %280 : vector<8x128xf32>
    %282 = vector.broadcast %262 : vector<1x128xf32> to vector<8x128xf32>
    %283 = arith.mulf %281, %282 : vector<8x128xf32>
    %284 = vector.broadcast %263 : vector<1x128xf32> to vector<8x128xf32>
    %285 = arith.addf %283, %284 : vector<8x128xf32>
    %c0_123 = arith.constant 0 : index
    %c0_124 = arith.constant 0 : index
    %c0_125 = arith.constant 0 : index
    %286 = vector.load %arg7[%c0_123, %c0_124, %c0_125] : memref<3x128x64xf32, #tpu.memory_space<vmem>>, vector<1x128x64xf32>
    %287 = vector.shape_cast %286 : vector<1x128x64xf32> to vector<128x64xf32>
    %c2_126 = arith.constant 2 : index
    %c0_127 = arith.constant 0 : index
    %288 = vector.load %arg5[%c2_126, %c0_127] : memref<5x64xf32, #tpu.memory_space<vmem>>, vector<1x64xf32>
    %c4_128 = arith.constant 4 : index
    %c0_129 = arith.constant 0 : index
    %c0_130 = arith.constant 0 : index
    %289 = vector.load %arg8[%c4_128, %c0_129, %c0_130] : memref<5x64x128xf32, #tpu.memory_space<vmem>>, vector<1x64x128xf32>
    %290 = vector.shape_cast %289 : vector<1x64x128xf32> to vector<64x128xf32>
    %c2_131 = arith.constant 2 : index
    %c0_132 = arith.constant 0 : index
    %291 = vector.load %arg4[%c2_131, %c0_132] : memref<23x128xf32, #tpu.memory_space<vmem>>, vector<1x128xf32>
    %cst_133 = arith.constant dense<0.000000e+00> : vector<8x64xf32>
    %292 = tpu.matmul %285, %287, %cst_133 {dimension_numbers = #tpu.dot_dimension_numbers<[1], [0], [0], [1], [0, 0, 1, 1], [], []>} : vector<8x128xf32>, vector<128x64xf32>, vector<8x64xf32> -> vector<8x64xf32>
    %293 = vector.broadcast %288 : vector<1x64xf32> to vector<8x64xf32>
    %294 = arith.addf %292, %293 : vector<8x64xf32>
    %295 = math.tanh %294 : vector<8x64xf32>
    %cst_134 = arith.constant dense<0.000000e+00> : vector<8x128xf32>
    %296 = tpu.matmul %295, %290, %cst_134 {dimension_numbers = #tpu.dot_dimension_numbers<[1], [0], [0], [1], [0, 0, 1, 1], [], []>} : vector<8x64xf32>, vector<64x128xf32>, vector<8x128xf32> -> vector<8x128xf32>
    %297 = vector.broadcast %291 : vector<1x128xf32> to vector<8x128xf32>
    %298 = arith.addf %296, %297 : vector<8x128xf32>
    %299 = vector.extract_strided_slice %298 {offsets = [0, 0], sizes = [8, 4], strides = [1, 1]} : vector<8x128xf32> to vector<8x4xf32>
    %300 = vector.shape_cast %299 : vector<8x4xf32> to vector<1x8x4xf32>
    %c0_135 = arith.constant 0 : index
    %c0_136 = arith.constant 0 : index
    %c0_137 = arith.constant 0 : index
    %301 = vector.load %arg11[%c0_135, %c0_136, %c0_137] : memref<1x8x4xf32, #tpu.memory_space<vmem>>, vector<1x8x4xf32>
    tpu.vector_store %arg11[%c0_135, %c0_136, %c0_137], %300 {strides = array<i32>} : memref<1x8x4xf32, #tpu.memory_space<vmem>>, vector<1x8x4xf32>,
    return
  }
  func.func @transform_0(%arg0: i32) -> (i32, i32, i32) {
    %c0_i32 = arith.constant 0 : i32
    %c0_i32_0 = arith.constant 0 : i32
    %c0_i32_1 = arith.constant 0 : i32
    return %arg0, %c0_i32, %c0_i32_0 : i32, i32, i32
  }
  func.func @transform_1(%arg0: i32) -> (i32, i32, i32) {
    %c0_i32 = arith.constant 0 : i32
    %c0_i32_0 = arith.constant 0 : i32
    %c0_i32_1 = arith.constant 0 : i32
    return %arg0, %c0_i32, %c0_i32_0 : i32, i32, i32
  }
  func.func @transform_2(%arg0: i32) -> (i32, i32, i32) {
    %c0_i32 = arith.constant 0 : i32
    %c0_i32_0 = arith.constant 0 : i32
    %c0_i32_1 = arith.constant 0 : i32
    return %arg0, %c0_i32, %c0_i32_0 : i32, i32, i32
  }
  func.func @transform_3(%arg0: i32) -> (i32, i32) {
    %c0_i32 = arith.constant 0 : i32
    %c0_i32_0 = arith.constant 0 : i32
    %c0_i32_1 = arith.constant 0 : i32
    return %c0_i32, %c0_i32_0 : i32, i32
  }
  func.func @transform_4(%arg0: i32) -> (i32, i32) {
    %c0_i32 = arith.constant 0 : i32
    %c0_i32_0 = arith.constant 0 : i32
    %c0_i32_1 = arith.constant 0 : i32
    return %c0_i32, %c0_i32_0 : i32, i32
  }
  func.func @transform_5(%arg0: i32) -> (i32, i32) {
    %c0_i32 = arith.constant 0 : i32
    %c0_i32_0 = arith.constant 0 : i32
    %c0_i32_1 = arith.constant 0 : i32
    return %c0_i32, %c0_i32_0 : i32, i32
  }
  func.func @transform_6(%arg0: i32) -> (i32, i32, i32) {
    %c0_i32 = arith.constant 0 : i32
    %c0_i32_0 = arith.constant 0 : i32
    %c0_i32_1 = arith.constant 0 : i32
    %c0_i32_2 = arith.constant 0 : i32
    return %c0_i32, %c0_i32_0, %c0_i32_1 : i32, i32, i32
  }
  func.func @transform_7(%arg0: i32) -> (i32, i32, i32) {
    %c0_i32 = arith.constant 0 : i32
    %c0_i32_0 = arith.constant 0 : i32
    %c0_i32_1 = arith.constant 0 : i32
    %c0_i32_2 = arith.constant 0 : i32
    return %c0_i32, %c0_i32_0, %c0_i32_1 : i32, i32, i32
  }
  func.func @transform_8(%arg0: i32) -> (i32, i32, i32) {
    %c0_i32 = arith.constant 0 : i32
    %c0_i32_0 = arith.constant 0 : i32
    %c0_i32_1 = arith.constant 0 : i32
    %c0_i32_2 = arith.constant 0 : i32
    return %c0_i32, %c0_i32_0, %c0_i32_1 : i32, i32, i32
  }
  func.func @transform_9(%arg0: i32) -> (i32, i32, i32) {
    %c0_i32 = arith.constant 0 : i32
    %c0_i32_0 = arith.constant 0 : i32
    %c0_i32_1 = arith.constant 0 : i32
    %c0_i32_2 = arith.constant 0 : i32
    return %c0_i32, %c0_i32_0, %c0_i32_1 : i32, i32, i32
  }
  func.func @transform_10(%arg0: i32) -> (i32, i32, i32) {
    %c0_i32 = arith.constant 0 : i32
    %c0_i32_0 = arith.constant 0 : i32
    %c0_i32_1 = arith.constant 0 : i32
    return %arg0, %c0_i32, %c0_i32_0 : i32, i32, i32
  }
}

</mosaic_0001>

<bundles_post_ra>
// kernel: state_dae_forward.1
= control target key start
LH: loop header
LB: loop body
LE: loop exit
PB: predicated region body
PF: predicated region fallthrough
CT: control target
= control target key end

     0   :  { %s3274_s13 = smov 0   ;;  %s4287_s0 = inlined_call_operand.vmem [shape: f32[2,8,3], index: 0, kind: input, shape index: {}]   ;;  %s4288_s1 = inlined_call_operand.vmem [shape: f32[2,8,4], index: 1, kind: input, shape index: {}]   ;;  %s4289_s2 = inlined_call_operand.vmem [shape: f32[2,8,3], index: 2, kind: input, shape index: {}]   ;;  %s4290_s3 = inlined_call_operand.vmem [shape: f32[23,128], index: 3, kind: input, shape index: {}]   ;;  %s4291_s4 = inlined_call_operand.vmem [shape: f32[5,64], index: 4, kind: input, shape index: {}]   ;;  %s4292_s5 = inlined_call_operand.vmem [shape: f32[7,64], index: 5, kind: input, shape index: {}]   ;;  %s4293_s6 = inlined_call_operand.vmem [shape: f32[3,128,64], index: 6, kind: input, shape index: {}]   ;;  %s4294_s7 = inlined_call_operand.vmem [shape: f32[5,64,128], index: 7, kind: input, shape index: {}]   ;;  %s4295_s8 = inlined_call_operand.vmem [shape: f32[4,128,128], index: 8, kind: input, shape index: {}]   ;;  %s4296_s9 = inlined_call_operand.vmem [shape: f32[2,128,256], index: 9, kind: input, shape index: {}]   ;;  %s4297_s10 = inlined_call_operand.vmem [shape: f32[2,8,4], index: 10, kind: output, shape index: {}]  }
   0x1 LB: > { %s2802_s14 = sadd.s32 4294967295, %s3207_s13   ;;  %p2806_p0 = scmp.ge.s32.totalorder %s3207_s13, 1  ;;  %s3207_s13 = sphi %s3274_s13, %s20_s13  }
   0x2   : > { %p329_p1 = scmp.lt.s32.totalorder %s3207_s13, 3 }
   0x4   : > { %p330_p2 = pnand %p2806_p0, %p329_p1 }
   0x5   : > { %p373_p3 = scmp.lt.s32.totalorder (!%p330_p2), %s2802_s14, 1  ;;  %s3209_s24 = smov (!%p330_p2), 32  }
   0x6   : > { %333 = sbr.rel (%p330_p2) target bundleno = 4931 (0x1343), region = 60  ;;  %s3210_s26 = smov (!%p330_p2), 96  }
   0x7   : > { %s3211_s27 = smov (!%p330_p2), 112   ;;  %s3213_s29 = smov (!%p330_p2), 80  }
   0x8   : > { %s3214_s30 = smov (!%p330_p2), 48  }
   0xb   : > { %v392_v0 = vld [vmem:[%s4292_s5] sm:$0x7]  ;;  %vm420_vm0 = vcmask 1042432   ;;  %v403_v1 = vld [vmem:[%s4294_s7 + $0x38] sm:$0xff]  ;;  %v402_v2 = vld [vmem:[%s4294_s7 + $0x30] sm:$0xff]  ;;  %s4299_s14 = smov (!%p373_p3, %s2802_s14), 1 }
   0xc   : > { %2819 = vmatpush.msk.msra.mxu0 %vm420_vm0, %v392_v0  ;;  %2822 = vmatpush.msk.msra.mxu2 %vm420_vm0, %v392_v0  ;;  %vm416_vm1 = vcmask 23552   ;;  %v401_v3 = vld [vmem:[%s4294_s7 + $0x28] sm:$0xff]  ;;  %v393_v4 = vld [vmem:[%s4292_s5 + $0x3] sm:$0xf]  ;;  %s3297_s25 = sshll.u32 %s4299_s14, 3  ;;  %vm522_vm2 = vcmask 1043456  }
   0xd   : > { %458 = vmatpush.msra.mxu1 %v403_v1  ;;  %505 = vmatpush.msra.mxu3 %v403_v1  ;;  %s384_s28 = scalar_lea.vmem %s4289_s2, %s3297_s25  ;;  %s376_s11 = scalar_lea.vmem %s4287_s0, %s3297_s25  ;;  %vm518_vm3 = vcmask 31744   ;;  %v400_v8 = vld [vmem:[%s4294_s7 + $0x20] sm:$0xff]  ;;  %v399_v9 = vld [vmem:[%s4294_s7 + $0x18] sm:$0xff]  ;;  %v398_v11 = vld [vmem:[%s4294_s7 + $0x10] sm:$0xff]  ;;  %vm446_vm4 = vcmask 523264   ;;  %vm785_vm5 = vcmask 130048  }
   0xe   : > { %v391_v5 = vld [vmem:[%s384_s28] sm:$0xff]  ;;  %s380_s15 = scalar_lea.vmem %s4288_s1, %s3297_s25  ;;  %v2818_v10 = vld [vmem:[%s4294_s7 + $0x78] sm:$0xff]  ;;  %v2817_v12 = vld [vmem:[%s4294_s7 + $0x70] sm:$0xff]  ;;  %s3212_s28 = smov 64   ;;  %vm970_vm6 = vcmask 58368   ;;  %vm1163_vm11 = vcmask 64512  }
   0xf   : > { %459 = vmatpush.msra.mxu1 %v402_v2  ;;  %506 = vmatpush.msra.mxu3 %v402_v2  ;;  %v389_v6 = vld [vmem:[%s376_s11] sm:$0xff]  ;;  %v397_v13 = vld [vmem:[%s4294_s7 + $0x8] sm:$0xff]  ;;  %v2814_v17 = vld [vmem:[%s4294_s7 + $0x58] sm:$0xff]  ;;  %s3215_s11 = smov 16   ;;  %s388_s16 = scalar_lea.vmem %s4297_s10, %s3297_s25 }
  0x10   : > { %2820 = vmatmul.msk.f32.vlgmr.msra.gmra.mxu0 %vm416_vm1, %v391_v5  ;;  %2823 = vmatmul.msk.f32.vlgmr.msra.gmra.mxu2 %vm416_vm1, %v389_v6  ;;  %v390_v7 = vld [vmem:[%s380_s15] sm:$0xff]  ;;  %v2816_v14 = vld [vmem:[%s4294_s7 + $0x68] sm:$0xff]  ;;  %v2813_v18 = vld [vmem:[%s4294_s7 + $0x50] sm:$0xff] }
  0x11   : > { %460 = vmatpush.msra.mxu1 %v401_v3  ;;  %507 = vmatpush.msra.mxu3 %v401_v3  ;;  %v396_v15 = vld [vmem:[%s4294_s7] sm:$0xff]  ;;  %v2812_v19 = vld [vmem:[%s4294_s7 + $0x48] sm:$0xff]  ;;  %v588_v21 = vld [vmem:[%s4295_s8 + $0x78] sm:$0xff] }
  0x12   : > { %2825 = vmatpush.msk.msra.mxu0 %vm522_vm2, %v393_v4  ;;  %559 = vmatpush.msra.mxu2 %v2818_v10  ;;  %v2815_v16 = vld [vmem:[%s4294_s7 + $0x60] sm:$0xff]  ;;  %v587_v22 = vld [vmem:[%s4295_s8 + $0x70] sm:$0xff]  ;;  %v586_v23 = vld [vmem:[%s4295_s8 + $0x68] sm:$0xff] }
  0x13   : > { %461 = vmatpush.msra.mxu1 %v400_v8  ;;  %508 = vmatpush.msra.mxu3 %v400_v8  ;;  %v2811_v20 = vld [vmem:[%s4294_s7 + $0x40] sm:$0xff]  ;;  %v584_v25 = vld [vmem:[%s4295_s8 + $0x58] sm:$0xff]  ;;  %v636_v26 = vld [vmem:[%s4296_s9 + $0xf0] sm:$0xff] }
  0x14   : > { %560 = vmatpush.msra.mxu2 %v2817_v12  ;;  %v585_v24 = vld [vmem:[%s4295_s8 + $0x60] sm:$0xff]  ;;  %v637_v27 = vld [vmem:[%s4296_s9 + $0xf8] sm:$0xff]  ;;  %v635_v29 = vld [vmem:[%s4296_s9 + $0xe8] sm:$0xff] }
  0x15   : > { %462 = vmatpush.msra.mxu1 %v399_v9  ;;  %509 = vmatpush.msra.mxu3 %v399_v9  ;;  %v634_v28 = vld [vmem:[%s4296_s9 + $0xe0] sm:$0xff]  ;;  %v632_v30 = vld [vmem:[%s4296_s9 + $0xd0] sm:$0xff]  ;;  %v633_v32 = vld [vmem:[%s4296_s9 + $0xd8] sm:$0xff] }
  0x16   : > { %561 = vmatpush.msra.mxu2 %v2816_v14  ;;  %v583_v31 = vld [vmem:[%s4295_s8 + $0x50] sm:$0xff]  ;;  %v630_v33 = vld [vmem:[%s4296_s9 + $0xc0] sm:$0xff]  ;;  %v582_v34 = vld [vmem:[%s4295_s8 + $0x48] sm:$0xff] }
  0x17   : > { %463 = vmatpush.msra.mxu1 %v398_v11  ;;  %510 = vmatpush.msra.mxu3 %v398_v11  ;;  %v631_v35 = vld [vmem:[%s4296_s9 + $0xc8] sm:$0xff]  ;;  %v3092_v36 = vld [vmem:[%s4291_s4] ss:$0 sm:$0xff]  ;;  %v628_v37 = vld [vmem:[%s4296_s9 + $0xb0] sm:$0xff] }
  0x18   : > { %2826 = vmatmul.msk.f32.vlgmr.msra.gmra.mxu0 %vm518_vm3, %v390_v7  ;;  %562 = vmatpush.msra.mxu2 %v2815_v16  ;;  %v581_v38 = vld [vmem:[%s4295_s8 + $0x40] sm:$0xff]  ;;  %v629_v39 = vld [vmem:[%s4296_s9 + $0xb8] sm:$0xff]  ;;  %v627_v43 = vld [vmem:[%s4296_s9 + $0xa8] sm:$0xff] }
  0x19   : > { %464 = vmatpush.msra.mxu1 %v397_v13  ;;  %511 = vmatpush.msra.mxu3 %v397_v13  ;;  %v626_v40 = vld [vmem:[%s4296_s9 + $0xa0] sm:$0xff]  ;;  %v580_v42 = vld [vmem:[%s4295_s8 + $0x38] sm:$0xff]  ;;  %v579_v45 = vld [vmem:[%s4295_s8 + $0x30] sm:$0xff] }
  0x1a   : > { %563 = vmatpush.msra.mxu2 %v2814_v17  ;;  %640 = vmatpush.msra.mxu0 %v588_v21  ;;  %v578_v46 = vld [vmem:[%s4295_s8 + $0x28] sm:$0xff]  ;;  %v3093_v47 = vld [vmem:[%s4291_s4 + $0x1] ss:$0 sm:$0xff]  ;;  %v576_v52 = vld [vmem:[%s4295_s8 + $0x18] sm:$0xff] }
  0x1b   : > { %465 = vmatpush.msra.mxu1 %v396_v15  ;;  %512 = vmatpush.msra.mxu3 %v396_v15  ;;  %v577_v49 = vld [vmem:[%s4295_s8 + $0x20] sm:$0xff]  ;;  %v575_v55 = vld [vmem:[%s4295_s8 + $0x10] sm:$0xff]  ;;  %v574_v56 = vld [vmem:[%s4295_s8 + $0x8] sm:$0xff] }
  0x1c   : > { %564 = vmatpush.msra.mxu2 %v2813_v18  ;;  %641 = vmatpush.msra.mxu0 %v587_v22  ;;  %v573_v57 = vld [vmem:[%s4295_s8] sm:$0xff]  ;;  %v624_v61 = vld [vmem:[%s4296_s9 + $0x90] sm:$0xff]  ;;  %v625_v62 = vld [vmem:[%s4296_s9 + $0x98] sm:$0xff] }
  0x1d   : > { %660 = vmatpush.msrb.mxu1 %v636_v26  ;;  %680 = vmatpush.msrb.mxu3 %v637_v27  ;;  %v572_v59 = vld [vmem:[%s4290_s3 + $0x3] sm:$0x3]  ;;  %v623_v0 = vld [vmem:[%s4296_s9 + $0x88] sm:$0xff]  ;;  %v620_v1 = vld [vmem:[%s4296_s9 + $0x70] sm:$0xff] }
  0x1e   : > { %565 = vmatpush.msra.mxu2 %v2812_v19  ;;  %642 = vmatpush.msra.mxu0 %v586_v23  ;;  %v622_v63 = vld [vmem:[%s4296_s9 + $0x80] sm:$0xff]  ;;  %v621_v2 = vld [vmem:[%s4296_s9 + $0x78] sm:$0xff]  ;;  %v619_v4 = vld [vmem:[%s4296_s9 + $0x68] sm:$0xff] }
  0x1f   : > { %661 = vmatpush.msrb.mxu1 %v634_v28  ;;  %681 = vmatpush.msrb.mxu3 %v635_v29  ;;  %v618_v3 = vld [vmem:[%s4296_s9 + $0x60] sm:$0xff]  ;;  %v616_v5 = vld [vmem:[%s4296_s9 + $0x50] sm:$0xff]  ;;  %v617_v6 = vld [vmem:[%s4296_s9 + $0x58] sm:$0xff] }
  0x20   : > { %566 = vmatpush.msra.mxu2 %v2811_v20  ;;  %643 = vmatpush.msra.mxu0 %v585_v24  ;;  %v614_v7 = vld [vmem:[%s4296_s9 + $0x40] sm:$0xff]  ;;  %v615_v8 = vld [vmem:[%s4296_s9 + $0x48] sm:$0xff]  ;;  %v612_v9 = vld [vmem:[%s4296_s9 + $0x30] sm:$0xff] }
  0x21   : > { %662 = vmatpush.msrb.mxu1 %v632_v30  ;;  %682 = vmatpush.msrb.mxu3 %v633_v32  ;;  %v613_v10 = vld [vmem:[%s4296_s9 + $0x38] sm:$0xff]  ;;  %v610_v11 = vld [vmem:[%s4296_s9 + $0x20] sm:$0xff]  ;;  %v611_v12 = vld [vmem:[%s4296_s9 + $0x28] sm:$0xff] }
  0x22   : > { %644 = vmatpush.msra.mxu0 %v584_v25  ;;  %v608_v13 = vld [vmem:[%s4296_s9 + $0x10] sm:$0xff]  ;;  %v609_v14 = vld [vmem:[%s4296_s9 + $0x18] sm:$0xff]  ;;  %v606_v15 = vld [vmem:[%s4296_s9] sm:$0xff] }
  0x23   : > { %663 = vmatpush.msrb.mxu1 %v630_v33  ;;  %683 = vmatpush.msrb.mxu3 %v631_v35  ;;  %v607_v16 = vld [vmem:[%s4296_s9 + $0x8] sm:$0xff]  ;;  %v3096_v17 = vld [vmem:[%s4290_s3 + $0x5] ss:$0 sm:$0xff]  ;;  %v3515_v20 = vld [vmem:[%s4290_s3] ss:$0 sm:$0xff] }
  0x24   : > { %645 = vmatpush.msra.mxu0 %v583_v31  ;;  %v3095_v21 = vld [vmem:[%s4290_s3 + $0x1] ss:$0 sm:$0xff]  ;;  %v3097_v28 = vld [vmem:[%s4290_s3 + $0x6] ss:$0 sm:$0xff] }
  0x25   : > { %664 = vmatpush.msrb.mxu1 %v628_v37  ;;  %684 = vmatpush.msrb.mxu3 %v629_v39 }
  0x26   : > { %646 = vmatpush.msra.mxu0 %v582_v34 }
  0x27   : > { %665 = vmatpush.msrb.mxu1 %v626_v40  ;;  %685 = vmatpush.msrb.mxu3 %v627_v43 }
  0x28   : > { %647 = vmatpush.msra.mxu0 %v581_v38 }
  0x29   : > { %666 = vmatpush.msrb.mxu1 %v624_v61  ;;  %686 = vmatpush.msrb.mxu3 %v625_v62 }
  0x2a   : > { %648 = vmatpush.msra.mxu0 %v580_v42 }
  0x2b   : > { %667 = vmatpush.msrb.mxu1 %v622_v63  ;;  %687 = vmatpush.msrb.mxu3 %v623_v0 }
  0x2c   : > { %649 = vmatpush.msra.mxu0 %v579_v45 }
  0x2d   : > { %668 = vmatpush.msrb.mxu1 %v620_v1  ;;  %688 = vmatpush.msrb.mxu3 %v621_v2 }
  0x2e   : > { %650 = vmatpush.msra.mxu0 %v578_v46 }
  0x2f   : > { %669 = vmatpush.msrb.mxu1 %v618_v3  ;;  %689 = vmatpush.msrb.mxu3 %v619_v4 }
  0x30   : > { %651 = vmatpush.msra.mxu0 %v577_v49 }
  0x31   : > { %670 = vmatpush.msrb.mxu1 %v616_v5  ;;  %690 = vmatpush.msrb.mxu3 %v617_v6 }
  0x32   : > { %652 = vmatpush.msra.mxu0 %v576_v52 }
  0x33   : > { %671 = vmatpush.msrb.mxu1 %v614_v7  ;;  %691 = vmatpush.msrb.mxu3 %v615_v8 }
  0x34   : > { %653 = vmatpush.msra.mxu0 %v575_v55 }
  0x35   : > { %672 = vmatpush.msrb.mxu1 %v612_v9  ;;  %692 = vmatpush.msrb.mxu3 %v613_v10 }
  0x36   : > { %654 = vmatpush.msra.mxu0 %v574_v56 }
  0x37   : > { %673 = vmatpush.msrb.mxu1 %v610_v11  ;;  %693 = vmatpush.msrb.mxu3 %v611_v12 }
  0x38   : > { %655 = vmatpush.msra.mxu0 %v573_v57 }
  0x39   : > { %656 = vmatmul.f32.vlgmr.msra.gmra.mxu0 %v572_v59  ;;  %674 = vmatpush.msrb.mxu1 %v608_v13 }
  0x3a   : > { %694 = vmatpush.msrb.mxu3 %v609_v14 }
  0x3b   : > { %675 = vmatpush.msrb.mxu1 %v606_v15 }
  0x3c   : > { %695 = vmatpush.msrb.mxu3 %v607_v16 }
  0x8d   : > { %v441_v41 = vpop.f32.mrf.mxu0 }
  0x8e   : > { %v442_v44 = vadd.f32 %v3092_v36, %v441_v41 }
  0x90   : > { %3118 = vtanh.f32 %v442_v44 }
  0x93   : > { %v490_v48 = vpop.f32.mrf.mxu2 }
  0x94   : > { %v491_v50 = vadd.f32 %v3092_v36, %v490_v48 }
  0x95   : > { %v543_v51 = vpop.f32.mrf.mxu0 }
  0x96   : > { %v3119_v53 = vpop.eup %3118  ;;  %3120 = vtanh.f32 %v491_v50  ;;  %v544_v54 = vadd.f32 %v3093_v47, %v543_v51 }
  0x97   : > { %2821 = vmatmul.msk.f32.vlgmr.msra.gmra.mxu1 %vm446_vm4, %v3119_v53 }
  0x98   : > { %3122 = vtanh.f32 %v544_v54 }
  0x9c   : > { %v3121_v58 = vpop.eup %3120 }
  0x9d   : > { %2824 = vmatmul.msk.f32.vlgmr.msra.gmra.mxu3 %vm446_vm4, %v3121_v58 }
  0x9e   : > { %v3123_v60 = vpop.eup %3122 }
  0x9f   : > { %2827 = vmatmul.msk.f32.vlgmr.msra.gmra.mxu2 %vm446_vm4, %v3123_v60 }
  0xb6   : > { %v657_v18 = vpop.f32.mrf.mxu0 }
  0xb7   : > { %v658_v19 = vadd.f32 %v3096_v17, %v657_v18 }
  0xb9   : > { %717 = vrot.lane.b32.xlu2 %v658_v19, %s3209_s24  ;;  %709 = vrot.lane.b32.xlu1 %v658_v19, %s3210_s26 }
  0xba   : > { %707 = vrot.lane.b32.xlu0 %v658_v19, %s3211_s27 }
  0xc1   : > { %713 = vrot.lane.b32.xlu2 %v658_v19, %s3212_s28  ;;  %711 = vrot.lane.b32.xlu1 %v658_v19, %s3213_s29 }
  0xc9   : > { %715 = vrot.lane.b32.xlu2 %v658_v19, %s3214_s30  ;;  %719 = vrot.lane.b32.xlu1 %v658_v19, %s3215_s11 }
 0x113   : > { %v718_v43 = vpop.permute.xlu2 %717 }
 0x114   : > { %v3532_v27 = vpop.f32.mrf.mxu1 }
 0x11b   : > { %v714_v45 = vpop.permute.xlu2 %713 }
 0x120   : > { %v514_v22 = vpop.f32.mrf.mxu3 }
 0x121   : > { %v515_v23 = vadd.f32 %v3515_v20, %v514_v22 }
 0x122   : > { %v568_v24 = vpop.f32.mrf.mxu2 }
 0x123   : > { %v569_v25 = vadd.f32 %v3095_v21, %v568_v24  ;;  %v716_v48 = vpop.permute.xlu2 %715 }
 0x125   : > { %v3524_v26 = vadd.f32 %v569_v25, %v515_v23 }
 0x127   : > { %676 = vmatmul.f32.vlgmr.msrb.gmra.mxu1 %v3524_v26  ;;  %696 = vmatmul.f32.vlgmr.msrb.gmra.mxu3 %v3524_v26 }
 0x12b   : > { %v710_v38 = vpop.permute.xlu1 %709 }
 0x12c   : > { %v708_v31 = vpop.permute.xlu0 %707 }
 0x133   : > { %v712_v41 = vpop.permute.xlu1 %711 }
 0x13b   : > { %v720_v53 = vpop.permute.xlu1 %719 }
 0x1a4   : > { %v677_v29 = vpop.f32.mrf.mxu1 }
 0x1a5   : > { %v702_v30 = vadd.f32 %v3097_v28, %v677_v29 }
 0x1a7   : > { %721 = vxpose.xlu0.b32.start.end [1/1] (short) %v702_v30, 128 }
 0x1aa   : > { %v3550_v5 = vpop.f32.mrf.mxu3 }
 0x24b   : > { %v737_v32 = vpop.trf.xlu0 }
 0x253   : > { %v738_v33 = vpop.trf.xlu0 }
 0x254   : > { %802 = vmatpush.msra.mxu2 %v738_v33 }
 0x256   : > { %803 = vmatpush.msra.mxu2 %v737_v32 }
 0x257   : > { %2844 = vmatmul.msk.f32.vlgmr.msra.gmra.mxu2 %vm785_vm5, %v658_v19 }
 0x25b   : > { %v739_v34 = vpop.trf.xlu0 }
 0x263   : > { %v740_v35 = vpop.trf.xlu0 }
 0x264   : > { %824 = vmatpush.msra.mxu2 %v740_v35 }
 0x266   : > { %825 = vmatpush.msra.mxu2 %v739_v34 }
 0x267   : > { %2845 = vmatmul.msk.f32.vlgmr.msra.gmra.mxu2 %vm785_vm5, %v708_v31 }
 0x26b   : > { %v741_v36 = vpop.trf.xlu0 }
 0x273   : > { %v742_v37 = vpop.trf.xlu0 }
 0x274   : > { %846 = vmatpush.msra.mxu2 %v742_v37 }
 0x276   : > { %847 = vmatpush.msra.mxu2 %v741_v36 }
 0x277   : > { %2846 = vmatmul.msk.f32.vlgmr.msra.gmra.mxu2 %vm785_vm5, %v710_v38 }
 0x27b   : > { %v743_v39 = vpop.trf.xlu0 }
 0x283   : > { %v744_v40 = vpop.trf.xlu0 }
 0x284   : > { %868 = vmatpush.msra.mxu0 %v744_v40 }
 0x286   : > { %869 = vmatpush.msra.mxu0 %v743_v39 }
 0x287   : > { %2847 = vmatmul.msk.f32.vlgmr.msra.gmra.mxu0 %vm785_vm5, %v712_v41 }
 0x28b   : > { %v745_v42 = vpop.trf.xlu0 }
 0x293   : > { %v746_v44 = vpop.trf.xlu0 }
 0x294   : > { %890 = vmatpush.msra.mxu2 %v746_v44 }
 0x296   : > { %891 = vmatpush.msra.mxu2 %v745_v42 }
 0x297   : > { %2848 = vmatmul.msk.f32.vlgmr.msra.gmra.mxu2 %vm785_vm5, %v714_v45 }
 0x29b   : > { %v747_v46 = vpop.trf.xlu0 }
 0x2a3   : > { %v748_v47 = vpop.trf.xlu0 }
 0x2a4   : > { %912 = vmatpush.msra.mxu1 %v748_v47 }
 0x2a6   : > { %913 = vmatpush.msra.mxu1 %v747_v46 }
 0x2a7   : > { %2849 = vmatmul.msk.f32.vlgmr.msra.gmra.mxu1 %vm785_vm5, %v716_v48 }
 0x2ab   : > { %v749_v49 = vpop.trf.xlu0 }
 0x2b3   : > { %v750_v50 = vpop.trf.xlu0 }
 0x2b4   : > { %934 = vmatpush.msra.mxu3 %v750_v50 }
 0x2b6   : > { %935 = vmatpush.msra.mxu3 %v749_v49 }
 0x2b7   : > { %2850 = vmatmul.msk.f32.vlgmr.msra.gmra.mxu3 %vm785_vm5, %v718_v43 }
 0x2bb   : > { %v751_v51 = vpop.trf.xlu0 }
 0x2c3   : > { %v752_v52 = vpop.trf.xlu0 }
 0x2c4   : > { %956 = vmatpush.msra.mxu0 %v752_v52 }
 0x2c6   : > { %957 = vmatpush.msra.mxu0 %v751_v51 }
 0x2c7   : > { %2851 = vmatmul.msk.f32.vlgmr.msra.gmra.mxu0 %vm785_vm5, %v720_v53 }
 0x2da   : > { %v805_v54 = vpop.f32.mrf.mxu2 }
 0x2db   : > { %v962_v55 = vmul.f32 0.25, %v805_v54 }
 0x2dd   : > { %v971_v56 = vsel %vm970_vm6, %v962_v55, -inf }
 0x2de   : > { %972 = vmax.xlane.f32.xlu0 %v971_v56 }
 0x2ea   : > { %v827_v57 = vpop.f32.mrf.mxu2 }
 0x2eb   : > { %v963_v0 = vmul.f32 0.25, %v827_v57 }
 0x2ed   : > { %v974_v1 = vsel %vm970_vm6, %v963_v0, -inf }
 0x2fa   : > { %v849_v58 = vpop.f32.mrf.mxu2 }
 0x2fb   : > { %v964_v59 = vmul.f32 0.25, %v849_v58 }
 0x2fd   : > { %v977_v60 = vsel %vm970_vm6, %v964_v59, -inf }
 0x2fe   : > { %978 = vmax.xlane.f32.xlu1 %v977_v60 }
 0x304   : > { %v871_v61 = vpop.f32.mrf.mxu0 }
 0x305   : > { %v965_v62 = vmul.f32 0.25, %v871_v61 }
 0x307   : > { %v980_v63 = vsel %vm970_vm6, %v965_v62, -inf }
 0x308   : > { %981 = vmax.xlane.f32.xlu2 %v980_v63 }
 0x310   : > { %975 = vmax.xlane.f32.xlu2 %v974_v1 }
 0x31a   : > { %v893_v2 = vpop.f32.mrf.mxu2 }
 0x31b   : > { %v966_v3 = vmul.f32 0.25, %v893_v2 }
 0x31d   : > { %v983_v4 = vsel %vm970_vm6, %v966_v3, -inf }
 0x31e   : > { %984 = vmax.xlane.f32.xlu1 %v983_v4 }
 0x324   : > { %v915_v12 = vpop.f32.mrf.mxu1 }
 0x325   : > { %v967_v13 = vmul.f32 0.25, %v915_v12 }
 0x327   : > { %v986_v14 = vsel %vm970_vm6, %v967_v13, -inf }
 0x33a   : > { %v937_v6 = vpop.f32.mrf.mxu3 }
 0x33b   : > { %v968_v7 = vmul.f32 0.25, %v937_v6 }
 0x33d   : > { %v989_v8 = vsel %vm970_vm6, %v968_v7, -inf }
 0x33e   : > { %990 = vmax.xlane.f32.xlu1 %v989_v8  ;;  %v3098_v8 = vld [vmem:[%s4290_s3 + $0x7] ss:$0 sm:$0xff] }
 0x344   : > { %v959_v9 = vpop.f32.mrf.mxu0 }
 0x345   : > { %v969_v10 = vmul.f32 0.25, %v959_v9  ;;  %v705_v9 = vadd.f32 %v3098_v8, %v3550_v5 }
 0x347   : > { %v992_v11 = vsel %vm970_vm6, %v969_v10, -inf }
 0x348   : > { %993 = vmax.xlane.f32.xlu2 %v992_v11 }
 0x350   : > { %987 = vmax.xlane.f32.xlu2 %v986_v14 }
 0x351   : > { %v973_v15 = vpop.xlane.xlu0 %972 }
 0x352   : > { %v995_v16 = vsub.f32 %v962_v55, %v973_v15 }
 0x354   : > { %v1003_v17 = vmul.f32 1.442695, %v995_v16 }
 0x356   : > { %3124 = vpow2.f32 %v1003_v17 }
 0x35c   : > { %v3555_v18 = vpop.eup %3124 }
 0x35d   : > { %v1019_v19 = vsel %vm970_vm6, %v3555_v18, 0.0 }
 0x35e   : > { %1020 = vadd.xlane.f32.xlu1 %v1019_v19 }
 0x371   : > { %v979_v21 = vpop.xlane.xlu1 %978 }
 0x372   : > { %v997_v22 = vsub.f32 %v964_v59, %v979_v21 }
 0x374   : > { %v1007_v23 = vmul.f32 1.442695, %v997_v22 }
 0x376   : > { %3126 = vpow2.f32 %v1007_v23 }
 0x37b   : > { %v982_v24 = vpop.xlane.xlu2 %981 }
 0x37c   : > { %v3559_v25 = vpop.eup %3126  ;;  %v998_v31 = vsub.f32 %v965_v62, %v982_v24 }
 0x37d   : > { %v1025_v28 = vsel %vm970_vm6, %v3559_v25, 0.0 }
 0x37e   : > { %1026 = vadd.xlane.f32.xlu1 %v1025_v28  ;;  %v1009_v33 = vmul.f32 1.442695, %v998_v31 }
 0x383   : > { %v976_v29 = vpop.xlane.xlu2 %975 }
 0x384   : > { %v996_v30 = vsub.f32 %v963_v0, %v976_v29 }
 0x386   : > { %v1005_v32 = vmul.f32 1.442695, %v996_v30 }
 0x388   : > { %3128 = vpow2.f32 %v1005_v32 }
 0x389   : > { %3130 = vpow2.f32 %v1009_v33 }
 0x38e   : > { %v3563_v34 = vpop.eup %3128 }
 0x38f   : > { %v1022_v35 = vsel %vm970_vm6, %v3563_v34, 0.0  ;;  %v3567_v38 = vpop.eup %3130 }
 0x390   : > { %1023 = vadd.xlane.f32.xlu2 %v1022_v35  ;;  %v1028_v40 = vsel %vm970_vm6, %v3567_v38, 0.0 }
 0x391   : > { %v985_v36 = vpop.xlane.xlu1 %984 }
 0x392   : > { %v999_v37 = vsub.f32 %v966_v3, %v985_v36 }
 0x394   : > { %v1011_v39 = vmul.f32 1.442695, %v999_v37 }
 0x396   : > { %3132 = vpow2.f32 %v1011_v39 }
 0x398   : > { %1029 = vadd.xlane.f32.xlu2 %v1028_v40 }
 0x39c   : > { %v3571_v41 = vpop.eup %3132 }
 0x39d   : > { %v1031_v42 = vsel %vm970_vm6, %v3571_v41, 0.0 }
 0x3a0   : > { %1032 = vadd.xlane.f32.xlu2 %v1031_v42 }
 0x3b1   : > { %v991_v43 = vpop.xlane.xlu1 %990 }
 0x3b2   : > { %v1001_v44 = vsub.f32 %v968_v7, %v991_v43 }
 0x3b4   : > { %v1015_v45 = vmul.f32 1.442695, %v1001_v44 }
 0x3b6   : > { %3134 = vpow2.f32 %v1015_v45 }
 0x3bb   : > { %v994_v46 = vpop.xlane.xlu2 %993 }
 0x3bc   : > { %v3575_v47 = vpop.eup %3134  ;;  %v1002_v48 = vsub.f32 %v969_v10, %v994_v46 }
 0x3bd   : > { %v1037_v49 = vsel %vm970_vm6, %v3575_v47, 0.0 }
 0x3be   : > { %v1017_v50 = vmul.f32 1.442695, %v1002_v48  ;;  %1038 = vadd.xlane.f32.xlu1 %v1037_v49 }
 0x3c0   : > { %3136 = vpow2.f32 %v1017_v50 }
 0x3c3   : > { %v988_v51 = vpop.xlane.xlu2 %987 }
 0x3c4   : > { %v1000_v52 = vsub.f32 %v967_v13, %v988_v51 }
 0x3c6   : > { %v3579_v53 = vpop.eup %3136  ;;  %v1013_v54 = vmul.f32 1.442695, %v1000_v52 }
 0x3c7   : > { %v1040_v55 = vsel %vm970_vm6, %v3579_v53, 0.0 }
 0x3c8   : > { %3138 = vpow2.f32 %v1013_v54  ;;  %1041 = vadd.xlane.f32.xlu2 %v1040_v55 }
 0x3ce   : > { %v3583_v56 = vpop.eup %3138 }
 0x3cf   : > { %v1034_v57 = vsel %vm970_vm6, %v3583_v56, 0.0 }
 0x3d0   : > { %1035 = vadd.xlane.f32.xlu2 %v1034_v57 }
 0x3d1   : > { %v1021_v58 = vpop.xlane.xlu1 %1020 }
 0x3d2   : > { %3140 = vrcp.f32 %v1021_v58  ;;  %v1054_v62 = vand.u32 2147483648, %v1021_v58  ;;  %v1052_v0 = vand.u32 2147483647, %v1021_v58  ;;  %vm1048_vm8 = vweird.f32 %v1021_v58 }
 0x3d4   : > { %v1055_v2 = vor.u32 1.1754944e-38, %v1054_v62  ;;  %vm1053_vm10 = vcmp.eq.f32.partialorder %v1052_v0, 8.507059e+37 }
 0x3d8   : > { %v3141_v59 = vpop.eup %3140 }
 0x3d9   : > { %v1044_v60 = vmul.f32 %v3141_v59, %v1021_v58  ;;  %vm1049_vm7 = vweird.f32 %v3141_v59 }
 0x3da   : > { %vm1050_vm9 = vmor %vm1048_vm8, %vm1049_vm7 }
 0x3db   : > { %v1045_v61 = vsub.f32 1.0, %v1044_v60 }
 0x3dd   : > { %v1046_v63 = vmul.f32 %v3141_v59, %v1045_v61 }
 0x3df   : > { %v1047_v1 = vadd.f32 %v3141_v59, %v1046_v63 }
 0x3e1   : > { %v1051_v3 = vsel %vm1050_vm9, %v3141_v59, %v1047_v1 }
 0x3e2   : > { %v1056_v4 = vsel %vm1053_vm10, %v1055_v2, %v1051_v3 }
 0x3e3   : > { %v1057_v6 = vmul.f32 %v3555_v18, %v1056_v4 }
 0x3e5   : > { %2852 = vmatpush.xpose.msk.msra.mxu2 %vm1163_vm11, %v1057_v6 }
 0x3f1   : > { %v1027_v7 = vpop.xlane.xlu1 %1026 }
 0x3f2   : > { %3142 = vrcp.f32 %v1027_v7  ;;  %v1084_v13 = vand.u32 2147483648, %v1027_v7  ;;  %v1082_v15 = vand.u32 2147483647, %v1027_v7  ;;  %vm1078_vm13 = vweird.f32 %v1027_v7 }
 0x3f4   : > { %v1085_v17 = vor.u32 1.1754944e-38, %v1084_v13  ;;  %vm1083_vm15 = vcmp.eq.f32.partialorder %v1082_v15, 8.507059e+37 }
 0x3f8   : > { %v3143_v10 = vpop.eup %3142  ;;  %753 = vxpose.xlu1.b32.start.end [1/1] (short) %v705_v9, 128 }
 0x3f9   : > { %v1074_v11 = vmul.f32 %v3143_v10, %v1027_v7  ;;  %vm1079_vm12 = vweird.f32 %v3143_v10 }
 0x3fa   : > { %vm1080_vm14 = vmor %vm1078_vm13, %vm1079_vm12 }
 0x3fb   : > { %v1075_v12 = vsub.f32 1.0, %v1074_v11 }
 0x3fd   : > { %v1076_v14 = vmul.f32 %v3143_v10, %v1075_v12 }
 0x3ff   : > { %v1077_v16 = vadd.f32 %v3143_v10, %v1076_v14 }
 0x401   : > { %v1081_v18 = vsel %vm1080_vm14, %v3143_v10, %v1077_v16 }
 0x402   : > { %v1086_v19 = vsel %vm1083_vm15, %v1085_v17, %v1081_v18 }
 0x403   : > { %v1024_v21 = vpop.xlane.xlu2 %1023  ;;  %v1087_v22 = vmul.f32 %v3559_v25, %v1086_v19 }
 0x404   : > { %3144 = vrcp.f32 %v1024_v21  ;;  %v1069_v29 = vand.u32 2147483648, %v1024_v21  ;;  %v1067_v31 = vand.u32 2147483647, %v1024_v21  ;;  %vm1063_vm1 = vweird.f32 %v1024_v21 }
 0x405   : > { %2858 = vmatpush.xpose.msk.msrb.mxu3 %vm1163_vm11, %v1087_v22 }
 0x406   : > { %v1070_v35 = vor.u32 1.1754944e-38, %v1069_v29  ;;  %vm1068_vm6 = vcmp.eq.f32.partialorder %v1067_v31, 8.507059e+37 }
 0x40a   : > { %v3145_v5 = vpop.eup %3144 }
 0x40b   : > { %v1059_v23 = vmul.f32 %v3145_v5, %v1024_v21  ;;  %v1030_v24 = vpop.xlane.xlu2 %1029  ;;  %vm1064_vm0 = vweird.f32 %v3145_v5 }
 0x40c   : > { %3146 = vrcp.f32 %v1030_v24  ;;  %vm1065_vm2 = vmor %vm1063_vm1, %vm1064_vm0  ;;  %v1099_v42 = vand.u32 2147483648, %v1030_v24  ;;  %v1097_v44 = vand.u32 2147483647, %v1030_v24  ;;  %vm1093_vm8 = vweird.f32 %v1030_v24 }
 0x40d   : > { %v1060_v28 = vsub.f32 1.0, %v1059_v23 }
 0x40e   : > { %v1100_v46 = vor.u32 1.1754944e-38, %v1099_v42  ;;  %vm1098_vm10 = vcmp.eq.f32.partialorder %v1097_v44, 8.507059e+37 }
 0x40f   : > { %v1061_v30 = vmul.f32 %v3145_v5, %v1060_v28 }
 0x411   : > { %v1062_v32 = vadd.f32 %v3145_v5, %v1061_v30 }
 0x412   : > { %v3147_v33 = vpop.eup %3146 }
 0x413   : > { %v1066_v36 = vsel %vm1065_vm2, %v3145_v5, %v1062_v32  ;;  %v1089_v25 = vmul.f32 %v3147_v33, %v1030_v24  ;;  %vm1094_vm7 = vweird.f32 %v3147_v33 }
 0x414   : > { %v1071_v37 = vsel %vm1068_vm6, %v1070_v35, %v1066_v36  ;;  %vm1095_vm9 = vmor %vm1093_vm8, %vm1094_vm7 }
 0x415   : > { %v1090_v39 = vsub.f32 1.0, %v1089_v25  ;;  %v1072_v40 = vmul.f32 %v3563_v34, %v1071_v37  ;;  %v1033_v34 = vpop.xlane.xlu2 %1032 }
 0x416   : > { %v1114_v18 = vand.u32 2147483648, %v1033_v34  ;;  %vm1108_vm8 = vweird.f32 %v1033_v34  ;;  %v1112_v19 = vand.u32 2147483647, %v1033_v34 }
 0x417   : > { %v1091_v43 = vmul.f32 %v3147_v33, %v1090_v39  ;;  %2855 = vmatpush.xpose.msk.msrb.mxu1 %vm1163_vm11, %v1072_v40 }
 0x418   : > { %v1115_v22 = vor.u32 1.1754944e-38, %v1114_v18 }
 0x419   : > { %v1092_v45 = vadd.f32 %v3147_v33, %v1091_v43 }
 0x41b   : > { %v1096_v48 = vsel %vm1095_vm9, %v3147_v33, %v1092_v45 }
 0x41c   : > { %v1101_v49 = vsel %vm1098_vm10, %v1100_v46, %v1096_v48  ;;  %vm1113_vm10 = vcmp.eq.f32.partialorder %v1112_v19, 8.507059e+37  ;;  %v2842_v19 = vld [vmem:[%s4295_s8 + $0xf0] sm:$0xff] }
 0x41d   : > { %v1102_v50 = vmul.f32 %v3567_v38, %v1101_v49 }
 0x41f   : > { %2861 = vmatpush.xpose.msk.msra.mxu0 %vm1163_vm11, %v1102_v50 }
 0x431   : > { %v1039_v51 = vpop.xlane.xlu1 %1038 }
 0x432   : > { %3148 = vrcp.f32 %v1039_v51  ;;  %v1144_v58 = vand.u32 2147483648, %v1039_v51  ;;  %v1142_v60 = vand.u32 2147483647, %v1039_v51  ;;  %vm1138_vm13 = vweird.f32 %v1039_v51 }
 0x434   : > { %v1145_v62 = vor.u32 1.1754944e-38, %v1144_v58  ;;  %vm1143_vm15 = vcmp.eq.f32.partialorder %v1142_v60, 8.507059e+37  ;;  %v2912_v58 = vld [vmem:[%s4295_s8 + $0x158] sm:$0xff]  ;;  %v2911_v60 = vld [vmem:[%s4295_s8 + $0x150] sm:$0xff] }
 0x438   : > { %v3149_v52 = vpop.eup %3148 }
 0x439   : > { %v1134_v54 = vmul.f32 %v3149_v52, %v1039_v51  ;;  %vm1139_vm12 = vweird.f32 %v3149_v52 }
 0x43a   : > { %vm1140_vm14 = vmor %vm1138_vm13, %vm1139_vm12 }
 0x43b   : > { %v1135_v55 = vsub.f32 1.0, %v1134_v54  ;;  %v3599_v57 = vpop.xlane.xlu2 %1041  ;;  %v2915_v54 = vld [vmem:[%s4295_s8 + $0x170] sm:$0xff] }
 0x43c   : > { %v1159_v36 = vand.u32 2147483648, %v3599_v57  ;;  %vm1153_vm13 = vweird.f32 %v3599_v57  ;;  %v1157_v25 = vand.u32 2147483647, %v3599_v57 }
 0x43d   : > { %v1136_v59 = vmul.f32 %v3149_v52, %v1135_v55  ;;  %v2914_v55 = vld [vmem:[%s4295_s8 + $0x168] sm:$0xff] }
 0x43e   : > { %v1160_v40 = vor.u32 1.1754944e-38, %v1159_v36  ;;  %v2831_v36 = vld [vmem:[%s4295_s8 + $0x98] sm:$0xff] }
 0x43f   : > { %v1137_v61 = vadd.f32 %v3149_v52, %v1136_v59 }
 0x441   : > { %v1141_v63 = vsel %vm1140_vm14, %v3149_v52, %v1137_v61  ;;  %v2910_v61 = vld [vmem:[%s4295_s8 + $0x148] sm:$0xff] }
 0x442   : > { %v1146_v38 = vsel %vm1143_vm15, %v1145_v62, %v1141_v63  ;;  %vm1158_vm15 = vcmp.eq.f32.partialorder %v1157_v25, 8.507059e+37  ;;  %v2909_v62 = vld [vmem:[%s4295_s8 + $0x140] sm:$0xff]  ;;  %v2908_v63 = vld [vmem:[%s4295_s8 + $0x138] sm:$0xff] }
 0x443   : > { %v1036_v0 = vpop.xlane.xlu2 %1035  ;;  %v1147_v1 = vmul.f32 %v3575_v47, %v1146_v38  ;;  %v2907_v38 = vld [vmem:[%s4295_s8 + $0x130] sm:$0xff] }
 0x444   : > { %3150 = vrcp.f32 %v1036_v0  ;;  %v1129_v6 = vand.u32 2147483648, %v1036_v0  ;;  %v1127_v8 = vand.u32 2147483647, %v1036_v0  ;;  %vm1123_vm1 = vweird.f32 %v1036_v0 }
 0x445   : > { %2870 = vmatpush.xpose.msk.msra.mxu3 %vm1163_vm11, %v1147_v1  ;;  %3152 = vrcp.f32 %v1033_v34  ;;  %v2905_v1 = vld [vmem:[%s4295_s8 + $0x120] sm:$0xff] }
 0x446   : > { %v1130_v10 = vor.u32 1.1754944e-38, %v1129_v6  ;;  %vm1128_vm6 = vcmp.eq.f32.partialorder %v1127_v8, 8.507059e+37  ;;  %3154 = vrcp.f32 %v3599_v57  ;;  %v2901_v6 = vld [vmem:[%s4295_s8 + $0x100] sm:$0xff] }
 0x44a   : > { %v3151_v2 = vpop.eup %3150 }
 0x44b   : > { %v1119_v3 = vmul.f32 %v3151_v2, %v1036_v0  ;;  %vm1124_vm0 = vweird.f32 %v3151_v2  ;;  %v3153_v47 = vpop.eup %3152  ;;  %v2906_v0 = vld [vmem:[%s4295_s8 + $0x128] sm:$0xff] }
 0x44c   : > { %vm1125_vm2 = vmor %vm1123_vm1, %vm1124_vm0  ;;  %v1104_v14 = vmul.f32 %v3153_v47, %v1033_v34  ;;  %vm1109_vm7 = vweird.f32 %v3153_v47  ;;  %v3155_v29 = vpop.eup %3154  ;;  %v2916_v34 = vld [vmem:[%s4295_s8 + $0x178] sm:$0xff] }
 0x44d   : > { %v1120_v4 = vsub.f32 1.0, %v1119_v3  ;;  %vm1110_vm9 = vmor %vm1108_vm8, %vm1109_vm7  ;;  %v1149_v31 = vmul.f32 %v3155_v29, %v3599_v57  ;;  %vm1154_vm12 = vweird.f32 %v3155_v29  ;;  %v2913_v57 = vld [vmem:[%s4295_s8 + $0x160] sm:$0xff]  ;;  %v2903_v3 = vld [vmem:[%s4295_s8 + $0x110] sm:$0xff] }
 0x44e   : > { %v1105_v15 = vsub.f32 1.0, %v1104_v14  ;;  %vm1155_vm14 = vmor %vm1153_vm13, %vm1154_vm12 }
 0x44f   : > { %v1121_v7 = vmul.f32 %v3151_v2, %v1120_v4  ;;  %v1150_v32 = vsub.f32 1.0, %v1149_v31  ;;  %v2902_v4 = vld [vmem:[%s4295_s8 + $0x108] sm:$0xff]  ;;  %v2835_v31 = vld [vmem:[%s4295_s8 + $0xb8] sm:$0xff] }
 0x450   : > { %v1106_v16 = vmul.f32 %v3153_v47, %v1105_v15 }
 0x451   : > { %v1122_v9 = vadd.f32 %v3151_v2, %v1121_v7  ;;  %v1151_v33 = vmul.f32 %v3155_v29, %v1150_v32  ;;  %v3680_v7 = vadd.f32 %v3515_v20, %v3532_v27  ;;  %v2843_v20 = vld [vmem:[%s4295_s8 + $0xf8] sm:$0xff]  ;;  %v2834_v32 = vld [vmem:[%s4295_s8 + $0xb0] sm:$0xff] }
 0x452   : > { %v1107_v17 = vadd.f32 %v3153_v47, %v1106_v16 }
 0x453   : > { %v1126_v11 = vsel %vm1125_vm2, %v3151_v2, %v1122_v9  ;;  %v1152_v35 = vadd.f32 %v3155_v29, %v1151_v33  ;;  %v2904_v2 = vld [vmem:[%s4295_s8 + $0x118] sm:$0xff]  ;;  %v3099_v33 = vld [vmem:[%s4290_s3 + $0xe] ss:$0 sm:$0xff] }
 0x454   : > { %v1131_v12 = vsel %vm1128_vm6, %v1130_v10, %v1126_v11  ;;  %v1111_v21 = vsel %vm1110_vm9, %v3153_v47, %v1107_v17 }
 0x455   : > { %v1132_v13 = vmul.f32 %v3583_v56, %v1131_v12  ;;  %v1116_v5 = vsel %vm1113_vm10, %v1115_v22, %v1111_v21  ;;  %v1156_v39 = vsel %vm1155_vm14, %v3155_v29, %v1152_v35  ;;  %v2841_v21 = vld [vmem:[%s4295_s8 + $0xe8] sm:$0xff]  ;;  %v2832_v35 = vld [vmem:[%s4295_s8 + $0xa0] sm:$0xff]  ;;  %vm2020_vm10 = vcmask 80896  }
 0x456   : > { %v1117_v56 = vmul.f32 %v3571_v41, %v1116_v5  ;;  %v1161_v42 = vsel %vm1158_vm15, %v1160_v40, %v1156_v39  ;;  %v2840_v5 = vld [vmem:[%s4295_s8 + $0xe0] sm:$0xff]  ;;  %v2830_v39 = vld [vmem:[%s4295_s8 + $0x90] sm:$0xff]  ;;  %v2829_v40 = vld [vmem:[%s4295_s8 + $0x88] sm:$0xff] }
 0x457   : > { %2867 = vmatpush.xpose.msk.msra.mxu1 %vm1163_vm11, %v1132_v13  ;;  %v1162_v44 = vmul.f32 %v3579_v53, %v1161_v42  ;;  %v2828_v42 = vld [vmem:[%s4295_s8 + $0x80] sm:$0xff] }
 0x49c   : > { %v769_v23 = vpop.trf.xlu1 }
 0x49d   : > { %2853 = vmatmul.msk.f32.vlgmr.msra.gmra.mxu2 %vm1163_vm11, %v769_v23  ;;  %v2839_v23 = vld [vmem:[%s4295_s8 + $0xd8] sm:$0xff] }
 0x49e   : > { %2864 = vmatpush.xpose.msk.msra.mxu2 %vm1163_vm11, %v1117_v56 }
 0x4a4   : > { %v770_v24 = vpop.trf.xlu1 }
 0x4a5   : > { %2854 = vmatmul.msk.f32.gmra.mxu2 %vm1163_vm11, %v770_v24  ;;  %v2838_v24 = vld [vmem:[%s4295_s8 + $0xd0] sm:$0xff] }
 0x4ac   : > { %v771_v28 = vpop.trf.xlu1 }
 0x4ad   : > { %2856 = vmatmul.msk.f32.vlgmr.msrb.gmra.mxu1 %vm1163_vm11, %v771_v28  ;;  %v2837_v28 = vld [vmem:[%s4295_s8 + $0xc8] sm:$0xff] }
 0x4b4   : > { %v772_v30 = vpop.trf.xlu1 }
 0x4b5   : > { %2857 = vmatmul.msk.f32.gmra.mxu1 %vm1163_vm11, %v772_v30  ;;  %v2836_v30 = vld [vmem:[%s4295_s8 + $0xc0] sm:$0xff] }
 0x4bc   : > { %v773_v41 = vpop.trf.xlu1 }
 0x4bd   : > { %2859 = vmatmul.msk.f32.vlgmr.msrb.gmra.mxu3 %vm1163_vm11, %v773_v41  ;;  %v2833_v41 = vld [vmem:[%s4295_s8 + $0xa8] sm:$0xff] }
 0x4c4   : > { %v774_v37 = vpop.trf.xlu1 }
 0x4c5   : > { %2860 = vmatmul.msk.f32.gmra.mxu3 %vm1163_vm11, %v774_v37 }
 0x4cc   : > { %v775_v43 = vpop.trf.xlu1 }
 0x4cd   : > { %2862 = vmatmul.msk.f32.vlgmr.msra.gmra.mxu0 %vm1163_vm11, %v775_v43  ;;  %v2964_v43 = vld [vmem:[%s4296_s9 + $0x1f8] sm:$0xff] }
 0x4ce   : > { %2873 = vmatpush.xpose.msk.msra.mxu0 %vm1163_vm11, %v1162_v44  ;;  %v2962_v44 = vld [vmem:[%s4296_s9 + $0x1e8] sm:$0xff] }
 0x4d4   : > { %v776_v45 = vpop.trf.xlu1 }
 0x4d5   : > { %2863 = vmatmul.msk.f32.gmra.mxu0 %vm1163_vm11, %v776_v45  ;;  %v2960_v45 = vld [vmem:[%s4296_s9 + $0x1d8] sm:$0xff] }
 0x4dc   : > { %v777_v46 = vpop.trf.xlu1 }
 0x4dd   : > { %2865 = vmatmul.msk.f32.vlgmr.msra.gmra.mxu2 %vm1163_vm11, %v777_v46  ;;  %v2958_v46 = vld [vmem:[%s4296_s9 + $0x1c8] sm:$0xff] }
 0x4e4   : > { %v778_v48 = vpop.trf.xlu1 }
 0x4e5   : > { %2866 = vmatmul.msk.f32.gmra.mxu2 %vm1163_vm11, %v778_v48  ;;  %v2956_v48 = vld [vmem:[%s4296_s9 + $0x1b8] sm:$0xff] }
 0x4ec   : > { %v779_v49 = vpop.trf.xlu1 }
 0x4ed   : > { %2868 = vmatmul.msk.f32.vlgmr.msra.gmra.mxu1 %vm1163_vm11, %v779_v49  ;;  %v2954_v49 = vld [vmem:[%s4296_s9 + $0x1a8] sm:$0xff] }
 0x4f4   : > { %v780_v50 = vpop.trf.xlu1 }
 0x4f5   : > { %2869 = vmatmul.msk.f32.gmra.mxu1 %vm1163_vm11, %v780_v50  ;;  %v2952_v50 = vld [vmem:[%s4296_s9 + $0x198] sm:$0xff] }
 0x4fc   : > { %v781_v53 = vpop.trf.xlu1 }
 0x4fd   : > { %2871 = vmatmul.msk.f32.vlgmr.msra.gmra.mxu3 %vm1163_vm11, %v781_v53  ;;  %v2950_v53 = vld [vmem:[%s4296_s9 + $0x188] sm:$0xff] }
 0x504   : > { %v782_v51 = vpop.trf.xlu1 }
 0x505   : > { %2872 = vmatmul.msk.f32.gmra.mxu3 %vm1163_vm11, %v782_v51  ;;  %v2948_v51 = vld [vmem:[%s4296_s9 + $0x178] sm:$0xff] }
 0x50c   : > { %v783_v52 = vpop.trf.xlu1 }
 0x50d   : > { %2874 = vmatmul.msk.f32.vlgmr.msra.gmra.mxu0 %vm1163_vm11, %v783_v52  ;;  %v2944_v52 = vld [vmem:[%s4296_s9 + $0x158] sm:$0xff] }
 0x50e   : > { %1683 = vmatpush.msra.mxu0 %v2916_v34  ;;  %v2946_v34 = vld [vmem:[%s4296_s9 + $0x168] sm:$0xff] }
 0x510   : > { %1684 = vmatpush.msra.mxu0 %v2915_v54  ;;  %v2942_v54 = vld [vmem:[%s4296_s9 + $0x148] sm:$0xff] }
 0x512   : > { %1685 = vmatpush.msra.mxu0 %v2914_v55  ;;  %v2940_v55 = vld [vmem:[%s4296_s9 + $0x138] sm:$0xff] }
 0x514   : > { %1686 = vmatpush.msra.mxu0 %v2913_v57  ;;  %v784_v59 = vpop.trf.xlu1  ;;  %v2938_v57 = vld [vmem:[%s4296_s9 + $0x128] sm:$0xff] }
 0x515   : > { %2875 = vmatmul.msk.f32.gmra.mxu0 %vm1163_vm11, %v784_v59  ;;  %v2934_v59 = vld [vmem:[%s4296_s9 + $0x108] sm:$0xff]  ;;  %vm1477_vm11 = vcmask 1041408  }
 0x516   : > { %1687 = vmatpush.msra.mxu0 %v2912_v58  ;;  %v2936_v58 = vld [vmem:[%s4296_s9 + $0x118] sm:$0xff] }
 0x518   : > { %1688 = vmatpush.msra.mxu0 %v2911_v60  ;;  %v3100_v60 = vld [vmem:[%s4290_s3 + $0x8] ss:$0 sm:$0xff] }
 0x51a   : > { %1689 = vmatpush.msra.mxu0 %v2910_v61 }
 0x51c   : > { %1690 = vmatpush.msra.mxu0 %v2909_v62 }
 0x51e   : > { %1691 = vmatpush.msra.mxu0 %v2908_v63  ;;  %v3200_v63 = vld [vmem:[%s4290_s3 + $0x3] sm:$0x3] }
 0x520   : > { %1692 = vmatpush.msra.mxu0 %v2907_v38  ;;  %v3683_v11 = vpop.f32.mrf.mxu2 }
 0x522   : > { %1693 = vmatpush.msra.mxu0 %v2906_v0 }
 0x524   : > { %1694 = vmatpush.msra.mxu0 %v2905_v1  ;;  %v3216_v1 = vmov 128.0  }
 0x525   : > { %3156 = vrcp.f32 %v3216_v1  ;;  %v2943_v1 = vld [vmem:[%s4296_s9 + $0x150] sm:$0xff] }
 0x526   : > { %1695 = vmatpush.msra.mxu0 %v2904_v2  ;;  %v2891_v2 = vld [vmem:[%s4293_s6 + $0xf8] sm:$0xff] }
 0x527   : > { %1539 = vmatpush.msrb.mxu1 %v2891_v2  ;;  %v2941_v2 = vld [vmem:[%s4296_s9 + $0x140] sm:$0xff] }
 0x528   : > { %1696 = vmatpush.msra.mxu0 %v2903_v3  ;;  %v1193_v15 = vpop.f32.mrf.mxu2  ;;  %v2890_v3 = vld [vmem:[%s4293_s6 + $0xf0] sm:$0xff] }
 0x529   : > { %1540 = vmatpush.msrb.mxu1 %v2890_v3  ;;  %v2939_v3 = vld [vmem:[%s4296_s9 + $0x130] sm:$0xff] }
 0x52a   : > { %1697 = vmatpush.msra.mxu0 %v2902_v4  ;;  %v1222_v10 = vpop.f32.mrf.mxu1 }
 0x52b   : > { %v3157_v4 = vpop.eup %3156 }
 0x52c   : > { %1698 = vmatpush.msra.mxu0 %v2901_v6  ;;  %v1482_v6 = vmul.f32 128.0, %v3157_v4  ;;  %vm1486_vm0 = vweird.f32 %v3157_v4 }
 0x52d   : > { %1699 = vmatmul.f32.vlgmr.msra.gmra.mxu0 %v3680_v7 }
 0x532   : > { %v1225_v47 = vpop.f32.mrf.mxu1 }
 0x540   : > { %v1254_v9 = vpop.f32.mrf.mxu3 }
 0x548   : > { %v1257_v13 = vpop.f32.mrf.mxu3 }
 0x54a   : > { %v1286_v8 = vpop.f32.mrf.mxu0 }
 0x552   : > { %v1289_v12 = vpop.f32.mrf.mxu0 }
 0x560   : > { %v1318_v27 = vpop.f32.mrf.mxu2 }
 0x568   : > { %v1321_v29 = vpop.f32.mrf.mxu2 }
 0x56a   : > { %v1350_v17 = vpop.f32.mrf.mxu1 }
 0x572   : > { %v1353_v56 = vpop.f32.mrf.mxu1 }
 0x580   : > { %v1382_v16 = vpop.f32.mrf.mxu3 }
 0x588   : > { %v1385_v22 = vpop.f32.mrf.mxu3 }
 0x58a   : > { %v1414_v14 = vpop.f32.mrf.mxu0 }
 0x592   : > { %v1417_v18 = vpop.f32.mrf.mxu0 }
 0x593   : > { %3057 = vmatpush.lsf.msrb.mxu2 %v1417_v18  ;;  %v2887_v18 = vld [vmem:[%s4293_s6 + $0xd8] sm:$0xff] }
 0x595   : > { %1454 = vmatpush.msra.mxu2 %v2843_v20  ;;  %v2886_v20 = vld [vmem:[%s4293_s6 + $0xd0] sm:$0xff] }
 0x597   : > { %3058 = vmatpush.lsf.msrb.mxu2 %v1414_v14 }
 0x599   : > { %1455 = vmatpush.msra.mxu2 %v2842_v19  ;;  %v2884_v19 = vld [vmem:[%s4293_s6 + $0xc0] sm:$0xff] }
 0x59b   : > { %3059 = vmatpush.lsf.msrb.mxu2 %v1385_v22  ;;  %v2882_v22 = vld [vmem:[%s4293_s6 + $0xb0] sm:$0xff] }
 0x59d   : > { %1456 = vmatpush.msra.mxu2 %v2841_v21  ;;  %v2883_v21 = vld [vmem:[%s4293_s6 + $0xb8] sm:$0xff] }
 0x59f   : > { %3060 = vmatpush.lsf.msrb.mxu2 %v1382_v16  ;;  %v2889_v16 = vld [vmem:[%s4293_s6 + $0xe8] sm:$0xff] }
 0x5a0   : > { %1541 = vmatpush.msrb.mxu1 %v2889_v16 }
 0x5a1   : > { %1457 = vmatpush.msra.mxu2 %v2840_v5  ;;  %v2881_v5 = vld [vmem:[%s4293_s6 + $0xa8] sm:$0xff] }
 0x5a3   : > { %3061 = vmatpush.lsf.msrb.mxu2 %v1353_v56  ;;  %v2879_v56 = vld [vmem:[%s4293_s6 + $0x98] sm:$0xff] }
 0x5a5   : > { %1458 = vmatpush.msra.mxu2 %v2839_v23  ;;  %v2880_v23 = vld [vmem:[%s4293_s6 + $0xa0] sm:$0xff] }
 0x5a7   : > { %3062 = vmatpush.lsf.msrb.mxu2 %v1350_v17  ;;  %v2888_v17 = vld [vmem:[%s4293_s6 + $0xe0] sm:$0xff] }
 0x5a8   : > { %1542 = vmatpush.msrb.mxu1 %v2888_v17 }
 0x5a9   : > { %1459 = vmatpush.msra.mxu2 %v2838_v24  ;;  %v2878_v24 = vld [vmem:[%s4293_s6 + $0x90] sm:$0xff] }
 0x5aa   : > { %v1700_v25 = vpop.f32.mrf.mxu0  ;;  %1543 = vmatpush.msrb.mxu1 %v2887_v18 }
 0x5ab   : > { %3063 = vmatpush.lsf.msrb.mxu2 %v1321_v29  ;;  %v3727_v37 = vadd.f32 %v3099_v33, %v1700_v25  ;;  %v2876_v29 = vld [vmem:[%s4293_s6 + $0x80] sm:$0xff]  ;;  %v2895_v25 = vld [vmem:[%s4294_s7 + $0x98] sm:$0xff] }
 0x5ac   : > { %1544 = vmatpush.msrb.mxu1 %v2886_v20 }
 0x5ad   : > { %1460 = vmatpush.msra.mxu2 %v2837_v28  ;;  %1760 = vrot.lane.b32.xlu0 %v3727_v37, %s3210_s26  ;;  %v2877_v28 = vld [vmem:[%s4293_s6 + $0x88] sm:$0xff] }
 0x5ae   : > { %1758 = vrot.lane.b32.xlu1 %v3727_v37, %s3211_s27 }
 0x5af   : > { %3064 = vmatpush.lsf.msrb.mxu2 %v1318_v27  ;;  %v2885_v27 = vld [vmem:[%s4293_s6 + $0xc8] sm:$0xff] }
 0x5b0   : > { %1545 = vmatpush.msrb.mxu1 %v2885_v27 }
 0x5b1   : > { %1461 = vmatpush.msra.mxu2 %v2836_v30  ;;  %v2899_v30 = vld [vmem:[%s4294_s7 + $0xb8] sm:$0xff] }
 0x5b2   : > { %1546 = vmatpush.msrb.mxu1 %v2884_v19  ;;  %1573 = vmatpush.msrb.mxu3 %v2899_v30 }
 0x5b3   : > { %3065 = vmatpush.lsf.msrb.mxu2 %v1289_v12 }
 0x5b4   : > { %1547 = vmatpush.msrb.mxu1 %v2883_v21 }
 0x5b5   : > { %1462 = vmatpush.msra.mxu2 %v2835_v31  ;;  %1770 = vrot.lane.b32.xlu0 %v3727_v37, %s3215_s11  ;;  %v2898_v31 = vld [vmem:[%s4294_s7 + $0xb0] sm:$0xff] }
 0x5b6   : > { %1548 = vmatpush.msrb.mxu1 %v2882_v22  ;;  %1574 = vmatpush.msrb.mxu3 %v2898_v31 }
 0x5b7   : > { %3066 = vmatpush.lsf.msrb.mxu2 %v1286_v8  ;;  %v1483_v8 = vsub.f32 1.0, %v1482_v6  ;;  %v2935_v6 = vld [vmem:[%s4296_s9 + $0x110] sm:$0xff] }
 0x5b8   : > { %1549 = vmatpush.msrb.mxu1 %v2881_v5 }
 0x5b9   : > { %1463 = vmatpush.msra.mxu2 %v2834_v32  ;;  %v2897_v32 = vld [vmem:[%s4294_s7 + $0xa8] sm:$0xff] }
 0x5ba   : > { %1550 = vmatpush.msrb.mxu1 %v2880_v23  ;;  %1575 = vmatpush.msrb.mxu3 %v2897_v32 }
 0x5bb   : > { %3067 = vmatpush.lsf.msrb.mxu2 %v1257_v13 }
 0x5bc   : > { %1551 = vmatpush.msrb.mxu1 %v2879_v56 }
 0x5bd   : > { %1464 = vmatpush.msra.mxu2 %v2833_v41  ;;  %1764 = vrot.lane.b32.xlu0 %v3727_v37, %s3212_s28 }
 0x5be   : > { %1552 = vmatpush.msrb.mxu1 %v2878_v24 }
 0x5bf   : > { %3068 = vmatpush.lsf.msrb.mxu2 %v1254_v9  ;;  %v1484_v9 = vmul.f32 %v3157_v4, %v1483_v8  ;;  %v2933_v8 = vld [vmem:[%s4296_s9 + $0x100] sm:$0xff] }
 0x5c0   : > { %1553 = vmatpush.msrb.mxu1 %v2877_v28 }
 0x5c1   : > { %1465 = vmatpush.msra.mxu2 %v2832_v35  ;;  %v2896_v35 = vld [vmem:[%s4294_s7 + $0xa0] sm:$0xff] }
 0x5c2   : > { %1554 = vmatpush.msrb.mxu1 %v2876_v29  ;;  %1576 = vmatpush.msrb.mxu3 %v2896_v35 }
 0x5c3   : > { %3069 = vmatpush.lsf.msrb.mxu2 %v1225_v47 }
 0x5c4   : > { %1577 = vmatpush.msrb.mxu3 %v2895_v25  ;;  %v3108_v25 = vld [vmem:[%s4290_s3 + $0xd] ss:$0 sm:$0xff] }
 0x5c5   : > { %1466 = vmatpush.msra.mxu2 %v2831_v36  ;;  %1768 = vrot.lane.b32.xlu0 %v3727_v37, %s3209_s24 }
 0x5c7   : > { %3070 = vmatpush.lsf.msrb.mxu2 %v1222_v10  ;;  %v1485_v10 = vadd.f32 %v3157_v4, %v1484_v9  ;;  %v3104_v9 = vld [vmem:[%s4291_s4 + $0x3] ss:$0 sm:$0xff] }
 0x5c9   : > { %1467 = vmatpush.msra.mxu2 %v2830_v39  ;;  %v2894_v39 = vld [vmem:[%s4294_s7 + $0x90] sm:$0xff] }
 0x5ca   : > { %1578 = vmatpush.msrb.mxu3 %v2894_v39 }
 0x5cb   : > { %3071 = vmatpush.lsf.msrb.mxu2 %v1193_v15 }
 0x5cd   : > { %1468 = vmatpush.msra.mxu2 %v2829_v40  ;;  %1766 = vrot.lane.b32.xlu0 %v3727_v37, %s3214_s30  ;;  %v2893_v40 = vld [vmem:[%s4294_s7 + $0x88] sm:$0xff] }
 0x5ce   : > { %1579 = vmatpush.msrb.mxu3 %v2893_v40 }
 0x5cf   : > { %3072 = vmatpush.lsf.msrb.mxu2 %v3683_v11  ;;  %v3813_v11 = vsel %vm1486_vm0, %v3157_v4, %v1485_v10  ;;  %v2937_v4 = vld [vmem:[%s4296_s9 + $0x120] sm:$0xff] }
 0x5d0   : > { %3073 = vllmr.1.mxu2 }
 0x5d1   : > { %1469 = vmatpush.msra.mxu2 %v2828_v42  ;;  %v2892_v42 = vld [vmem:[%s4294_s7 + $0x80] sm:$0xff] }
 0x5d2   : > { %1580 = vmatpush.msrb.mxu3 %v2892_v42 }
 0x5f1   : > { %3074 = vmatmul.lmr.bf16.vlgmr.msra.gmra.1.mxu2 }
 0x5f2   : > { %1726 = vmatpush.msra.mxu2 %v2964_v43  ;;  %v2963_v43 = vld [vmem:[%s4296_s9 + $0x1f0] sm:$0xff] }
 0x5f3   : > { %1703 = vmatpush.msra.mxu3 %v2963_v43 }
 0x5f4   : > { %1727 = vmatpush.msra.mxu2 %v2962_v44 }
 0x5f6   : > { %1728 = vmatpush.msra.mxu2 %v2960_v45 }
 0x5f8   : > { %1729 = vmatpush.msra.mxu2 %v2958_v46  ;;  %v2961_v46 = vld [vmem:[%s4296_s9 + $0x1e0] sm:$0xff] }
 0x5f9   : > { %1704 = vmatpush.msra.mxu3 %v2961_v46 }
 0x5fa   : > { %1730 = vmatpush.msra.mxu2 %v2956_v48 }
 0x5fc   : > { %1731 = vmatpush.msra.mxu2 %v2954_v49  ;;  %v2959_v49 = vld [vmem:[%s4296_s9 + $0x1d0] sm:$0xff] }
 0x5fd   : > { %1705 = vmatpush.msra.mxu3 %v2959_v49 }
 0x5fe   : > { %1732 = vmatpush.msra.mxu2 %v2952_v50 }
 0x600   : > { %1733 = vmatpush.msra.mxu2 %v2950_v53  ;;  %v2957_v53 = vld [vmem:[%s4296_s9 + $0x1c0] sm:$0xff] }
 0x601   : > { %1706 = vmatpush.msra.mxu3 %v2957_v53 }
 0x602   : > { %1734 = vmatpush.msra.mxu2 %v2948_v51 }
 0x604   : > { %1735 = vmatpush.msra.mxu2 %v2946_v34  ;;  %v2955_v34 = vld [vmem:[%s4296_s9 + $0x1b0] sm:$0xff] }
 0x605   : > { %1707 = vmatpush.msra.mxu3 %v2955_v34 }
 0x606   : > { %1736 = vmatpush.msra.mxu2 %v2944_v52 }
 0x608   : > { %1737 = vmatpush.msra.mxu2 %v2942_v54  ;;  %v2953_v54 = vld [vmem:[%s4296_s9 + $0x1a0] sm:$0xff] }
 0x609   : > { %1708 = vmatpush.msra.mxu3 %v2953_v54 }
 0x60a   : > { %1738 = vmatpush.msra.mxu2 %v2940_v55  ;;  %v3102_v55 = vld [vmem:[%s4290_s3 + $0x9] ss:$0 sm:$0xff] }
 0x60c   : > { %1739 = vmatpush.msra.mxu2 %v2938_v57 }
 0x60e   : > { %1740 = vmatpush.msra.mxu2 %v2936_v58  ;;  %v2951_v58 = vld [vmem:[%s4296_s9 + $0x190] sm:$0xff] }
 0x60f   : > { %1709 = vmatpush.msra.mxu3 %v2951_v58 }
 0x610   : > { %1741 = vmatpush.msra.mxu2 %v2934_v59 }
 0x611   : > { %1742 = vmatmul.f32.vlgmr.msra.gmra.mxu2 %v3524_v26 }
 0x620   : > { %v1759_v49 = vpop.permute.xlu1 %1758 }
 0x674   : > { %v1471_v61 = vpop.f32.mrf.mxu2 }
 0x675   : > { %v1472_v62 = vadd.f32 %v3100_v60, %v1471_v61  ;;  %v3103_v60 = vld [vmem:[%s4290_s3 + $0xa] ss:$0 sm:$0xff]  ;;  %v2949_v61 = vld [vmem:[%s4296_s9 + $0x180] sm:$0xff] }
 0x676   : > { %1710 = vmatpush.msra.mxu3 %v2949_v61 }
 0x677   : > { %v1474_v38 = vadd.f32 %v3200_v63, %v1472_v62  ;;  %v2947_v63 = vld [vmem:[%s4296_s9 + $0x170] sm:$0xff] }
 0x678   : > { %1711 = vmatpush.msra.mxu3 %v2947_v63 }
 0x679   : > { %v1478_v0 = vsel %vm1477_vm11, %v1474_v38, 0.0 }
 0x67a   : > { %1479 = vadd.xlane.f32.xlu2 %v1478_v0  ;;  %v2945_v0 = vld [vmem:[%s4296_s9 + $0x160] sm:$0xff] }
 0x67b   : > { %1712 = vmatpush.msra.mxu3 %v2945_v0 }
 0x67d   : > { %1713 = vmatpush.msra.mxu3 %v2943_v1 }
 0x67f   : > { %1714 = vmatpush.msra.mxu3 %v2941_v2 }
 0x681   : > { %1715 = vmatpush.msra.mxu3 %v2939_v3 }
 0x683   : > { %1716 = vmatpush.msra.mxu3 %v2937_v4 }
 0x685   : > { %1717 = vmatpush.msra.mxu3 %v2935_v6 }
 0x687   : > { %1718 = vmatpush.msra.mxu3 %v2933_v8 }
 0x6ed   : > { %v1480_v12 = vpop.xlane.xlu2 %1479 }
 0x6ee   : > { %v1488_v13 = vmul.f32 %v3813_v11, %v1480_v12 }
 0x6f0   : > { %v3816_v47 = vsub.f32 %v1474_v38, %v1488_v13 }
 0x6f2   : > { %v1490_v14 = vmul.f32 %v3816_v47, %v3816_v47 }
 0x6f4   : > { %v1491_v15 = vsel %vm1477_vm11, %v1490_v14, 0.0 }
 0x6f5   : > { %1492 = vadd.xlane.f32.xlu2 %v1491_v15 }
 0x768   : > { %v1493_v41 = vpop.xlane.xlu2 %1492 }
 0x769   : > { %v1494_v33 = vmul.f32 %v1493_v41, %v3813_v11 }
 0x76b   : > { %v1495_v36 = vadd.f32 1e-05, %v1494_v33  ;;  %v3107_v33 = vld [vmem:[%s4290_s3 + $0xc] ss:$0 sm:$0xff] }
 0x76d   : > { %3158 = vrsqrt.f32 %v1495_v36  ;;  %vm1502_vm2 = vweird.f32 %v1495_v36 }
 0x773   : > { %v3159_v44 = vpop.eup %3158 }
 0x774   : > { %v1497_v45 = vmul.f32 %v3159_v44, %v1495_v36  ;;  %vm1503_vm1 = vweird.f32 %v3159_v44 }
 0x775   : > { %vm1504_vm6 = vmor %vm1502_vm2, %vm1503_vm1 }
 0x776   : > { %v1498_v48 = vmul.f32 %v3159_v44, %v1497_v45 }
 0x778   : > { %v1499_v50 = vmul.f32 0.5, %v1498_v48 }
 0x77a   : > { %v1500_v51 = vsub.f32 1.5, %v1499_v50 }
 0x77c   : > { %v1501_v52 = vmul.f32 %v3159_v44, %v1500_v51  ;;  %v1761_v51 = vpop.permute.xlu0 %1760 }
 0x77e   : > { %v1505_v57 = vsel %vm1504_vm6, %v3159_v44, %v1501_v52 }
 0x77f   : > { %v1506_v59 = vmul.f32 %v1505_v57, %v3816_v47  ;;  %v3105_v47 = vld [vmem:[%s4290_s3 + $0xb] ss:$0 sm:$0xff] }
 0x781   : > { %v1508_v62 = vmul.f32 %v3102_v55, %v1506_v59 }
 0x783   : > { %v1510_v38 = vadd.f32 %v3103_v60, %v1508_v62 }
 0x784   : > { %v1771_v55 = vpop.permute.xlu0 %1770 }
 0x785   : > { %1555 = vmatmul.f32.vlgmr.msrb.gmra.mxu1 %v1510_v38 }
 0x78c   : > { %v1765_v58 = vpop.permute.xlu0 %1764 }
 0x794   : > { %v1769_v63 = vpop.permute.xlu0 %1768 }
 0x79c   : > { %v1767_v8 = vpop.permute.xlu0 %1766 }
 0x802   : > { %v1556_v10 = vpop.f32.mrf.mxu1 }
 0x803   : > { %v1557_v12 = vadd.f32 %v3104_v9, %v1556_v10 }
 0x805   : > { %v1559_v13 = vmax.f32 %v1557_v12, 0.0 }
 0x807   : > { %2900 = vmatmul.msk.f32.vlgmr.msrb.gmra.mxu3 %vm446_vm4, %v1559_v13 }
 0x80f   : > { %1719 = vmatmul.f32.vlgmr.msra.gmra.mxu3 %v3524_v26  ;;  %v3106_v26 = vld [vmem:[%s4290_s3 + $0xf] ss:$0 sm:$0xff] }
 0x88a   : > { %v1582_v14 = vpop.f32.mrf.mxu3 }
 0x88b   : > { %v1583_v15 = vadd.f32 %v3105_v47, %v1582_v14 }
 0x88d   : > { %v1585_v16 = vadd.f32 %v1583_v15, %v1510_v38 }
 0x88f   : > { %v1588_v17 = vsel %vm1477_vm11, %v1585_v16, 0.0 }
 0x890   : > { %1589 = vadd.xlane.f32.xlu2 %v1588_v17 }
 0x892   : > { %v1720_v22 = vpop.f32.mrf.mxu3 }
 0x893   : > { %v1751_v5 = vadd.f32 %v3106_v26, %v1720_v22 }
 0x903   : > { %v1590_v18 = vpop.xlane.xlu2 %1589 }
 0x904   : > { %v1591_v20 = vmul.f32 %v1590_v18, %v3813_v11 }
 0x906   : > { %v1592_v27 = vsub.f32 %v1585_v16, %v1591_v20 }
 0x908   : > { %v1593_v19 = vmul.f32 %v1592_v27, %v1592_v27 }
 0x90a   : > { %v1594_v21 = vsel %vm1477_vm11, %v1593_v19, 0.0 }
 0x90b   : > { %1595 = vadd.xlane.f32.xlu2 %v1594_v21 }
 0x934   : > { %1772 = vxpose.xlu2.b32.start [1/2] (short) %v1751_v5, 128 }
 0x97e   : > { %v1596_v23 = vpop.xlane.xlu2 %1595 }
 0x97f   : > { %v1597_v56 = vmul.f32 %v1596_v23, %v3813_v11 }
 0x981   : > { %v1598_v24 = vadd.f32 1e-05, %v1597_v56 }
 0x983   : > { %3160 = vrsqrt.f32 %v1598_v24  ;;  %vm1605_vm8 = vweird.f32 %v1598_v24 }
 0x989   : > { %v3161_v28 = vpop.eup %3160 }
 0x98a   : > { %v1600_v29 = vmul.f32 %v3161_v28, %v1598_v24  ;;  %vm1606_vm7 = vweird.f32 %v3161_v28 }
 0x98b   : > { %vm1607_vm9 = vmor %vm1605_vm8, %vm1606_vm7 }
 0x98c   : > { %v1601_v30 = vmul.f32 %v3161_v28, %v1600_v29 }
 0x98e   : > { %v1602_v31 = vmul.f32 0.5, %v1601_v30 }
 0x990   : > { %v1603_v32 = vsub.f32 1.5, %v1602_v31 }
 0x992   : > { %v1604_v41 = vmul.f32 %v3161_v28, %v1603_v32 }
 0x994   : > { %v1608_v35 = vsel %vm1607_vm9, %v3161_v28, %v1604_v41 }
 0x995   : > { %v1609_v36 = vmul.f32 %v1608_v35, %v1592_v27 }
 0x997   : > { %v1611_v39 = vmul.f32 %v3107_v33, %v1609_v36 }
 0x999   : > { %v1613_v40 = vadd.f32 %v3108_v25, %v1611_v39 }
 0x99b   : > { %1722 = vmatmul.f32.gmra.mxu3 %v1613_v40  ;;  %1745 = vmatmul.f32.gmra.mxu2 %v1613_v40 }
 0xa1e   : > { %v1723_v42 = vpop.f32.mrf.mxu3 }
 0xa1f   : > { %v1752_v43 = vadd.f32 %v3106_v26, %v1723_v42 }
 0xa21   : > { %1773 = vxpose.xlu2.b32.end [2/2] (short) %v1752_v43, 128 }
 0xab2   : > { %v1788_v44 = vpop.trf.xlu2 }
 0xaba   : > { %v1789_v45 = vpop.trf.xlu2 }
 0xabb   : > { %1852 = vmatpush.msra.mxu1 %v1789_v45 }
 0xabd   : > { %1853 = vmatpush.msra.mxu1 %v1788_v44 }
 0xabe   : > { %2965 = vmatmul.msk.f32.vlgmr.msra.gmra.mxu1 %vm785_vm5, %v3727_v37 }
 0xac2   : > { %v1790_v46 = vpop.trf.xlu2 }
 0xaca   : > { %v1791_v48 = vpop.trf.xlu2 }
 0xacb   : > { %1874 = vmatpush.msra.mxu0 %v1791_v48 }
 0xacd   : > { %1875 = vmatpush.msra.mxu0 %v1790_v46 }
 0xace   : > { %2966 = vmatmul.msk.f32.vlgmr.msra.gmra.mxu0 %vm785_vm5, %v1759_v49 }
 0xad2   : > { %v1792_v50 = vpop.trf.xlu2 }
 0xada   : > { %v1793_v53 = vpop.trf.xlu2 }
 0xadb   : > { %1896 = vmatpush.msrb.mxu1 %v1793_v53 }
 0xadd   : > { %1897 = vmatpush.msrb.mxu1 %v1792_v50 }
 0xade   : > { %2967 = vmatmul.msk.f32.vlgmr.msrb.gmra.mxu1 %vm785_vm5, %v1761_v51 }
 0xae2   : > { %v1794_v34 = vpop.trf.xlu2 }
 0xaea   : > { %v1795_v52 = vpop.trf.xlu2 }
 0xaeb   : > { %1918 = vmatpush.msra.mxu0 %v1795_v52 }
 0xaed   : > { %1919 = vmatpush.msra.mxu0 %v1794_v34 }
 0xaf2   : > { %v1796_v54 = vpop.trf.xlu2 }
 0xafa   : > { %1762 = vrot.lane.b32.xlu2 %v3727_v37, %s3213_s29  ;;  %v1797_v57 = vpop.trf.xlu2 }
 0xafb   : > { %1940 = vmatpush.msra.mxu1 %v1797_v57 }
 0xafd   : > { %1941 = vmatpush.msra.mxu1 %v1796_v54 }
 0xafe   : > { %2969 = vmatmul.msk.f32.vlgmr.msra.gmra.mxu1 %vm785_vm5, %v1765_v58 }
 0xb02   : > { %v1798_v59 = vpop.trf.xlu2 }
 0xb0a   : > { %v1799_v60 = vpop.trf.xlu2 }
 0xb12   : > { %v1800_v61 = vpop.trf.xlu2 }
 0xb1a   : > { %v1801_v62 = vpop.trf.xlu2 }
 0xb1b   : > { %1984 = vmatpush.msrb.mxu1 %v1801_v62 }
 0xb1d   : > { %1985 = vmatpush.msrb.mxu1 %v1800_v61 }
 0xb1e   : > { %2971 = vmatmul.msk.f32.vlgmr.msrb.gmra.mxu1 %vm785_vm5, %v1769_v63 }
 0xb22   : > { %v1802_v38 = vpop.trf.xlu2 }
 0xb2a   : > { %v1803_v0 = vpop.trf.xlu2 }
 0xb2b   : > { %2006 = vmatpush.msrb.mxu3 %v1803_v0 }
 0xb2d   : > { %2007 = vmatpush.msrb.mxu3 %v1802_v38 }
 0xb2e   : > { %2972 = vmatmul.msk.f32.vlgmr.msrb.gmra.mxu3 %vm785_vm5, %v1771_v55 }
 0xb3b   : > { %v1855_v3 = vpop.f32.mrf.mxu1 }
 0xb3c   : > { %v2012_v20 = vmul.f32 0.25, %v1855_v3 }
 0xb3e   : > { %v2021_v27 = vsel %vm2020_vm10, %v2012_v20, -inf }
 0xb4b   : > { %v1877_v37 = vpop.f32.mrf.mxu0 }
 0xb4c   : > { %v2013_v1 = vmul.f32 0.25, %v1877_v37 }
 0xb4e   : > { %v2024_v2 = vsel %vm2020_vm10, %v2013_v1, -inf }
 0xb4f   : > { %2025 = vmax.xlane.f32.xlu1 %v2024_v2 }
 0xb54   : > { %v1763_v4 = vpop.permute.xlu2 %1762 }
 0xb55   : > { %2968 = vmatmul.msk.f32.vlgmr.msra.gmra.mxu0 %vm785_vm5, %v1763_v4 }
 0xb56   : > { %1962 = vmatpush.msra.mxu0 %v1799_v60 }
 0xb58   : > { %1963 = vmatpush.msra.mxu0 %v1798_v59 }
 0xb5b   : > { %v1899_v6 = vpop.f32.mrf.mxu1 }
 0xb5c   : > { %v2014_v9 = vmul.f32 0.25, %v1899_v6 }
 0xb5d   : > { %2970 = vmatmul.msk.f32.vlgmr.msra.gmra.mxu0 %vm785_vm5, %v1767_v8 }
 0xb5e   : > { %v2027_v10 = vsel %vm2020_vm10, %v2014_v9, -inf }
 0xb5f   : > { %2028 = vmax.xlane.f32.xlu0 %v2027_v10 }
 0xb7b   : > { %v1943_v19 = vpop.f32.mrf.mxu1 }
 0xb7c   : > { %v2016_v41 = vmul.f32 0.25, %v1943_v19 }
 0xb7e   : > { %v2033_v33 = vsel %vm2020_vm10, %v2016_v41, -inf }
 0xb9b   : > { %v1987_v5 = vpop.f32.mrf.mxu1 }
 0xb9c   : > { %v2018_v23 = vmul.f32 0.25, %v1987_v5 }
 0xb9e   : > { %v2039_v56 = vsel %vm2020_vm10, %v2018_v23, -inf }
 0xbb1   : > { %v2009_v21 = vpop.f32.mrf.mxu3 }
 0xbb2   : > { %v2019_v26 = vmul.f32 0.25, %v2009_v21 }
 0xbb4   : > { %v2042_v22 = vsel %vm2020_vm10, %v2019_v26, -inf }
 0xbc2   : > { %v2026_v12 = vpop.xlane.xlu1 %2025 }
 0xbc3   : > { %v2046_v13 = vsub.f32 %v2013_v1, %v2026_v12 }
 0xbc5   : > { %v2055_v47 = vmul.f32 1.442695, %v2046_v13 }
 0xbc7   : > { %3162 = vpow2.f32 %v2055_v47 }
 0xbcd   : > { %v3163_v14 = vpop.eup %3162 }
 0xbce   : > { %v2072_v15 = vsel %vm2020_vm10, %v3163_v14, 0.0 }
 0xbcf   : > { %2073 = vadd.xlane.f32.xlu1 %v2072_v15 }
 0xbd2   : > { %v1921_v16 = vpop.f32.mrf.mxu0  ;;  %v2029_v28 = vpop.xlane.xlu0 %2028 }
 0xbd3   : > { %v2015_v17 = vmul.f32 0.25, %v1921_v16  ;;  %v2047_v30 = vsub.f32 %v2014_v9, %v2029_v28 }
 0xbd5   : > { %v2030_v18 = vsel %vm2020_vm10, %v2015_v17, -inf  ;;  %v2057_v32 = vmul.f32 1.442695, %v2047_v30 }
 0xbd6   : > { %2031 = vmax.xlane.f32.xlu0 %v2030_v18 }
 0xbd7   : > { %3164 = vpow2.f32 %v2057_v32 }
 0xbda   : > { %v1965_v24 = vpop.f32.mrf.mxu0 }
 0xbdb   : > { %v2017_v29 = vmul.f32 0.25, %v1965_v24  ;;  %v3101_v24 = vld [vmem:[%s4290_s3 + $0x10] ss:$0 sm:$0xff] }
 0xbdd   : > { %v2036_v31 = vsel %vm2020_vm10, %v2017_v29, -inf  ;;  %v3984_v35 = vpop.eup %3164 }
 0xbde   : > { %2022 = vmax.xlane.f32.xlu0 %v2021_v27  ;;  %v2075_v36 = vsel %vm2020_vm10, %v3984_v35, 0.0 }
 0xbe6   : > { %2043 = vmax.xlane.f32.xlu0 %v2042_v22 }
 0xbee   : > { %2040 = vmax.xlane.f32.xlu0 %v2039_v56 }
 0xbf6   : > { %2037 = vmax.xlane.f32.xlu0 %v2036_v31 }
 0xbfe   : > { %2034 = vmax.xlane.f32.xlu0 %v2033_v33 }
 0xc06   : > { %2076 = vadd.xlane.f32.xlu0 %v2075_v36 }
 0xc42   : > { %v2074_v25 = vpop.xlane.xlu1 %2073 }
 0xc43   : > { %3166 = vrcp.f32 %v2074_v25  ;;  %v2119_v46 = vand.u32 2147483648, %v2074_v25  ;;  %v2117_v49 = vand.u32 2147483647, %v2074_v25  ;;  %vm2113_vm12 = vweird.f32 %v2074_v25 }
 0xc45   : > { %v2120_v53 = vor.u32 1.1754944e-38, %v2119_v46  ;;  %vm2118_vm14 = vcmp.eq.f32.partialorder %v2117_v49, 8.507059e+37 }
 0xc49   : > { %v3167_v39 = vpop.eup %3166  ;;  %v2032_v40 = vpop.xlane.xlu0 %2031 }
 0xc4a   : > { %v2109_v42 = vmul.f32 %v3167_v39, %v2074_v25  ;;  %v2048_v43 = vsub.f32 %v2015_v17, %v2032_v40  ;;  %vm2114_vm5 = vweird.f32 %v3167_v39 }
 0xc4b   : > { %vm2115_vm13 = vmor %vm2113_vm12, %vm2114_vm5 }
 0xc4c   : > { %v2110_v44 = vsub.f32 1.0, %v2109_v42  ;;  %v2059_v45 = vmul.f32 1.442695, %v2048_v43 }
 0xc4e   : > { %v2111_v48 = vmul.f32 %v3167_v39, %v2110_v44  ;;  %3168 = vpow2.f32 %v2059_v45 }
 0xc50   : > { %v2112_v50 = vadd.f32 %v3167_v39, %v2111_v48 }
 0xc51   : > { %v2023_v51 = vpop.xlane.xlu0 %2022 }
 0xc52   : > { %v2116_v34 = vsel %vm2115_vm13, %v3167_v39, %v2112_v50  ;;  %v2045_v52 = vsub.f32 %v2012_v20, %v2023_v51 }
 0xc53   : > { %v2121_v54 = vsel %vm2118_vm14, %v2120_v53, %v2116_v34 }
 0xc54   : > { %v3988_v55 = vpop.eup %3168  ;;  %v2053_v57 = vmul.f32 1.442695, %v2045_v52  ;;  %v2122_v58 = vmul.f32 %v3163_v14, %v2121_v54 }
 0xc55   : > { %v2078_v59 = vsel %vm2020_vm10, %v3988_v55, 0.0 }
 0xc56   : > { %3170 = vpow2.f32 %v2053_v57  ;;  %2976 = vmatpush.xpose.msk.msra.mxu1 %vm2020_vm10, %v2122_v58  ;;  %2079 = vadd.xlane.f32.xlu1 %v2078_v59 }
 0xc59   : > { %v2044_v60 = vpop.xlane.xlu0 %2043 }
 0xc5a   : > { %v2052_v61 = vsub.f32 %v2019_v26, %v2044_v60 }
 0xc5c   : > { %v3993_v62 = vpop.eup %3170  ;;  %v2067_v63 = vmul.f32 1.442695, %v2052_v61 }
 0xc5d   : > { %v2069_v38 = vsel %vm2020_vm10, %v3993_v62, 0.0 }
 0xc5e   : > { %3172 = vpow2.f32 %v2067_v63  ;;  %2070 = vadd.xlane.f32.xlu2 %v2069_v38 }
 0xc61   : > { %v2041_v0 = vpop.xlane.xlu0 %2040 }
 0xc62   : > { %v2051_v37 = vsub.f32 %v2018_v23, %v2041_v0 }
 0xc64   : > { %v3997_v1 = vpop.eup %3172  ;;  %v2065_v2 = vmul.f32 1.442695, %v2051_v37 }
 0xc65   : > { %v2090_v3 = vsel %vm2020_vm10, %v3997_v1, 0.0 }
 0xc66   : > { %3174 = vpow2.f32 %v2065_v2  ;;  %2091 = vadd.xlane.f32.xlu0 %v2090_v3 }
 0xc69   : > { %v2038_v4 = vpop.xlane.xlu0 %2037 }
 0xc6a   : > { %v2050_v6 = vsub.f32 %v2017_v29, %v2038_v4  ;;  %v1743_v29 = vpop.f32.mrf.mxu2 }
 0xc6b   : > { %v1755_v31 = vadd.f32 %v3101_v24, %v1743_v29 }
 0xc6c   : > { %v4001_v8 = vpop.eup %3174  ;;  %v2063_v9 = vmul.f32 1.442695, %v2050_v6 }
 0xc6d   : > { %v2087_v10 = vsel %vm2020_vm10, %v4001_v8, 0.0 }
 0xc6e   : > { %3176 = vpow2.f32 %v2063_v9  ;;  %2088 = vadd.xlane.f32.xlu0 %v2087_v10 }
 0xc71   : > { %v2035_v12 = vpop.xlane.xlu0 %2034 }
 0xc72   : > { %v2049_v13 = vsub.f32 %v2016_v41, %v2035_v12  ;;  %v1746_v32 = vpop.f32.mrf.mxu2 }
 0xc73   : > { %v1756_v41 = vadd.f32 %v3101_v24, %v1746_v32 }
 0xc74   : > { %v4005_v47 = vpop.eup %3176  ;;  %v2061_v14 = vmul.f32 1.442695, %v2049_v13 }
 0xc75   : > { %v2084_v15 = vsel %vm2020_vm10, %v4005_v47, 0.0 }
 0xc76   : > { %3178 = vpow2.f32 %v2061_v14  ;;  %2085 = vadd.xlane.f32.xlu0 %v2084_v15 }
 0xc79   : > { %v2077_v16 = vpop.xlane.xlu0 %2076 }
 0xc7a   : > { %3180 = vrcp.f32 %v2077_v16  ;;  %v2134_v21 = vand.u32 2147483648, %v2077_v16  ;;  %v2132_v22 = vand.u32 2147483647, %v2077_v16  ;;  %vm2128_vm11 = vweird.f32 %v2077_v16 }
 0xc7c   : > { %v4009_v17 = vpop.eup %3178  ;;  %v2135_v23 = vor.u32 1.1754944e-38, %v2134_v21  ;;  %vm2133_vm1 = vcmp.eq.f32.partialorder %v2132_v22, 8.507059e+37 }
 0xc7d   : > { %v2081_v18 = vsel %vm2020_vm10, %v4009_v17, 0.0 }
 0xc7e   : > { %2082 = vadd.xlane.f32.xlu0 %v2081_v18 }
 0xc80   : > { %v3181_v20 = vpop.eup %3180 }
 0xc81   : > { %v2124_v27 = vmul.f32 %v3181_v20, %v2077_v16  ;;  %vm2129_vm15 = vweird.f32 %v3181_v20 }
 0xc82   : > { %vm2130_vm0 = vmor %vm2128_vm11, %vm2129_vm15 }
 0xc83   : > { %v2125_v19 = vsub.f32 1.0, %v2124_v27 }
 0xc85   : > { %v2126_v26 = vmul.f32 %v3181_v20, %v2125_v19 }
 0xc87   : > { %v2127_v5 = vadd.f32 %v3181_v20, %v2126_v26 }
 0xc89   : > { %v2131_v56 = vsel %vm2130_vm0, %v3181_v20, %v2127_v5 }
 0xc8a   : > { %v2136_v28 = vsel %vm2133_vm1, %v2135_v23, %v2131_v56 }
 0xc8b   : > { %v2137_v30 = vmul.f32 %v3984_v35, %v2136_v28 }
 0xc8d   : > { %2979 = vmatpush.xpose.msk.msra.mxu3 %vm2020_vm10, %v2137_v30 }
 0xc90   : > { %1804 = vxpose.xlu1.b32.start [1/2] (short) %v1755_v31, 128 }
 0xc98   : > { %1805 = vxpose.xlu1.b32.end [2/2] (short) %v1756_v41, 128 }
 0xcc9   : > { %v2080_v33 = vpop.xlane.xlu1 %2079 }
 0xcca   : > { %3182 = vrcp.f32 %v2080_v33  ;;  %v2149_v43 = vand.u32 2147483648, %v2080_v33  ;;  %v2147_v44 = vand.u32 2147483647, %v2080_v33  ;;  %vm2143_vm6 = vweird.f32 %v2080_v33 }
 0xccc   : > { %v2150_v46 = vor.u32 1.1754944e-38, %v2149_v43  ;;  %vm2148_vm8 = vcmp.eq.f32.partialorder %v2147_v44, 8.507059e+37 }
 0xcd0   : > { %v3183_v36 = vpop.eup %3182 }
 0xcd1   : > { %v2139_v25 = vmul.f32 %v3183_v36, %v2080_v33  ;;  %v2071_v39 = vpop.xlane.xlu2 %2070  ;;  %vm2144_vm2 = vweird.f32 %v3183_v36 }
 0xcd2   : > { %3184 = vrcp.f32 %v2071_v39  ;;  %vm2145_vm7 = vmor %vm2143_vm6, %vm2144_vm2  ;;  %v2104_v54 = vand.u32 2147483648, %v2071_v39  ;;  %v2102_v57 = vand.u32 2147483647, %v2071_v39  ;;  %vm2098_vm5 = vweird.f32 %v2071_v39 }
 0xcd3   : > { %v2140_v40 = vsub.f32 1.0, %v2139_v25 }
 0xcd4   : > { %v2105_v59 = vor.u32 1.1754944e-38, %v2104_v54  ;;  %vm2103_vm13 = vcmp.eq.f32.partialorder %v2102_v57, 8.507059e+37 }
 0xcd5   : > { %v2141_v42 = vmul.f32 %v3183_v36, %v2140_v40 }
 0xcd7   : > { %v2142_v45 = vadd.f32 %v3183_v36, %v2141_v42 }
 0xcd8   : > { %v3185_v35 = vpop.eup %3184 }
 0xcd9   : > { %v2094_v48 = vmul.f32 %v3185_v35, %v2071_v39  ;;  %v4018_v49 = vpop.xlane.xlu0 %2091  ;;  %v2146_v50 = vsel %vm2145_vm7, %v3183_v36, %v2142_v45  ;;  %vm2099_vm9 = vweird.f32 %v3185_v35 }
 0xcda   : > { %v2151_v51 = vsel %vm2148_vm8, %v2150_v46, %v2146_v50  ;;  %vm2100_vm12 = vmor %vm2098_vm5, %vm2099_vm9  ;;  %v2209_v46 = vand.u32 2147483648, %v4018_v49 }
 0xcdb   : > { %v2095_v53 = vsub.f32 1.0, %v2094_v48  ;;  %v2152_v34 = vmul.f32 %v3988_v55, %v2151_v51  ;;  %v2207_v48 = vand.u32 2147483647, %v4018_v49 }
 0xcdc   : > { %v2210_v51 = vor.u32 1.1754944e-38, %v2209_v46  ;;  %v3006_v46 = vld [vmem:[%s4293_s6 + $0x148] sm:$0xff] }
 0xcdd   : > { %v2096_v52 = vmul.f32 %v3185_v35, %v2095_v53  ;;  %2982 = vmatpush.xpose.msk.msra.mxu2 %vm2020_vm10, %v2152_v34 }
 0xcdf   : > { %v2097_v58 = vadd.f32 %v3185_v35, %v2096_v52 }
 0xce1   : > { %v2089_v60 = vpop.xlane.xlu0 %2088  ;;  %v2101_v61 = vsel %vm2100_vm12, %v3185_v35, %v2097_v58 }
 0xce2   : > { %3186 = vrcp.f32 %v2089_v60  ;;  %v2106_v63 = vsel %vm2103_vm13, %v2105_v59, %v2101_v61  ;;  %v2194_v3 = vand.u32 2147483648, %v2089_v60  ;;  %v2192_v6 = vand.u32 2147483647, %v2089_v60 }
 0xce3   : > { %v2107_v38 = vmul.f32 %v3993_v62, %v2106_v63  ;;  %vm2188_vm15 = vweird.f32 %v2089_v60 }
 0xce4   : > { %v2195_v12 = vor.u32 1.1754944e-38, %v2194_v3  ;;  %vm2193_vm0 = vcmp.eq.f32.partialorder %v2192_v6, 8.507059e+37 }
 0xce5   : > { %2973 = vmatpush.xpose.msk.msra.mxu0 %vm2020_vm10, %v2107_v38 }
 0xce8   : > { %v3187_v55 = vpop.eup %3186 }
 0xce9   : > { %v2184_v0 = vmul.f32 %v3187_v55, %v2089_v60  ;;  %v2086_v37 = vpop.xlane.xlu0 %2085  ;;  %vm2189_vm14 = vweird.f32 %v3187_v55 }
 0xcea   : > { %3188 = vrcp.f32 %v2086_v37  ;;  %vm2190_vm11 = vmor %vm2188_vm15, %vm2189_vm14  ;;  %v2179_v18 = vand.u32 2147483648, %v2086_v37  ;;  %v2177_v27 = vand.u32 2147483647, %v2086_v37  ;;  %vm2173_vm2 = vweird.f32 %v2086_v37 }
 0xceb   : > { %v2185_v2 = vsub.f32 1.0, %v2184_v0  ;;  %vm2203_vm14 = vweird.f32 %v4018_v49 }
 0xcec   : > { %v2180_v21 = vor.u32 1.1754944e-38, %v2179_v18  ;;  %vm2178_vm7 = vcmp.eq.f32.partialorder %v2177_v27, 8.507059e+37  ;;  %v2930_v18 = vld [vmem:[%s4295_s8 + $0x1e8] sm:$0xff]  ;;  %v2929_v27 = vld [vmem:[%s4295_s8 + $0x1e0] sm:$0xff] }
 0xced   : > { %v2186_v4 = vmul.f32 %v3187_v55, %v2185_v2 }
 0xcef   : > { %v2187_v9 = vadd.f32 %v3187_v55, %v2186_v4 }
 0xcf0   : > { %v3189_v10 = vpop.eup %3188 }
 0xcf1   : > { %v2191_v13 = vsel %vm2190_vm11, %v3187_v55, %v2187_v9  ;;  %v2169_v14 = vmul.f32 %v3189_v10, %v2086_v37  ;;  %vm2174_vm1 = vweird.f32 %v3189_v10  ;;  %v2083_v23 = vpop.xlane.xlu0 %2082  ;;  %vm2208_vm11 = vcmp.eq.f32.partialorder %v2207_v48, 8.507059e+37  ;;  %v3005_v48 = vld [vmem:[%s4293_s6 + $0x140] sm:$0xff] }
 0xcf2   : > { %v2196_v62 = vsel %vm2193_vm0, %v2195_v12, %v2191_v13  ;;  %vm2175_vm6 = vmor %vm2173_vm2, %vm2174_vm1  ;;  %3190 = vrcp.f32 %v2083_v23  ;;  %v2164_v30 = vand.u32 2147483648, %v2083_v23  ;;  %vm2158_vm9 = vweird.f32 %v2083_v23 }
 0xcf3   : > { %v2170_v15 = vsub.f32 1.0, %v2169_v14  ;;  %v2197_v16 = vmul.f32 %v4001_v8, %v2196_v62  ;;  %v2162_v31 = vand.u32 2147483647, %v2083_v23  ;;  %3192 = vrcp.f32 %v4018_v49  ;;  %v2932_v62 = vld [vmem:[%s4295_s8 + $0x1f8] sm:$0xff] }
 0xcf4   : > { %v2165_v41 = vor.u32 1.1754944e-38, %v2164_v30  ;;  %v2919_v30 = vld [vmem:[%s4295_s8 + $0x190] sm:$0xff] }
 0xcf5   : > { %v2171_v20 = vmul.f32 %v3189_v10, %v2170_v15  ;;  %2991 = vmatpush.xpose.msk.msrb.mxu3 %vm2020_vm10, %v2197_v16  ;;  %vm2163_vm12 = vcmp.eq.f32.partialorder %v2162_v31, 8.507059e+37  ;;  %v2931_v15 = vld [vmem:[%s4295_s8 + $0x1f0] sm:$0xff]  ;;  %v2918_v31 = vld [vmem:[%s4295_s8 + $0x188] sm:$0xff] }
 0xcf7   : > { %v2172_v19 = vadd.f32 %v3189_v10, %v2171_v20 }
 0xcf8   : > { %v3191_v8 = vpop.eup %3190 }
 0xcf9   : > { %v2176_v26 = vsel %vm2175_vm6, %v3189_v10, %v2172_v19  ;;  %v2154_v56 = vmul.f32 %v3191_v8, %v2083_v23  ;;  %vm2159_vm8 = vweird.f32 %v3191_v8  ;;  %v3193_v40 = vpop.eup %3192  ;;  %v2928_v19 = vld [vmem:[%s4295_s8 + $0x1d8] sm:$0xff]  ;;  %v2925_v23 = vld [vmem:[%s4295_s8 + $0x1c0] sm:$0xff] }
 0xcfa   : > { %v2181_v22 = vsel %vm2178_vm7, %v2180_v21, %v2176_v26  ;;  %vm2160_vm5 = vmor %vm2158_vm9, %vm2159_vm8  ;;  %v2199_v43 = vmul.f32 %v3193_v40, %v4018_v49  ;;  %vm2204_vm13 = vweird.f32 %v3193_v40  ;;  %v2927_v26 = vld [vmem:[%s4295_s8 + $0x1d0] sm:$0xff] }
 0xcfb   : > { %v2182_v5 = vmul.f32 %v4005_v47, %v2181_v22  ;;  %v2155_v24 = vsub.f32 1.0, %v2154_v56  ;;  %vm2205_vm15 = vmor %vm2203_vm14, %vm2204_vm13  ;;  %v2926_v22 = vld [vmem:[%s4295_s8 + $0x1c8] sm:$0xff]  ;;  %v2923_v56 = vld [vmem:[%s4295_s8 + $0x1b0] sm:$0xff] }
 0xcfc   : > { %v2200_v44 = vsub.f32 1.0, %v2199_v43 }
 0xcfd   : > { %2988 = vmatpush.xpose.msk.msrb.mxu1 %vm2020_vm10, %v2182_v5  ;;  %v2156_v28 = vmul.f32 %v3191_v8, %v2155_v24  ;;  %v2922_v24 = vld [vmem:[%s4295_s8 + $0x1a8] sm:$0xff] }
 0xcfe   : > { %v2201_v45 = vmul.f32 %v3193_v40, %v2200_v44 }
 0xcff   : > { %v2157_v29 = vadd.f32 %v3191_v8, %v2156_v28  ;;  %v2921_v28 = vld [vmem:[%s4295_s8 + $0x1a0] sm:$0xff] }
 0xd00   : > { %v2202_v35 = vadd.f32 %v3193_v40, %v2201_v45  ;;  %v3008_v45 = vld [vmem:[%s4293_s6 + $0x158] sm:$0xff] }
 0xd01   : > { %v2161_v32 = vsel %vm2160_vm5, %v3191_v8, %v2157_v29  ;;  %v2924_v8 = vld [vmem:[%s4295_s8 + $0x1b8] sm:$0xff] }
 0xd02   : > { %v2166_v33 = vsel %vm2163_vm12, %v2165_v41, %v2161_v32  ;;  %v2206_v53 = vsel %vm2205_vm15, %v3193_v40, %v2202_v35  ;;  %v2920_v29 = vld [vmem:[%s4295_s8 + $0x198] sm:$0xff]  ;;  %v2917_v32 = vld [vmem:[%s4295_s8 + $0x180] sm:$0xff]  ;;  %v3109_v41 = vld [vmem:[%s4290_s3 + $0x11] ss:$0 sm:$0xff] }
 0xd03   : > { %v2167_v47 = vmul.f32 %v4009_v17, %v2166_v33  ;;  %v2211_v34 = vsel %vm2208_vm11, %v2210_v51, %v2206_v53  ;;  %v3007_v35 = vld [vmem:[%s4293_s6 + $0x150] sm:$0xff]  ;;  %v3002_v51 = vld [vmem:[%s4293_s6 + $0x128] sm:$0xff] }
 0xd04   : > { %v2212_v54 = vmul.f32 %v3997_v1, %v2211_v34  ;;  %v3003_v53 = vld [vmem:[%s4293_s6 + $0x130] sm:$0xff]  ;;  %v3001_v34 = vld [vmem:[%s4293_s6 + $0x120] sm:$0xff] }
 0xd34   : > { %v1820_v36 = vpop.trf.xlu1 }
 0xd35   : > { %2974 = vmatmul.msk.f32.vlgmr.msra.gmra.mxu0 %vm2020_vm10, %v1820_v36 }
 0xd36   : > { %2985 = vmatpush.xpose.msk.msra.mxu0 %vm2020_vm10, %v2167_v47 }
 0xd3c   : > { %v1821_v25 = vpop.trf.xlu1 }
 0xd3d   : > { %2975 = vmatmul.msk.f32.gmra.mxu0 %vm2020_vm10, %v1821_v25  ;;  %v3012_v25 = vld [vmem:[%s4293_s6 + $0x178] sm:$0xff] }
 0xd44   : > { %v1822_v39 = vpop.trf.xlu1 }
 0xd45   : > { %2977 = vmatmul.msk.f32.vlgmr.msra.gmra.mxu1 %vm2020_vm10, %v1822_v39  ;;  %v3011_v39 = vld [vmem:[%s4293_s6 + $0x170] sm:$0xff] }
 0xd46   : > { %2578 = vmatpush.msra.mxu1 %v3012_v25  ;;  %v2658_v25 = vld [vmem:[%s4293_s6 + $0x38] sm:$0xff] }
 0xd48   : > { %2579 = vmatpush.msra.mxu1 %v3011_v39  ;;  %v2657_v39 = vld [vmem:[%s4293_s6 + $0x30] sm:$0xff] }
 0xd4c   : > { %v1823_v42 = vpop.trf.xlu1 }
 0xd4d   : > { %2978 = vmatmul.msk.f32.gmra.mxu1 %vm2020_vm10, %v1823_v42 }
 0xd54   : > { %v1824_v17 = vpop.trf.xlu1 }
 0xd55   : > { %2980 = vmatmul.msk.f32.vlgmr.msra.gmra.mxu3 %vm2020_vm10, %v1824_v17  ;;  %v3009_v17 = vld [vmem:[%s4293_s6 + $0x160] sm:$0xff] }
 0xd5c   : > { %v1825_v50 = vpop.trf.xlu1 }
 0xd5d   : > { %2981 = vmatmul.msk.f32.gmra.mxu3 %vm2020_vm10, %v1825_v50  ;;  %v3004_v50 = vld [vmem:[%s4293_s6 + $0x138] sm:$0xff] }
 0xd64   : > { %v1826_v52 = vpop.trf.xlu1 }
 0xd65   : > { %2983 = vmatmul.msk.f32.vlgmr.msra.gmra.mxu2 %vm2020_vm10, %v1826_v52  ;;  %v3000_v52 = vld [vmem:[%s4293_s6 + $0x118] sm:$0xff] }
 0xd66   : > { %2994 = vmatpush.xpose.msk.msra.mxu2 %vm2020_vm10, %v2212_v54  ;;  %v2999_v54 = vld [vmem:[%s4293_s6 + $0x110] sm:$0xff] }
 0xd6c   : > { %v1827_v57 = vpop.trf.xlu1 }
 0xd6d   : > { %2984 = vmatmul.msk.f32.gmra.mxu2 %vm2020_vm10, %v1827_v57  ;;  %v2998_v57 = vld [vmem:[%s4293_s6 + $0x108] sm:$0xff] }
 0xd74   : > { %v1828_v58 = vpop.trf.xlu1 }
 0xd75   : > { %2986 = vmatmul.msk.f32.vlgmr.msra.gmra.mxu0 %vm2020_vm10, %v1828_v58  ;;  %v2997_v58 = vld [vmem:[%s4293_s6 + $0x100] sm:$0xff] }
 0xd7c   : > { %v1829_v49 = vpop.trf.xlu1 }
 0xd7d   : > { %2987 = vmatmul.msk.f32.gmra.mxu0 %vm2020_vm10, %v1829_v49  ;;  %v3020_v49 = vld [vmem:[%s4294_s7 + $0xf8] sm:$0xff] }
 0xd7e   : > { %2612 = vmatpush.msra.mxu3 %v3020_v49  ;;  %v3114_v49 = vld [vmem:[%s4290_s3 + $0x15] ss:$0 sm:$0xff] }
 0xd84   : > { %v1830_v59 = vpop.trf.xlu1 }
 0xd85   : > { %2989 = vmatmul.msk.f32.vlgmr.msrb.gmra.mxu1 %vm2020_vm10, %v1830_v59  ;;  %v3019_v59 = vld [vmem:[%s4294_s7 + $0xf0] sm:$0xff] }
 0xd86   : > { %2613 = vmatpush.msra.mxu3 %v3019_v59 }
 0xd8c   : > { %v1831_v60 = vpop.trf.xlu1 }
 0xd8d   : > { %2990 = vmatmul.msk.f32.gmra.mxu1 %vm2020_vm10, %v1831_v60  ;;  %v3018_v60 = vld [vmem:[%s4294_s7 + $0xe8] sm:$0xff] }
 0xd8e   : > { %2614 = vmatpush.msra.mxu3 %v3018_v60 }
 0xd94   : > { %v1832_v1 = vpop.trf.xlu1 }
 0xd95   : > { %2992 = vmatmul.msk.f32.vlgmr.msrb.gmra.mxu3 %vm2020_vm10, %v1832_v1 }
 0xd9c   : > { %v1833_v61 = vpop.trf.xlu1 }
 0xd9d   : > { %2993 = vmatmul.msk.f32.gmra.mxu3 %vm2020_vm10, %v1833_v61 }
 0xda4   : > { %v1834_v63 = vpop.trf.xlu1 }
 0xda5   : > { %2995 = vmatmul.msk.f32.vlgmr.msra.gmra.mxu2 %vm2020_vm10, %v1834_v63  ;;  %v3017_v63 = vld [vmem:[%s4294_s7 + $0xe0] sm:$0xff] }
 0xda6   : > { %2615 = vmatpush.msra.mxu3 %v3017_v63  ;;  %v3026_v63 = vld [vmem:[%s4294_s7 + $0x120] sm:$0xff] }
 0xdac   : > { %v1835_v38 = vpop.trf.xlu1 }
 0xdad   : > { %2996 = vmatmul.msk.f32.gmra.mxu2 %vm2020_vm10, %v1835_v38 }
 0xdb2   : > { %v2239_v2 = vpop.f32.mrf.mxu0 }
 0xdba   : > { %v2242_v10 = vpop.f32.mrf.mxu0 }
 0xdc2   : > { %v2271_v37 = vpop.f32.mrf.mxu1 }
 0xdca   : > { %v2274_v6 = vpop.f32.mrf.mxu1 }
 0xdd8   : > { %v2303_v0 = vpop.f32.mrf.mxu3 }
 0xde0   : > { %v2306_v4 = vpop.f32.mrf.mxu3 }
 0xde8   : > { %v2335_v55 = vpop.f32.mrf.mxu2 }
 0xdf0   : > { %v2338_v3 = vpop.f32.mrf.mxu2 }
 0xdf2   : > { %v2367_v16 = vpop.f32.mrf.mxu0 }
 0xdfa   : > { %v2370_v5 = vpop.f32.mrf.mxu0 }
 0xe02   : > { %v2399_v13 = vpop.f32.mrf.mxu1 }
 0xe0a   : > { %v2402_v21 = vpop.f32.mrf.mxu1 }
 0xe18   : > { %v2431_v12 = vpop.f32.mrf.mxu3 }
 0xe20   : > { %v2434_v20 = vpop.f32.mrf.mxu3 }
 0xe28   : > { %v2463_v9 = vpop.f32.mrf.mxu2 }
 0xe30   : > { %v2466_v14 = vpop.f32.mrf.mxu2 }
 0xe31   : > { %3036 = vmatpush.lsf.msrb.mxu0 %v2466_v14 }
 0xe33   : > { %2503 = vmatpush.msra.mxu0 %v2932_v62 }
 0xe35   : > { %3037 = vmatpush.lsf.msrb.mxu0 %v2463_v9  ;;  %v3110_v9 = vld [vmem:[%s4290_s3 + $0x12] ss:$0 sm:$0xff] }
 0xe37   : > { %2504 = vmatpush.msra.mxu0 %v2931_v15  ;;  %v3015_v15 = vld [vmem:[%s4294_s7 + $0xd0] sm:$0xff] }
 0xe39   : > { %3038 = vmatpush.lsf.msrb.mxu0 %v2434_v20  ;;  %v3112_v20 = vld [vmem:[%s4291_s4 + $0x4] ss:$0 sm:$0xff] }
 0xe3b   : > { %2505 = vmatpush.msra.mxu0 %v2930_v18  ;;  %v3013_v18 = vld [vmem:[%s4294_s7 + $0xc0] sm:$0xff] }
 0xe3d   : > { %3039 = vmatpush.lsf.msrb.mxu0 %v2431_v12 }
 0xe3f   : > { %2506 = vmatpush.msra.mxu0 %v2929_v27 }
 0xe41   : > { %3040 = vmatpush.lsf.msrb.mxu0 %v2402_v21 }
 0xe43   : > { %2507 = vmatpush.msra.mxu0 %v2928_v19 }
 0xe45   : > { %3041 = vmatpush.lsf.msrb.mxu0 %v2399_v13  ;;  %v3111_v13 = vld [vmem:[%s4290_s3 + $0x13] ss:$0 sm:$0xff] }
 0xe47   : > { %2508 = vmatpush.msra.mxu0 %v2927_v26  ;;  %v3113_v26 = vld [vmem:[%s4290_s3 + $0x14] ss:$0 sm:$0xff] }
 0xe49   : > { %3042 = vmatpush.lsf.msrb.mxu0 %v2370_v5 }
 0xe4b   : > { %2509 = vmatpush.msra.mxu0 %v2926_v22 }
 0xe4d   : > { %3043 = vmatpush.lsf.msrb.mxu0 %v2367_v16  ;;  %v3014_v16 = vld [vmem:[%s4294_s7 + $0xc8] sm:$0xff] }
 0xe4f   : > { %2510 = vmatpush.msra.mxu0 %v2925_v23 }
 0xe51   : > { %3044 = vmatpush.lsf.msrb.mxu0 %v2338_v3 }
 0xe53   : > { %2511 = vmatpush.msra.mxu0 %v2924_v8  ;;  %v2666_v8 = vld [vmem:[%s4293_s6 + $0x78] sm:$0xff] }
 0xe54   : > { %2679 = vmatpush.msra.mxu2 %v2666_v8 }
 0xe55   : > { %3045 = vmatpush.lsf.msrb.mxu0 %v2335_v55  ;;  %v3016_v55 = vld [vmem:[%s4294_s7 + $0xd8] sm:$0xff] }
 0xe56   : > { %2616 = vmatpush.msra.mxu3 %v3016_v55  ;;  %v3024_v55 = vld [vmem:[%s4294_s7 + $0x110] sm:$0xff] }
 0xe57   : > { %2512 = vmatpush.msra.mxu0 %v2923_v56  ;;  %v2665_v56 = vld [vmem:[%s4293_s6 + $0x70] sm:$0xff] }
 0xe58   : > { %2617 = vmatpush.msra.mxu3 %v3015_v15  ;;  %2680 = vmatpush.msra.mxu2 %v2665_v56 }
 0xe59   : > { %3046 = vmatpush.lsf.msrb.mxu0 %v2306_v4 }
 0xe5a   : > { %2618 = vmatpush.msra.mxu3 %v3014_v16 }
 0xe5b   : > { %2513 = vmatpush.msra.mxu0 %v2922_v24 }
 0xe5c   : > { %2619 = vmatpush.msra.mxu3 %v3013_v18 }
 0xe5d   : > { %3047 = vmatpush.lsf.msrb.mxu0 %v2303_v0 }
 0xe5f   : > { %2514 = vmatpush.msra.mxu0 %v2921_v28 }
 0xe61   : > { %3048 = vmatpush.lsf.msrb.mxu0 %v2274_v6 }
 0xe63   : > { %2515 = vmatpush.msra.mxu0 %v2920_v29 }
 0xe65   : > { %3049 = vmatpush.lsf.msrb.mxu0 %v2271_v37 }
 0xe67   : > { %2516 = vmatpush.msra.mxu0 %v2919_v30 }
 0xe69   : > { %3050 = vmatpush.lsf.msrb.mxu0 %v2242_v10 }
 0xe6b   : > { %2517 = vmatpush.msra.mxu0 %v2918_v31  ;;  %v2664_v31 = vld [vmem:[%s4293_s6 + $0x68] sm:$0xff] }
 0xe6c   : > { %2681 = vmatpush.msra.mxu2 %v2664_v31 }
 0xe6d   : > { %3051 = vmatpush.lsf.msrb.mxu0 %v2239_v2 }
 0xe6e   : > { %3052 = vllmr.1.mxu0 }
 0xe6f   : > { %2518 = vmatpush.msra.mxu0 %v2917_v32  ;;  %v2663_v32 = vld [vmem:[%s4293_s6 + $0x60] sm:$0xff] }
 0xe70   : > { %2682 = vmatpush.msra.mxu2 %v2663_v32 }
 0xe8f   : > { %3053 = vmatmul.lmr.bf16.vlgmr.msra.gmra.1.mxu0 }
 0xf0c   : > { %v2520_v33 = vpop.f32.mrf.mxu0 }
 0xf0d   : > { %v2521_v36 = vadd.f32 %v3109_v41, %v2520_v33  ;;  %v2662_v41 = vld [vmem:[%s4293_s6 + $0x58] sm:$0xff]  ;;  %v2661_v33 = vld [vmem:[%s4293_s6 + $0x50] sm:$0xff] }
 0xf0e   : > { %2683 = vmatpush.msra.mxu2 %v2662_v41 }
 0xf0f   : > { %v2523_v47 = vadd.f32 %v2521_v36, %v3680_v7  ;;  %v3010_v7 = vld [vmem:[%s4293_s6 + $0x168] sm:$0xff] }
 0xf10   : > { %2580 = vmatpush.msra.mxu1 %v3010_v7  ;;  %2684 = vmatpush.msra.mxu2 %v2661_v33  ;;  %v2660_v36 = vld [vmem:[%s4293_s6 + $0x48] sm:$0xff] }
 0xf11   : > { %2526 = vadd.xlane.f32.xlu0 %v2523_v47  ;;  %v2652_v7 = vld [vmem:[%s4293_s6 + $0x8] sm:$0xff] }
 0xf12   : > { %2581 = vmatpush.msra.mxu1 %v3009_v17  ;;  %2685 = vmatpush.msra.mxu2 %v2660_v36  ;;  %v2651_v17 = vld [vmem:[%s4293_s6] sm:$0xff] }
 0xf14   : > { %2582 = vmatpush.msra.mxu1 %v3008_v45  ;;  %v3029_v45 = vld [vmem:[%s4294_s7 + $0x138] sm:$0xff] }
 0xf15   : > { %2712 = vmatpush.msrb.mxu3 %v3029_v45 }
 0xf16   : > { %2583 = vmatpush.msra.mxu1 %v3007_v35  ;;  %v3028_v35 = vld [vmem:[%s4294_s7 + $0x130] sm:$0xff] }
 0xf17   : > { %2713 = vmatpush.msrb.mxu3 %v3028_v35 }
 0xf18   : > { %2584 = vmatpush.msra.mxu1 %v3006_v46  ;;  %v3027_v46 = vld [vmem:[%s4294_s7 + $0x128] sm:$0xff] }
 0xf19   : > { %2714 = vmatpush.msrb.mxu3 %v3027_v46 }
 0xf1a   : > { %2585 = vmatpush.msra.mxu1 %v3005_v48 }
 0xf1b   : > { %2715 = vmatpush.msrb.mxu3 %v3026_v63 }
 0xf1c   : > { %2586 = vmatpush.msra.mxu1 %v3004_v50 }
 0xf1e   : > { %2587 = vmatpush.msra.mxu1 %v3003_v53 }
 0xf20   : > { %2588 = vmatpush.msra.mxu1 %v3002_v51 }
 0xf22   : > { %2589 = vmatpush.msra.mxu1 %v3001_v34 }
 0xf24   : > { %2590 = vmatpush.msra.mxu1 %v3000_v52 }
 0xf26   : > { %2591 = vmatpush.msra.mxu1 %v2999_v54 }
 0xf28   : > { %2592 = vmatpush.msra.mxu1 %v2998_v57 }
 0xf2a   : > { %2593 = vmatpush.msra.mxu1 %v2997_v58 }
 0xf84   : > { %v2527_v40 = vpop.xlane.xlu0 %2526 }
 0xf85   : > { %v2528_v42 = vmul.f32 %v2527_v40, %v3813_v11  ;;  %v2656_v40 = vld [vmem:[%s4293_s6 + $0x28] sm:$0xff] }
 0xf87   : > { %v2529_v43 = vsub.f32 %v2523_v47, %v2528_v42  ;;  %v2659_v47 = vld [vmem:[%s4293_s6 + $0x40] sm:$0xff] }
 0xf88   : > { %2686 = vmatpush.msra.mxu2 %v2659_v47  ;;  %v2655_v42 = vld [vmem:[%s4293_s6 + $0x20] sm:$0xff] }
 0xf89   : > { %v2530_v44 = vmul.f32 %v2529_v43, %v2529_v43 }
 0xf8a   : > { %2687 = vmatpush.msra.mxu2 %v2658_v25 }
 0xf8b   : > { %2531 = vadd.xlane.f32.xlu0 %v2530_v44  ;;  %v2653_v44 = vld [vmem:[%s4293_s6 + $0x10] sm:$0xff] }
 0xf8c   : > { %2688 = vmatpush.msra.mxu2 %v2657_v39 }
 0xf8e   : > { %2689 = vmatpush.msra.mxu2 %v2656_v40 }
 0xf90   : > { %2690 = vmatpush.msra.mxu2 %v2655_v42 }
 0xffe   : > { %v2532_v1 = vpop.xlane.xlu0 %2531 }
 0xfff   : > { %v2533_v61 = vmul.f32 %v2532_v1, %v3813_v11 }
0x1001   : > { %v2534_v38 = vadd.f32 1e-05, %v2533_v61 }
0x1003   : > { %3194 = vrsqrt.f32 %v2534_v38  ;;  %vm2541_vm0 = vweird.f32 %v2534_v38 }
0x1009   : > { %v3195_v0 = vpop.eup %3194 }
0x100a   : > { %v2536_v37 = vmul.f32 %v3195_v0, %v2534_v38  ;;  %vm2542_vm10 = vweird.f32 %v3195_v0  ;;  %v3025_v38 = vld [vmem:[%s4294_s7 + $0x118] sm:$0xff] }
0x100b   : > { %vm2543_vm1 = vmor %vm2541_vm0, %vm2542_vm10  ;;  %2716 = vmatpush.msrb.mxu3 %v3025_v38 }
0x100c   : > { %v2537_v2 = vmul.f32 %v3195_v0, %v2536_v37  ;;  %v3022_v37 = vld [vmem:[%s4294_s7 + $0x100] sm:$0xff] }
0x100d   : > { %2717 = vmatpush.msrb.mxu3 %v3024_v55 }
0x100e   : > { %v2538_v3 = vmul.f32 0.5, %v2537_v2  ;;  %v3116_v2 = vld [vmem:[%s4291_s4 + $0x2] ss:$0 sm:$0xff] }
0x1010   : > { %v2539_v4 = vsub.f32 1.5, %v2538_v3 }
0x1012   : > { %v2540_v6 = vmul.f32 %v3195_v0, %v2539_v4 }
0x1014   : > { %v2544_v10 = vsel %vm2543_vm1, %v3195_v0, %v2540_v6  ;;  %v3023_v0 = vld [vmem:[%s4294_s7 + $0x108] sm:$0xff] }
0x1015   : > { %v2545_v12 = vmul.f32 %v2544_v10, %v2529_v43  ;;  %v2654_v43 = vld [vmem:[%s4293_s6 + $0x18] sm:$0xff]  ;;  %2718 = vmatpush.msrb.mxu3 %v3023_v0 }
0x1016   : > { %2691 = vmatpush.msra.mxu2 %v2654_v43 }
0x1017   : > { %v2547_v14 = vmul.f32 %v3110_v9, %v2545_v12  ;;  %2719 = vmatpush.msrb.mxu3 %v3022_v37  ;;  %v3117_v9 = vld [vmem:[%s4290_s3 + $0x2] ss:$0 sm:$0xff] }
0x1018   : > { %2692 = vmatpush.msra.mxu2 %v2653_v44 }
0x1019   : > { %v2549_v62 = vadd.f32 %v3111_v13, %v2547_v14 }
0x101a   : > { %2693 = vmatpush.msra.mxu2 %v2652_v7 }
0x101b   : > { %2594 = vmatmul.f32.vlgmr.msra.gmra.mxu1 %v2549_v62 }
0x101c   : > { %2694 = vmatpush.msra.mxu2 %v2651_v17 }
0x1098   : > { %v2595_v27 = vpop.f32.mrf.mxu1 }
0x1099   : > { %v2596_v19 = vadd.f32 %v3112_v20, %v2595_v27 }
0x109b   : > { %v2598_v21 = vmax.f32 %v2596_v19, 0.0 }
0x109d   : > { %3021 = vmatmul.msk.f32.vlgmr.msra.gmra.mxu3 %vm446_vm4, %v2598_v21 }
0x1120   : > { %v2621_v22 = vpop.f32.mrf.mxu3 }
0x1121   : > { %v2622_v5 = vadd.f32 %v3113_v26, %v2621_v22 }
0x1123   : > { %v2624_v23 = vadd.f32 %v2622_v5, %v2549_v62 }
0x1125   : > { %2627 = vadd.xlane.f32.xlu2 %v2624_v23 }
0x1198   : > { %v2628_v24 = vpop.xlane.xlu2 %2627 }
0x1199   : > { %v2629_v28 = vmul.f32 %v2628_v24, %v3813_v11 }
0x119b   : > { %v2630_v29 = vsub.f32 %v2624_v23, %v2629_v28 }
0x119d   : > { %v2631_v30 = vmul.f32 %v2630_v29, %v2630_v29 }
0x119f   : > { %2632 = vadd.xlane.f32.xlu0 %v2631_v30 }
0x1212   : > { %v2633_v48 = vpop.xlane.xlu0 %2632 }
0x1213   : > { %v2634_v50 = vmul.f32 %v2633_v48, %v3813_v11  ;;  %v3115_v11 = vld [vmem:[%s4290_s3 + $0x16] ss:$0 sm:$0xff] }
0x1215   : > { %v2635_v53 = vadd.f32 1e-05, %v2634_v50 }
0x1217   : > { %3196 = vrsqrt.f32 %v2635_v53  ;;  %vm2642_vm6 = vweird.f32 %v2635_v53 }
0x121d   : > { %v3197_v51 = vpop.eup %3196 }
0x121e   : > { %v2637_v34 = vmul.f32 %v3197_v51, %v2635_v53  ;;  %vm2643_vm2 = vweird.f32 %v3197_v51 }
0x121f   : > { %vm2644_vm7 = vmor %vm2642_vm6, %vm2643_vm2 }
0x1220   : > { %v2638_v52 = vmul.f32 %v3197_v51, %v2637_v34 }
0x1222   : > { %v2639_v54 = vmul.f32 0.5, %v2638_v52 }
0x1224   : > { %v2640_v57 = vsub.f32 1.5, %v2639_v54 }
0x1226   : > { %v2641_v58 = vmul.f32 %v3197_v51, %v2640_v57 }
0x1228   : > { %v2645_v59 = vsel %vm2644_vm7, %v3197_v51, %v2641_v58 }
0x1229   : > { %v2646_v60 = vmul.f32 %v2645_v59, %v2630_v29 }
0x122b   : > { %v2648_v1 = vmul.f32 %v3114_v49, %v2646_v60 }
0x122d   : > { %v2650_v61 = vadd.f32 %v3115_v11, %v2648_v1 }
0x122f   : > { %2695 = vmatmul.f32.vlgmr.msra.gmra.mxu2 %v2650_v61 }
0x12b2   : > { %v2696_v3 = vpop.f32.mrf.mxu2 }
0x12b3   : > { %v2697_v4 = vadd.f32 %v3116_v2, %v2696_v3 }
0x12b5   : > { %3198 = vtanh.f32 %v2697_v4 }
0x12bb   : > { %v3199_v6 = vpop.eup %3198 }
0x12bc   : > { %3030 = vmatmul.msk.f32.vlgmr.msrb.gmra.mxu3 %vm446_vm4, %v3199_v6 }
0x133f   : > { %v2721_v10 = vpop.f32.mrf.mxu3 }
0x1340   : > { %v2722_v12 = vadd.f32 %v3117_v9, %v2721_v10 }
0x1342   : > { %2724 = vst.msk [vmem:[%s388_s16] sm:$0xff] %vm518_vm3, %v2722_v12 }
0x1343 PF: > { %s20_s13 = sadd.s32 1, %s3207_s13  }
0x1344   : > { %p17_p4 = scmp.ge.s32.totalorder %s20_s13, 4  }
0x1346   :  { %19 = sbr.rel (!%p17_p4) target bundleno = 1 (0x1), region = 106 }

</bundles_post_ra>
